<compile_context>
chip_gen: v7x
topology: tpu7x:2x2x1
jax: 0.10.0
libtpu: 0.0.40
codegen_flags: <defaults>
</compile_context>

<pallas_src>
import functools

import jax
import jax.numpy as jnp
from jax.experimental import pallas as pl
from jax.experimental.pallas import tpu as pltpu


def _flatten_last2(x3):
    """Row-major flatten of the minor two dims, (TB, N, K) -> (TB, N*K).

    Implemented as N width-1 sublane slices concatenated along the lane axis
    (last dim preserved in every reshape), avoiding a minor-dim reshape.
    """
    tb, n, k = x3.shape
    flat3 = jnp.concatenate([x3[:, i:i + 1, :] for i in range(n)], axis=2)
    return flat3.reshape(tb, n * k)


# -----------------------------------------------------------------------------
# Fused Pallas kernel: all GAT layers + feed-forward encoder, one batch tile
# of TB elements per grid step (grid axis is "parallel" for megacore sharding).
# -----------------------------------------------------------------------------
def _generator_kernel(x_ref,
                      fwlT_ref, fwrT_ref, fblT_ref, faT_ref, fbiasT_ref,
                      twl_ref, twr_ref, tbl_ref, ta_ref, tbias_ref,
                      w1_ref, b1_ref, w2_ref, b2_ref,
                      o_ref, *, n_layers, alpha):
    """Refs (per grid step c, TB = batch tile):

    x_ref     : (TB, N, K)        input window tile
    fwlT/fwrT : (L, Ef, N)        feature-GAT lin weight halves (pre-transposed)
    fblT, faT : (L, Ef, 1)        feature-GAT lin bias / attention vector
    fbiasT    : (L, K, K)         feature-GAT attention bias, [q, p] order
    twl/twr   : (L, K, Et)        temporal-GAT lin weight halves
    tbl, ta   : (L, 1, Et)        temporal-GAT lin bias / attention vector
    tbias     : (L, N, N)         temporal-GAT attention bias
    w1_ref    : (D, F)            FF layer-1 weight (D = N*K)
    b1_ref    : (1, F)            FF layer-1 bias
    w2_ref    : (F, D)            FF layer-2 weight
    b2_ref    : (1, D)            FF layer-2 bias
    o_ref     : (TB, D)           lane-dense flattened output tile
    """
    f32 = jnp.float32
    x = x_ref[...].astype(f32)                     # (TB, N, K)
    TB, N, K = x.shape
    Ef = fwlT_ref.shape[1]
    Et = twl_ref.shape[2]

    x0_flat = _flatten_last2(x)                    # (TB, D) residual, no HBM re-read

    for i in range(n_layers):                      # static, unrolled
        # ---------------- feature-oriented GAT (nodes = features) ----------
        # leftT[b, e, p] = sum_n fwl[n, e] * x[b, n, p]  (feature dim p stays
        # in lanes, so no transposes are needed anywhere in this block).
        wl = jnp.broadcast_to(fwlT_ref[i], (TB, Ef, N))
        wr = jnp.broadcast_to(fwrT_ref[i], (TB, Ef, N))
        leftT = jnp.einsum('ben,bnk->bek', wl, x, preferred_element_type=f32)
        rightT = jnp.einsum('ben,bnk->bek', wr, x, preferred_element_type=f32)
        fbl = fblT_ref[i][None]                    # (1, Ef, 1)
        fa = faT_ref[i][None]                      # (1, Ef, 1)
        fbias_t = fbiasT_ref[i]                    # (K, K)  [q, p]

        # Streaming over key-node q: never materializes (TB, K, K, Ef).
        e_list = []
        for q in range(K):
            g = leftT + rightT[:, :, q:q + 1] + fbl          # (TB, Ef, K)
            g = jnp.where(g > 0, g, alpha * g)               # LeakyReLU
            e_q = jnp.sum(g * fa, axis=1, keepdims=True)     # (TB, 1, K)
            e_list.append(e_q + fbias_t[q:q + 1, :][None])
        m = e_list[0]
        for q in range(1, K):
            m = jnp.maximum(m, e_list[q])
        p_list = [jnp.exp(e - m) for e in e_list]
        den = p_list[0]
        for q in range(1, K):
            den = den + p_list[q]
        # out[b, n, p] = sigmoid( sum_q attn[b, p, q] * x[b, n, q] )
        num = p_list[0] * x[:, :, 0:1]
        for q in range(1, K):
            num = num + p_list[q] * x[:, :, q:q + 1]
        x = jax.nn.sigmoid(num / den)                        # (TB, N, K)

        # ---------------- time-oriented GAT (nodes = timestamps) -----------
        # Large-M projection: (TB*N, K) @ (K, Et).
        x2 = x.reshape(TB * N, K)
        left = jnp.dot(x2, twl_ref[i], preferred_element_type=f32).reshape(TB, N, Et)
        right = jnp.dot(x2, twr_ref[i], preferred_element_type=f32).reshape(TB, N, Et)
        tbl = tbl_ref[i][None]                     # (1, 1, Et)
        ta = ta_ref[i][None]                       # (1, 1, Et)
        tbias = tbias_ref[i]                       # (N, N)

        e_list = []
        for j in range(N):
            g = left + right[:, j:j + 1, :] + tbl            # (TB, N, Et)
            g = jnp.where(g > 0, g, alpha * g)
            e_j = jnp.sum(g * ta, axis=-1, keepdims=True)    # (TB, N, 1)
            e_list.append(e_j + tbias[:, j:j + 1][None])
        m = e_list[0]
        for j in range(1, N):
            m = jnp.maximum(m, e_list[j])
        p_list = [jnp.exp(e - m) for e in e_list]
        den = p_list[0]
        for j in range(1, N):
            den = den + p_list[j]
        # out[b, i, k] = sigmoid( sum_j attn[b, i, j] * x[b, j, k] )
        num = p_list[0] * x[:, 0:1, :]
        for j in range(1, N):
            num = num + p_list[j] * x[:, j:j + 1, :]
        x = jax.nn.sigmoid(num / den)                        # (TB, N, K)

    # ---------------- feed-forward encoder + residual -----------------------
    xf = _flatten_last2(x)                                   # (TB, D)
    h = jnp.dot(xf, w1_ref[...], preferred_element_type=f32) + b1_ref[...]
    h = jnp.maximum(h, 0.0)
    y = jnp.dot(h, w2_ref[...], preferred_element_type=f32) + b2_ref[...]
    o_ref[...] = (y + x0_flat).astype(o_ref.dtype)           # (TB, D)


# -----------------------------------------------------------------------------
# Wrapper: one pallas_call for the whole forward pass.
# -----------------------------------------------------------------------------
def generator_forward(params, x, *, n_layers, alpha, batch_tile=128):
    B, N, K = x.shape
    D = N * K
    L = n_layers
    Ef = params["fwl"].shape[-1]
    Et = params["twl"].shape[-1]
    F = params["w1"].shape[-1]

    # Batch tile: big enough to amortize per-step overhead, small enough to
    # keep intermediates spill-free (logits are streamed, so VMEM stays tiny
    # even on v7x's 64 MiB); multiple grid steps keep both v7x TCs busy.
    TB = min(batch_tile, B)
    num_chunks = pl.cdiv(B, TB)
    B_pad = num_chunks * TB
    x_in = jnp.pad(x, ((0, B_pad - B), (0, 0), (0, 0))) if B_pad != B else x

    # Host-side (free) re-orientations so the kernel never transposes.
    fwlT = jnp.swapaxes(params["fwl"], 1, 2)       # (L, Ef, N)
    fwrT = jnp.swapaxes(params["fwr"], 1, 2)       # (L, Ef, N)
    fblT = jnp.swapaxes(params["fbl"], 1, 2)       # (L, Ef, 1)
    faT = jnp.swapaxes(params["fa"], 1, 2)         # (L, Ef, 1)
    fbiasT = jnp.swapaxes(params["fbias"], 1, 2)   # (L, K, K)  [q, p]

    kernel = functools.partial(_generator_kernel, n_layers=n_layers, alpha=alpha)

    weight_bytes = 4 * sum(int(p.size) for p in params.values())
    per_elem_flops = (
        L * (4 * Ef * N * K                        # feature projections
             + K * K * (4 * Ef + 4)                # feature logits
             + 2 * K * K * N                       # feature aggregation
             + 4 * N * K * Et                      # temporal projections
             + N * N * (4 * Et + 4)                # temporal logits
             + 2 * N * N * K)                      # temporal aggregation
        + 4 * D * F)                               # feed-forward
    cost = pl.CostEstimate(
        flops=B_pad * per_elem_flops,
        transcendentals=B_pad * (L * (K * K + N * N + 2 * N * K)),
        bytes_accessed=8 * B_pad * D + num_chunks * weight_bytes)

    const3 = lambda c: (0, 0, 0)
    const2 = lambda c: (0, 0)
    out_flat = pl.pallas_call(
        kernel,
        out_shape=jax.ShapeDtypeStruct((B_pad, D), jnp.float32),
        grid=(num_chunks,),
        in_specs=[
            pl.BlockSpec((TB, N, K), lambda c: (c, 0, 0)),   # x
            pl.BlockSpec((L, Ef, N), const3),                # fwlT
            pl.BlockSpec((L, Ef, N), const3),                # fwrT
            pl.BlockSpec((L, Ef, 1), const3),                # fblT
            pl.BlockSpec((L, Ef, 1), const3),                # faT
            pl.BlockSpec((L, K, K), const3),                 # fbiasT
            pl.BlockSpec((L, K, Et), const3),                # twl
            pl.BlockSpec((L, K, Et), const3),                # twr
            pl.BlockSpec((L, 1, Et), const3),                # tbl
            pl.BlockSpec((L, 1, Et), const3),                # ta
            pl.BlockSpec((L, N, N), const3),                 # tbias
            pl.BlockSpec((D, F), const2),                    # w1
            pl.BlockSpec((1, F), const2),                    # b1
            pl.BlockSpec((F, D), const2),                    # w2
            pl.BlockSpec((1, D), const2),                    # b2
        ],
        out_specs=pl.BlockSpec((TB, D), lambda c: (c, 0)),
        compiler_params=pltpu.CompilerParams(
            dimension_semantics=("parallel",)),
        cost_estimate=cost,
    )(x_in, fwlT, fwrT, fblT, faT, fbiasT,
      params["twl"], params["twr"], params["tbl"], params["ta"], params["tbias"],
      params["w1"], params["b1"], params["w2"], params["b2"])

    out = out_flat[:B] if B_pad != B else out_flat
    return out.reshape(B, N, K)


# -----------------------------------------------------------------------------
# Parameter construction (deterministic, synthetic), stacked per layer.
# -----------------------------------------------------------------------------
def init_generator_params(key, *, n_features, seq_length, fcn_dim, n_layers,
                          feat_gat_embed_dim, time_gat_embed_dim):
    K, N = n_features, seq_length
    Ef = 2 * feat_gat_embed_dim            # GATv2 doubles the embed dim
    Et = 2 * time_gat_embed_dim
    D = N * K
    ks = jax.random.split(key, 14)
    s = 0.1
    return dict(
        fwl=jax.random.normal(ks[0], (n_layers, N, Ef), jnp.float32) * s,
        fwr=jax.random.normal(ks[1], (n_layers, N, Ef), jnp.float32) * s,
        fbl=jax.random.normal(ks[2], (n_layers, 1, Ef), jnp.float32) * s,
        fa=jax.random.normal(ks[3], (n_layers, 1, Ef), jnp.float32) * s,
        fbias=jax.random.normal(ks[4], (n_layers, K, K), jnp.float32) * s,
        twl=jax.random.normal(ks[5], (n_layers, K, Et), jnp.float32) * s,
        twr=jax.random.normal(ks[6], (n_layers, K, Et), jnp.float32) * s,
        tbl=jax.random.normal(ks[7], (n_layers, 1, Et), jnp.float32) * s,
        ta=jax.random.normal(ks[8], (n_layers, 1, Et), jnp.float32) * s,
        tbias=jax.random.normal(ks[9], (n_layers, N, N), jnp.float32) * s,
        w1=jax.random.normal(ks[10], (D, fcn_dim), jnp.float32) * s,
        b1=jax.random.normal(ks[11], (1, fcn_dim), jnp.float32) * s,
        w2=jax.random.normal(ks[12], (fcn_dim, D), jnp.float32) * s,
        b2=jax.random.normal(ks[13], (1, D), jnp.float32) * s,
    )


# -----------------------------------------------------------------------------
# Pure-JAX reference for correctness checking.
# -----------------------------------------------------------------------------
def generator_forward_ref(params, x, *, n_layers, alpha):
    B, N, K = x.shape
    res = x.reshape(B, -1)
    for i in range(n_layers):
        # feature-oriented GAT
        v = jnp.transpose(x, (0, 2, 1))                                 # (B, K, N)
        left = v @ params["fwl"][i]
        right = v @ params["fwr"][i]
        g = left[:, :, None, :] + right[:, None, :, :] + params["fbl"][i][None]
        g = jnp.where(g > 0, g, alpha * g)
        e = jnp.sum(g * params["fa"][i][None], axis=-1) + params["fbias"][i][None]
        attn = jax.nn.softmax(e, axis=-1)
        h = jax.nn.sigmoid(attn @ v)                                    # (B, K, N)
        x = jnp.transpose(h, (0, 2, 1))                                 # (B, N, K)
        # time-oriented GAT
        left = x @ params["twl"][i]
        right = x @ params["twr"][i]
        g = left[:, :, None, :] + right[:, None, :, :] + params["tbl"][i][None]
        g = jnp.where(g > 0, g, alpha * g)
        e = jnp.sum(g * params["ta"][i][None], axis=-1) + params["tbias"][i][None]
        attn = jax.nn.softmax(e, axis=-1)
        x = jax.nn.sigmoid(attn @ x)                                    # (B, N, K)
    xf = x.reshape(B, -1)
    h = jnp.maximum(xf @ params["w1"] + params["b1"], 0.0)
    y = h @ params["w2"] + params["b2"] + res
    return y.reshape(B, N, K)


# -----------------------------------------------------------------------------
if __name__ == "__main__":
    # Small, forward-consistent shapes.
    B, N, K = 2, 8, 4                  # batch, seq_length, n_features
    n_layers = 2
    fcn_dim = 32
    feat_gat_embed_dim = 8
    time_gat_embed_dim = 8
    alpha = 0.2                        # LeakyReLU negative slope

    key = jax.random.PRNGKey(0)
    kx, kp = jax.random.split(key)
    x = jax.random.normal(kx, (B, N, K), jnp.float32)

    params = init_generator_params(
        kp, n_features=K, seq_length=N, fcn_dim=fcn_dim, n_layers=n_layers,
        feat_gat_embed_dim=feat_gat_embed_dim,
        time_gat_embed_dim=time_gat_embed_dim)

    out = generator_forward(params, x, n_layers=n_layers, alpha=alpha)
    out = jax.block_until_ready(out)

    ref = generator_forward_ref(params, x, n_layers=n_layers, alpha=alpha)
    assert out.shape == (B, N, K)
    # Small residual tolerance: MXU f32 matmul passes differ slightly from the
    # XLA reference; softmax is exact (no approximate reciprocal anymore).
    assert jnp.allclose(out, ref, atol=2e-3, rtol=2e-3), "mismatch vs JAX ref"

    print("KERNEL_OK")
</pallas_src>

<mosaic_0001>
module attributes {stable_mosaic.version = 11 : i64} {
  func.func @_generator_kernel(%arg0: i32, %arg1: memref<2x8x4xf32, #tpu.memory_space<vmem>>, %arg2: memref<2x16x8xf32, #tpu.memory_space<vmem>>, %arg3: memref<2x16x8xf32, #tpu.memory_space<vmem>>, %arg4: memref<2x16x1xf32, #tpu.memory_space<vmem>>, %arg5: memref<2x16x1xf32, #tpu.memory_space<vmem>>, %arg6: memref<2x4x4xf32, #tpu.memory_space<vmem>>, %arg7: memref<2x4x16xf32, #tpu.memory_space<vmem>>, %arg8: memref<2x4x16xf32, #tpu.memory_space<vmem>>, %arg9: memref<2x1x16xf32, #tpu.memory_space<vmem>>, %arg10: memref<2x1x16xf32, #tpu.memory_space<vmem>>, %arg11: memref<2x8x8xf32, #tpu.memory_space<vmem>>, %arg12: memref<32x32xf32, #tpu.memory_space<vmem>>, %arg13: memref<1x32xf32, #tpu.memory_space<vmem>>, %arg14: memref<32x32xf32, #tpu.memory_space<vmem>>, %arg15: memref<1x32xf32, #tpu.memory_space<vmem>>, %arg16: memref<2x32xf32, #tpu.memory_space<vmem>>) attributes {dimension_semantics = [#tpu.dimension_semantics<parallel>], iteration_bounds = array<i64: 1>, scalar_prefetch = 0 : i64, scratch_operands = 0 : i64, tpu.core_type = #tpu.core_type<tc>, window_params = [{transform_indices = @transform_0, window_bounds = array<i64: 2, 8, 4>}, {pipeline_mode = #tpu.pipeline_mode<synchronous>, transform_indices = @transform_1, window_bounds = array<i64: 2, 16, 8>}, {pipeline_mode = #tpu.pipeline_mode<synchronous>, transform_indices = @transform_2, window_bounds = array<i64: 2, 16, 8>}, {pipeline_mode = #tpu.pipeline_mode<synchronous>, transform_indices = @transform_3, window_bounds = array<i64: 2, 16, 1>}, {pipeline_mode = #tpu.pipeline_mode<synchronous>, transform_indices = @transform_4, window_bounds = array<i64: 2, 16, 1>}, {pipeline_mode = #tpu.pipeline_mode<synchronous>, transform_indices = @transform_5, window_bounds = array<i64: 2, 4, 4>}, {pipeline_mode = #tpu.pipeline_mode<synchronous>, transform_indices = @transform_6, window_bounds = array<i64: 2, 4, 16>}, {pipeline_mode = #tpu.pipeline_mode<synchronous>, transform_indices = @transform_7, window_bounds = array<i64: 2, 4, 16>}, {pipeline_mode = #tpu.pipeline_mode<synchronous>, transform_indices = @transform_8, window_bounds = array<i64: 2, 1, 16>}, {pipeline_mode = #tpu.pipeline_mode<synchronous>, transform_indices = @transform_9, window_bounds = array<i64: 2, 1, 16>}, {pipeline_mode = #tpu.pipeline_mode<synchronous>, transform_indices = @transform_10, window_bounds = array<i64: 2, 8, 8>}, {pipeline_mode = #tpu.pipeline_mode<synchronous>, transform_indices = @transform_11, window_bounds = array<i64: 32, 32>}, {pipeline_mode = #tpu.pipeline_mode<synchronous>, transform_indices = @transform_12, window_bounds = array<i64: 1, 32>}, {pipeline_mode = #tpu.pipeline_mode<synchronous>, transform_indices = @transform_13, window_bounds = array<i64: 32, 32>}, {pipeline_mode = #tpu.pipeline_mode<synchronous>, transform_indices = @transform_14, window_bounds = array<i64: 1, 32>}, {transform_indices = @transform_15, window_bounds = array<i64: 2, 32>}]} {
    %c0 = arith.constant 0 : index
    %c0_0 = arith.constant 0 : index
    %c0_1 = arith.constant 0 : index
    %0 = vector.load %arg1[%c0, %c0_0, %c0_1] : memref<2x8x4xf32, #tpu.memory_space<vmem>>, vector<2x8x4xf32>
    %1 = vector.extract_strided_slice %0 {offsets = [0, 0, 0], sizes = [2, 1, 4], strides = [1, 1, 1]} : vector<2x8x4xf32> to vector<2x1x4xf32>
    %2 = vector.extract_strided_slice %0 {offsets = [0, 1, 0], sizes = [2, 1, 4], strides = [1, 1, 1]} : vector<2x8x4xf32> to vector<2x1x4xf32>
    %3 = vector.extract_strided_slice %0 {offsets = [0, 2, 0], sizes = [2, 1, 4], strides = [1, 1, 1]} : vector<2x8x4xf32> to vector<2x1x4xf32>
    %4 = vector.extract_strided_slice %0 {offsets = [0, 3, 0], sizes = [2, 1, 4], strides = [1, 1, 1]} : vector<2x8x4xf32> to vector<2x1x4xf32>
    %5 = vector.extract_strided_slice %0 {offsets = [0, 4, 0], sizes = [2, 1, 4], strides = [1, 1, 1]} : vector<2x8x4xf32> to vector<2x1x4xf32>
    %6 = vector.extract_strided_slice %0 {offsets = [0, 5, 0], sizes = [2, 1, 4], strides = [1, 1, 1]} : vector<2x8x4xf32> to vector<2x1x4xf32>
    %7 = vector.extract_strided_slice %0 {offsets = [0, 6, 0], sizes = [2, 1, 4], strides = [1, 1, 1]} : vector<2x8x4xf32> to vector<2x1x4xf32>
    %8 = vector.extract_strided_slice %0 {offsets = [0, 7, 0], sizes = [2, 1, 4], strides = [1, 1, 1]} : vector<2x8x4xf32> to vector<2x1x4xf32>
    %9 = tpu.concatenate %1, %2, %3, %4, %5, %6, %7, %8 in 2 : vector<2x1x4xf32>, vector<2x1x4xf32>, vector<2x1x4xf32>, vector<2x1x4xf32>, vector<2x1x4xf32>, vector<2x1x4xf32>, vector<2x1x4xf32>, vector<2x1x4xf32> -> vector<2x1x32xf32>
    %10 = vector.shape_cast %9 : vector<2x1x32xf32> to vector<2x32xf32>
    %c0_2 = arith.constant 0 : index
    %c0_3 = arith.constant 0 : index
    %c0_4 = arith.constant 0 : index
    %11 = vector.load %arg2[%c0_2, %c0_3, %c0_4] : memref<2x16x8xf32, #tpu.memory_space<vmem>>, vector<1x16x8xf32>
    %12 = vector.shape_cast %11 : vector<1x16x8xf32> to vector<16x8xf32>
    %13 = vector.shape_cast %12 : vector<16x8xf32> to vector<1x16x8xf32>
    %14 = vector.broadcast %13 : vector<1x16x8xf32> to vector<2x16x8xf32>
    %c0_5 = arith.constant 0 : index
    %c0_6 = arith.constant 0 : index
    %c0_7 = arith.constant 0 : index
    %15 = vector.load %arg3[%c0_5, %c0_6, %c0_7] : memref<2x16x8xf32, #tpu.memory_space<vmem>>, vector<1x16x8xf32>
    %16 = vector.shape_cast %15 : vector<1x16x8xf32> to vector<16x8xf32>
    %17 = vector.shape_cast %16 : vector<16x8xf32> to vector<1x16x8xf32>
    %18 = vector.broadcast %17 : vector<1x16x8xf32> to vector<2x16x8xf32>
    "tpu.trace_start"() <{level = 10 : i32, message = "ben,bnk->bek"}> : () -> ()
    %cst = arith.constant dense<0.000000e+00> : vector<2x16x4xf32>
    %19 = tpu.matmul %14, %0, %cst {dimension_numbers = #tpu.dot_dimension_numbers<[2], [1], [1], [2], [0, 0, 0, 1, 1, 2], [0], [0]>} : vector<2x16x8xf32>, vector<2x8x4xf32>, vector<2x16x4xf32> -> vector<2x16x4xf32>
    %cst_8 = arith.constant dense<0.000000e+00> : vector<2x16x4xf32>
    %20 = tpu.matmul %18, %0, %cst_8 {dimension_numbers = #tpu.dot_dimension_numbers<[2], [1], [1], [2], [0, 0, 0, 1, 1, 2], [0], [0]>} : vector<2x16x8xf32>, vector<2x8x4xf32>, vector<2x16x4xf32> -> vector<2x16x4xf32>
    "tpu.trace_stop"() : () -> ()
    %c0_9 = arith.constant 0 : index
    %c0_10 = arith.constant 0 : index
    %c0_11 = arith.constant 0 : index
    %21 = vector.load %arg4[%c0_9, %c0_10, %c0_11] : memref<2x16x1xf32, #tpu.memory_space<vmem>>, vector<1x16x1xf32>
    %22 = vector.shape_cast %21 : vector<1x16x1xf32> to vector<16x1xf32>
    %23 = vector.shape_cast %22 : vector<16x1xf32> to vector<1x16x1xf32>
    %c0_12 = arith.constant 0 : index
    %c0_13 = arith.constant 0 : index
    %c0_14 = arith.constant 0 : index
    %24 = vector.load %arg5[%c0_12, %c0_13, %c0_14] : memref<2x16x1xf32, #tpu.memory_space<vmem>>, vector<1x16x1xf32>
    %25 = vector.shape_cast %24 : vector<1x16x1xf32> to vector<16x1xf32>
    %26 = vector.shape_cast %25 : vector<16x1xf32> to vector<1x16x1xf32>
    %c0_15 = arith.constant 0 : index
    %c0_16 = arith.constant 0 : index
    %c0_17 = arith.constant 0 : index
    %27 = vector.load %arg6[%c0_15, %c0_16, %c0_17] : memref<2x4x4xf32, #tpu.memory_space<vmem>>, vector<1x4x4xf32>
    %28 = vector.shape_cast %27 : vector<1x4x4xf32> to vector<4x4xf32>
    %29 = vector.extract_strided_slice %20 {offsets = [0, 0, 0], sizes = [2, 16, 1], strides = [1, 1, 1]} : vector<2x16x4xf32> to vector<2x16x1xf32>
    %30 = vector.broadcast %29 : vector<2x16x1xf32> to vector<2x16x4xf32>
    %31 = arith.addf %19, %30 : vector<2x16x4xf32>
    %32 = vector.broadcast %23 : vector<1x16x1xf32> to vector<2x16x4xf32>
    %33 = arith.addf %31, %32 : vector<2x16x4xf32>
    %cst_18 = arith.constant 0.000000e+00 : f32
    %34 = vector.broadcast %cst_18 : f32 to vector<2x16x4xf32>
    %35 = arith.cmpf ogt, %33, %34 : vector<2x16x4xf32>
    %cst_19 = arith.constant 2.000000e-01 : f32
    %36 = vector.broadcast %cst_19 : f32 to vector<2x16x4xf32>
    %37 = arith.mulf %36, %33 : vector<2x16x4xf32>
    %38 = arith.select %35, %33, %37 : vector<2x16x4xi1>, vector<2x16x4xf32>
    %39 = vector.broadcast %26 : vector<1x16x1xf32> to vector<2x16x4xf32>
    %40 = arith.mulf %38, %39 : vector<2x16x4xf32>
    %cst_20 = arith.constant dense<0.000000e+00> : vector<2x4xf32>
    %41 = vector.multi_reduction <add>, %40, %cst_20 [1] : vector<2x16x4xf32> to vector<2x4xf32>
    %42 = vector.shape_cast %41 : vector<2x4xf32> to vector<2x1x4xf32>
    %43 = vector.extract_strided_slice %28 {offsets = [0, 0], sizes = [1, 4], strides = [1, 1]} : vector<4x4xf32> to vector<1x4xf32>
    %44 = vector.shape_cast %43 : vector<1x4xf32> to vector<1x1x4xf32>
    %45 = vector.broadcast %44 : vector<1x1x4xf32> to vector<2x1x4xf32>
    %46 = arith.addf %42, %45 : vector<2x1x4xf32>
    %47 = vector.extract_strided_slice %20 {offsets = [0, 0, 1], sizes = [2, 16, 1], strides = [1, 1, 1]} : vector<2x16x4xf32> to vector<2x16x1xf32>
    %48 = vector.broadcast %47 : vector<2x16x1xf32> to vector<2x16x4xf32>
    %49 = arith.addf %19, %48 : vector<2x16x4xf32>
    %50 = vector.broadcast %23 : vector<1x16x1xf32> to vector<2x16x4xf32>
    %51 = arith.addf %49, %50 : vector<2x16x4xf32>
    %cst_21 = arith.constant 0.000000e+00 : f32
    %52 = vector.broadcast %cst_21 : f32 to vector<2x16x4xf32>
    %53 = arith.cmpf ogt, %51, %52 : vector<2x16x4xf32>
    %cst_22 = arith.constant 2.000000e-01 : f32
    %54 = vector.broadcast %cst_22 : f32 to vector<2x16x4xf32>
    %55 = arith.mulf %54, %51 : vector<2x16x4xf32>
    %56 = arith.select %53, %51, %55 : vector<2x16x4xi1>, vector<2x16x4xf32>
    %57 = vector.broadcast %26 : vector<1x16x1xf32> to vector<2x16x4xf32>
    %58 = arith.mulf %56, %57 : vector<2x16x4xf32>
    %cst_23 = arith.constant dense<0.000000e+00> : vector<2x4xf32>
    %59 = vector.multi_reduction <add>, %58, %cst_23 [1] : vector<2x16x4xf32> to vector<2x4xf32>
    %60 = vector.shape_cast %59 : vector<2x4xf32> to vector<2x1x4xf32>
    %61 = vector.extract_strided_slice %28 {offsets = [1, 0], sizes = [1, 4], strides = [1, 1]} : vector<4x4xf32> to vector<1x4xf32>
    %62 = vector.shape_cast %61 : vector<1x4xf32> to vector<1x1x4xf32>
    %63 = vector.broadcast %62 : vector<1x1x4xf32> to vector<2x1x4xf32>
    %64 = arith.addf %60, %63 : vector<2x1x4xf32>
    %65 = vector.extract_strided_slice %20 {offsets = [0, 0, 2], sizes = [2, 16, 1], strides = [1, 1, 1]} : vector<2x16x4xf32> to vector<2x16x1xf32>
    %66 = vector.broadcast %65 : vector<2x16x1xf32> to vector<2x16x4xf32>
    %67 = arith.addf %19, %66 : vector<2x16x4xf32>
    %68 = vector.broadcast %23 : vector<1x16x1xf32> to vector<2x16x4xf32>
    %69 = arith.addf %67, %68 : vector<2x16x4xf32>
    %cst_24 = arith.constant 0.000000e+00 : f32
    %70 = vector.broadcast %cst_24 : f32 to vector<2x16x4xf32>
    %71 = arith.cmpf ogt, %69, %70 : vector<2x16x4xf32>
    %cst_25 = arith.constant 2.000000e-01 : f32
    %72 = vector.broadcast %cst_25 : f32 to vector<2x16x4xf32>
    %73 = arith.mulf %72, %69 : vector<2x16x4xf32>
    %74 = arith.select %71, %69, %73 : vector<2x16x4xi1>, vector<2x16x4xf32>
    %75 = vector.broadcast %26 : vector<1x16x1xf32> to vector<2x16x4xf32>
    %76 = arith.mulf %74, %75 : vector<2x16x4xf32>
    %cst_26 = arith.constant dense<0.000000e+00> : vector<2x4xf32>
    %77 = vector.multi_reduction <add>, %76, %cst_26 [1] : vector<2x16x4xf32> to vector<2x4xf32>
    %78 = vector.shape_cast %77 : vector<2x4xf32> to vector<2x1x4xf32>
    %79 = vector.extract_strided_slice %28 {offsets = [2, 0], sizes = [1, 4], strides = [1, 1]} : vector<4x4xf32> to vector<1x4xf32>
    %80 = vector.shape_cast %79 : vector<1x4xf32> to vector<1x1x4xf32>
    %81 = vector.broadcast %80 : vector<1x1x4xf32> to vector<2x1x4xf32>
    %82 = arith.addf %78, %81 : vector<2x1x4xf32>
    %83 = vector.extract_strided_slice %20 {offsets = [0, 0, 3], sizes = [2, 16, 1], strides = [1, 1, 1]} : vector<2x16x4xf32> to vector<2x16x1xf32>
    %84 = vector.broadcast %83 : vector<2x16x1xf32> to vector<2x16x4xf32>
    %85 = arith.addf %19, %84 : vector<2x16x4xf32>
    %86 = vector.broadcast %23 : vector<1x16x1xf32> to vector<2x16x4xf32>
    %87 = arith.addf %85, %86 : vector<2x16x4xf32>
    %cst_27 = arith.constant 0.000000e+00 : f32
    %88 = vector.broadcast %cst_27 : f32 to vector<2x16x4xf32>
    %89 = arith.cmpf ogt, %87, %88 : vector<2x16x4xf32>
    %cst_28 = arith.constant 2.000000e-01 : f32
    %90 = vector.broadcast %cst_28 : f32 to vector<2x16x4xf32>
    %91 = arith.mulf %90, %87 : vector<2x16x4xf32>
    %92 = arith.select %89, %87, %91 : vector<2x16x4xi1>, vector<2x16x4xf32>
    %93 = vector.broadcast %26 : vector<1x16x1xf32> to vector<2x16x4xf32>
    %94 = arith.mulf %92, %93 : vector<2x16x4xf32>
    %cst_29 = arith.constant dense<0.000000e+00> : vector<2x4xf32>
    %95 = vector.multi_reduction <add>, %94, %cst_29 [1] : vector<2x16x4xf32> to vector<2x4xf32>
    %96 = vector.shape_cast %95 : vector<2x4xf32> to vector<2x1x4xf32>
    %97 = vector.extract_strided_slice %28 {offsets = [3, 0], sizes = [1, 4], strides = [1, 1]} : vector<4x4xf32> to vector<1x4xf32>
    %98 = vector.shape_cast %97 : vector<1x4xf32> to vector<1x1x4xf32>
    %99 = vector.broadcast %98 : vector<1x1x4xf32> to vector<2x1x4xf32>
    %100 = arith.addf %96, %99 : vector<2x1x4xf32>
    %101 = arith.maximumf %46, %64 : vector<2x1x4xf32>
    %102 = arith.maximumf %101, %82 : vector<2x1x4xf32>
    %103 = arith.maximumf %102, %100 : vector<2x1x4xf32>
    %104 = arith.subf %46, %103 : vector<2x1x4xf32>
    %105 = math.exp %104 : vector<2x1x4xf32>
    %106 = arith.subf %64, %103 : vector<2x1x4xf32>
    %107 = math.exp %106 : vector<2x1x4xf32>
    %108 = arith.subf %82, %103 : vector<2x1x4xf32>
    %109 = math.exp %108 : vector<2x1x4xf32>
    %110 = arith.subf %100, %103 : vector<2x1x4xf32>
    %111 = math.exp %110 : vector<2x1x4xf32>
    %112 = arith.addf %105, %107 : vector<2x1x4xf32>
    %113 = arith.addf %112, %109 : vector<2x1x4xf32>
    %114 = arith.addf %113, %111 : vector<2x1x4xf32>
    %115 = vector.extract_strided_slice %0 {offsets = [0, 0, 0], sizes = [2, 8, 1], strides = [1, 1, 1]} : vector<2x8x4xf32> to vector<2x8x1xf32>
    %116 = vector.broadcast %105 : vector<2x1x4xf32> to vector<2x8x4xf32>
    %117 = vector.broadcast %115 : vector<2x8x1xf32> to vector<2x8x4xf32>
    %118 = arith.mulf %116, %117 : vector<2x8x4xf32>
    %119 = vector.extract_strided_slice %0 {offsets = [0, 0, 1], sizes = [2, 8, 1], strides = [1, 1, 1]} : vector<2x8x4xf32> to vector<2x8x1xf32>
    %120 = vector.broadcast %107 : vector<2x1x4xf32> to vector<2x8x4xf32>
    %121 = vector.broadcast %119 : vector<2x8x1xf32> to vector<2x8x4xf32>
    %122 = arith.mulf %120, %121 : vector<2x8x4xf32>
    %123 = arith.addf %118, %122 : vector<2x8x4xf32>
    %124 = vector.extract_strided_slice %0 {offsets = [0, 0, 2], sizes = [2, 8, 1], strides = [1, 1, 1]} : vector<2x8x4xf32> to vector<2x8x1xf32>
    %125 = vector.broadcast %109 : vector<2x1x4xf32> to vector<2x8x4xf32>
    %126 = vector.broadcast %124 : vector<2x8x1xf32> to vector<2x8x4xf32>
    %127 = arith.mulf %125, %126 : vector<2x8x4xf32>
    %128 = arith.addf %123, %127 : vector<2x8x4xf32>
    %129 = vector.extract_strided_slice %0 {offsets = [0, 0, 3], sizes = [2, 8, 1], strides = [1, 1, 1]} : vector<2x8x4xf32> to vector<2x8x1xf32>
    %130 = vector.broadcast %111 : vector<2x1x4xf32> to vector<2x8x4xf32>
    %131 = vector.broadcast %129 : vector<2x8x1xf32> to vector<2x8x4xf32>
    %132 = arith.mulf %130, %131 : vector<2x8x4xf32>
    %133 = arith.addf %128, %132 : vector<2x8x4xf32>
    %134 = vector.broadcast %114 : vector<2x1x4xf32> to vector<2x8x4xf32>
    %135 = arith.divf %133, %134 : vector<2x8x4xf32>
    %136 = arith.negf %135 : vector<2x8x4xf32>
    %137 = math.exp %136 : vector<2x8x4xf32>
    %cst_30 = arith.constant 1.000000e+00 : f32
    %138 = vector.broadcast %cst_30 : f32 to vector<2x8x4xf32>
    %139 = arith.addf %138, %137 : vector<2x8x4xf32>
    %140 = arith.divf %138, %139 : vector<2x8x4xf32>
    %141 = vector.shape_cast %140 : vector<2x8x4xf32> to vector<16x4xf32>
    %c0_31 = arith.constant 0 : index
    %c0_32 = arith.constant 0 : index
    %c0_33 = arith.constant 0 : index
    %142 = vector.load %arg7[%c0_31, %c0_32, %c0_33] : memref<2x4x16xf32, #tpu.memory_space<vmem>>, vector<1x4x16xf32>
    %143 = vector.shape_cast %142 : vector<1x4x16xf32> to vector<4x16xf32>
    %cst_34 = arith.constant dense<0.000000e+00> : vector<16x16xf32>
    %144 = tpu.matmul %141, %143, %cst_34 {dimension_numbers = #tpu.dot_dimension_numbers<[1], [0], [0], [1], [0, 0, 1, 1], [], []>} : vector<16x4xf32>, vector<4x16xf32>, vector<16x16xf32> -> vector<16x16xf32>
    %145 = vector.shape_cast %144 : vector<16x16xf32> to vector<2x8x16xf32>
    %c0_35 = arith.constant 0 : index
    %c0_36 = arith.constant 0 : index
    %c0_37 = arith.constant 0 : index
    %146 = vector.load %arg8[%c0_35, %c0_36, %c0_37] : memref<2x4x16xf32, #tpu.memory_space<vmem>>, vector<1x4x16xf32>
    %147 = vector.shape_cast %146 : vector<1x4x16xf32> to vector<4x16xf32>
    %cst_38 = arith.constant dense<0.000000e+00> : vector<16x16xf32>
    %148 = tpu.matmul %141, %147, %cst_38 {dimension_numbers = #tpu.dot_dimension_numbers<[1], [0], [0], [1], [0, 0, 1, 1], [], []>} : vector<16x4xf32>, vector<4x16xf32>, vector<16x16xf32> -> vector<16x16xf32>
    %149 = vector.shape_cast %148 : vector<16x16xf32> to vector<2x8x16xf32>
    %c0_39 = arith.constant 0 : index
    %c0_40 = arith.constant 0 : index
    %c0_41 = arith.constant 0 : index
    %150 = vector.load %arg9[%c0_39, %c0_40, %c0_41] : memref<2x1x16xf32, #tpu.memory_space<vmem>>, vector<1x1x16xf32>
    %151 = vector.shape_cast %150 : vector<1x1x16xf32> to vector<1x16xf32>
    %152 = vector.shape_cast %151 : vector<1x16xf32> to vector<1x1x16xf32>
    %c0_42 = arith.constant 0 : index
    %c0_43 = arith.constant 0 : index
    %c0_44 = arith.constant 0 : index
    %153 = vector.load %arg10[%c0_42, %c0_43, %c0_44] : memref<2x1x16xf32, #tpu.memory_space<vmem>>, vector<1x1x16xf32>
    %154 = vector.shape_cast %153 : vector<1x1x16xf32> to vector<1x16xf32>
    %155 = vector.shape_cast %154 : vector<1x16xf32> to vector<1x1x16xf32>
    %c0_45 = arith.constant 0 : index
    %c0_46 = arith.constant 0 : index
    %c0_47 = arith.constant 0 : index
    %156 = vector.load %arg11[%c0_45, %c0_46, %c0_47] : memref<2x8x8xf32, #tpu.memory_space<vmem>>, vector<1x8x8xf32>
    %157 = vector.shape_cast %156 : vector<1x8x8xf32> to vector<8x8xf32>
    %158 = vector.extract_strided_slice %149 {offsets = [0, 0, 0], sizes = [2, 1, 16], strides = [1, 1, 1]} : vector<2x8x16xf32> to vector<2x1x16xf32>
    %159 = vector.broadcast %158 : vector<2x1x16xf32> to vector<2x8x16xf32>
    %160 = arith.addf %145, %159 : vector<2x8x16xf32>
    %161 = vector.broadcast %152 : vector<1x1x16xf32> to vector<2x8x16xf32>
    %162 = arith.addf %160, %161 : vector<2x8x16xf32>
    %cst_48 = arith.constant 0.000000e+00 : f32
    %163 = vector.broadcast %cst_48 : f32 to vector<2x8x16xf32>
    %164 = arith.cmpf ogt, %162, %163 : vector<2x8x16xf32>
    %cst_49 = arith.constant 2.000000e-01 : f32
    %165 = vector.broadcast %cst_49 : f32 to vector<2x8x16xf32>
    %166 = arith.mulf %165, %162 : vector<2x8x16xf32>
    %167 = arith.select %164, %162, %166 : vector<2x8x16xi1>, vector<2x8x16xf32>
    %168 = vector.broadcast %155 : vector<1x1x16xf32> to vector<2x8x16xf32>
    %169 = arith.mulf %167, %168 : vector<2x8x16xf32>
    %cst_50 = arith.constant dense<0.000000e+00> : vector<2x8xf32>
    %170 = vector.multi_reduction <add>, %169, %cst_50 [2] : vector<2x8x16xf32> to vector<2x8xf32>
    %171 = vector.shape_cast %170 : vector<2x8xf32> to vector<2x8x1xf32>
    %172 = vector.extract_strided_slice %157 {offsets = [0, 0], sizes = [8, 1], strides = [1, 1]} : vector<8x8xf32> to vector<8x1xf32>
    %173 = vector.shape_cast %172 : vector<8x1xf32> to vector<1x8x1xf32>
    %174 = vector.broadcast %173 : vector<1x8x1xf32> to vector<2x8x1xf32>
    %175 = arith.addf %171, %174 : vector<2x8x1xf32>
    %176 = vector.extract_strided_slice %149 {offsets = [0, 1, 0], sizes = [2, 1, 16], strides = [1, 1, 1]} : vector<2x8x16xf32> to vector<2x1x16xf32>
    %177 = vector.broadcast %176 : vector<2x1x16xf32> to vector<2x8x16xf32>
    %178 = arith.addf %145, %177 : vector<2x8x16xf32>
    %179 = vector.broadcast %152 : vector<1x1x16xf32> to vector<2x8x16xf32>
    %180 = arith.addf %178, %179 : vector<2x8x16xf32>
    %cst_51 = arith.constant 0.000000e+00 : f32
    %181 = vector.broadcast %cst_51 : f32 to vector<2x8x16xf32>
    %182 = arith.cmpf ogt, %180, %181 : vector<2x8x16xf32>
    %cst_52 = arith.constant 2.000000e-01 : f32
    %183 = vector.broadcast %cst_52 : f32 to vector<2x8x16xf32>
    %184 = arith.mulf %183, %180 : vector<2x8x16xf32>
    %185 = arith.select %182, %180, %184 : vector<2x8x16xi1>, vector<2x8x16xf32>
    %186 = vector.broadcast %155 : vector<1x1x16xf32> to vector<2x8x16xf32>
    %187 = arith.mulf %185, %186 : vector<2x8x16xf32>
    %cst_53 = arith.constant dense<0.000000e+00> : vector<2x8xf32>
    %188 = vector.multi_reduction <add>, %187, %cst_53 [2] : vector<2x8x16xf32> to vector<2x8xf32>
    %189 = vector.shape_cast %188 : vector<2x8xf32> to vector<2x8x1xf32>
    %190 = vector.extract_strided_slice %157 {offsets = [0, 1], sizes = [8, 1], strides = [1, 1]} : vector<8x8xf32> to vector<8x1xf32>
    %191 = vector.shape_cast %190 : vector<8x1xf32> to vector<1x8x1xf32>
    %192 = vector.broadcast %191 : vector<1x8x1xf32> to vector<2x8x1xf32>
    %193 = arith.addf %189, %192 : vector<2x8x1xf32>
    %194 = vector.extract_strided_slice %149 {offsets = [0, 2, 0], sizes = [2, 1, 16], strides = [1, 1, 1]} : vector<2x8x16xf32> to vector<2x1x16xf32>
    %195 = vector.broadcast %194 : vector<2x1x16xf32> to vector<2x8x16xf32>
    %196 = arith.addf %145, %195 : vector<2x8x16xf32>
    %197 = vector.broadcast %152 : vector<1x1x16xf32> to vector<2x8x16xf32>
    %198 = arith.addf %196, %197 : vector<2x8x16xf32>
    %cst_54 = arith.constant 0.000000e+00 : f32
    %199 = vector.broadcast %cst_54 : f32 to vector<2x8x16xf32>
    %200 = arith.cmpf ogt, %198, %199 : vector<2x8x16xf32>
    %cst_55 = arith.constant 2.000000e-01 : f32
    %201 = vector.broadcast %cst_55 : f32 to vector<2x8x16xf32>
    %202 = arith.mulf %201, %198 : vector<2x8x16xf32>
    %203 = arith.select %200, %198, %202 : vector<2x8x16xi1>, vector<2x8x16xf32>
    %204 = vector.broadcast %155 : vector<1x1x16xf32> to vector<2x8x16xf32>
    %205 = arith.mulf %203, %204 : vector<2x8x16xf32>
    %cst_56 = arith.constant dense<0.000000e+00> : vector<2x8xf32>
    %206 = vector.multi_reduction <add>, %205, %cst_56 [2] : vector<2x8x16xf32> to vector<2x8xf32>
    %207 = vector.shape_cast %206 : vector<2x8xf32> to vector<2x8x1xf32>
    %208 = vector.extract_strided_slice %157 {offsets = [0, 2], sizes = [8, 1], strides = [1, 1]} : vector<8x8xf32> to vector<8x1xf32>
    %209 = vector.shape_cast %208 : vector<8x1xf32> to vector<1x8x1xf32>
    %210 = vector.broadcast %209 : vector<1x8x1xf32> to vector<2x8x1xf32>
    %211 = arith.addf %207, %210 : vector<2x8x1xf32>
    %212 = vector.extract_strided_slice %149 {offsets = [0, 3, 0], sizes = [2, 1, 16], strides = [1, 1, 1]} : vector<2x8x16xf32> to vector<2x1x16xf32>
    %213 = vector.broadcast %212 : vector<2x1x16xf32> to vector<2x8x16xf32>
    %214 = arith.addf %145, %213 : vector<2x8x16xf32>
    %215 = vector.broadcast %152 : vector<1x1x16xf32> to vector<2x8x16xf32>
    %216 = arith.addf %214, %215 : vector<2x8x16xf32>
    %cst_57 = arith.constant 0.000000e+00 : f32
    %217 = vector.broadcast %cst_57 : f32 to vector<2x8x16xf32>
    %218 = arith.cmpf ogt, %216, %217 : vector<2x8x16xf32>
    %cst_58 = arith.constant 2.000000e-01 : f32
    %219 = vector.broadcast %cst_58 : f32 to vector<2x8x16xf32>
    %220 = arith.mulf %219, %216 : vector<2x8x16xf32>
    %221 = arith.select %218, %216, %220 : vector<2x8x16xi1>, vector<2x8x16xf32>
    %222 = vector.broadcast %155 : vector<1x1x16xf32> to vector<2x8x16xf32>
    %223 = arith.mulf %221, %222 : vector<2x8x16xf32>
    %cst_59 = arith.constant dense<0.000000e+00> : vector<2x8xf32>
    %224 = vector.multi_reduction <add>, %223, %cst_59 [2] : vector<2x8x16xf32> to vector<2x8xf32>
    %225 = vector.shape_cast %224 : vector<2x8xf32> to vector<2x8x1xf32>
    %226 = vector.extract_strided_slice %157 {offsets = [0, 3], sizes = [8, 1], strides = [1, 1]} : vector<8x8xf32> to vector<8x1xf32>
    %227 = vector.shape_cast %226 : vector<8x1xf32> to vector<1x8x1xf32>
    %228 = vector.broadcast %227 : vector<1x8x1xf32> to vector<2x8x1xf32>
    %229 = arith.addf %225, %228 : vector<2x8x1xf32>
    %230 = vector.extract_strided_slice %149 {offsets = [0, 4, 0], sizes = [2, 1, 16], strides = [1, 1, 1]} : vector<2x8x16xf32> to vector<2x1x16xf32>
    %231 = vector.broadcast %230 : vector<2x1x16xf32> to vector<2x8x16xf32>
    %232 = arith.addf %145, %231 : vector<2x8x16xf32>
    %233 = vector.broadcast %152 : vector<1x1x16xf32> to vector<2x8x16xf32>
    %234 = arith.addf %232, %233 : vector<2x8x16xf32>
    %cst_60 = arith.constant 0.000000e+00 : f32
    %235 = vector.broadcast %cst_60 : f32 to vector<2x8x16xf32>
    %236 = arith.cmpf ogt, %234, %235 : vector<2x8x16xf32>
    %cst_61 = arith.constant 2.000000e-01 : f32
    %237 = vector.broadcast %cst_61 : f32 to vector<2x8x16xf32>
    %238 = arith.mulf %237, %234 : vector<2x8x16xf32>
    %239 = arith.select %236, %234, %238 : vector<2x8x16xi1>, vector<2x8x16xf32>
    %240 = vector.broadcast %155 : vector<1x1x16xf32> to vector<2x8x16xf32>
    %241 = arith.mulf %239, %240 : vector<2x8x16xf32>
    %cst_62 = arith.constant dense<0.000000e+00> : vector<2x8xf32>
    %242 = vector.multi_reduction <add>, %241, %cst_62 [2] : vector<2x8x16xf32> to vector<2x8xf32>
    %243 = vector.shape_cast %242 : vector<2x8xf32> to vector<2x8x1xf32>
    %244 = vector.extract_strided_slice %157 {offsets = [0, 4], sizes = [8, 1], strides = [1, 1]} : vector<8x8xf32> to vector<8x1xf32>
    %245 = vector.shape_cast %244 : vector<8x1xf32> to vector<1x8x1xf32>
    %246 = vector.broadcast %245 : vector<1x8x1xf32> to vector<2x8x1xf32>
    %247 = arith.addf %243, %246 : vector<2x8x1xf32>
    %248 = vector.extract_strided_slice %149 {offsets = [0, 5, 0], sizes = [2, 1, 16], strides = [1, 1, 1]} : vector<2x8x16xf32> to vector<2x1x16xf32>
    %249 = vector.broadcast %248 : vector<2x1x16xf32> to vector<2x8x16xf32>
    %250 = arith.addf %145, %249 : vector<2x8x16xf32>
    %251 = vector.broadcast %152 : vector<1x1x16xf32> to vector<2x8x16xf32>
    %252 = arith.addf %250, %251 : vector<2x8x16xf32>
    %cst_63 = arith.constant 0.000000e+00 : f32
    %253 = vector.broadcast %cst_63 : f32 to vector<2x8x16xf32>
    %254 = arith.cmpf ogt, %252, %253 : vector<2x8x16xf32>
    %cst_64 = arith.constant 2.000000e-01 : f32
    %255 = vector.broadcast %cst_64 : f32 to vector<2x8x16xf32>
    %256 = arith.mulf %255, %252 : vector<2x8x16xf32>
    %257 = arith.select %254, %252, %256 : vector<2x8x16xi1>, vector<2x8x16xf32>
    %258 = vector.broadcast %155 : vector<1x1x16xf32> to vector<2x8x16xf32>
    %259 = arith.mulf %257, %258 : vector<2x8x16xf32>
    %cst_65 = arith.constant dense<0.000000e+00> : vector<2x8xf32>
    %260 = vector.multi_reduction <add>, %259, %cst_65 [2] : vector<2x8x16xf32> to vector<2x8xf32>
    %261 = vector.shape_cast %260 : vector<2x8xf32> to vector<2x8x1xf32>
    %262 = vector.extract_strided_slice %157 {offsets = [0, 5], sizes = [8, 1], strides = [1, 1]} : vector<8x8xf32> to vector<8x1xf32>
    %263 = vector.shape_cast %262 : vector<8x1xf32> to vector<1x8x1xf32>
    %264 = vector.broadcast %263 : vector<1x8x1xf32> to vector<2x8x1xf32>
    %265 = arith.addf %261, %264 : vector<2x8x1xf32>
    %266 = vector.extract_strided_slice %149 {offsets = [0, 6, 0], sizes = [2, 1, 16], strides = [1, 1, 1]} : vector<2x8x16xf32> to vector<2x1x16xf32>
    %267 = vector.broadcast %266 : vector<2x1x16xf32> to vector<2x8x16xf32>
    %268 = arith.addf %145, %267 : vector<2x8x16xf32>
    %269 = vector.broadcast %152 : vector<1x1x16xf32> to vector<2x8x16xf32>
    %270 = arith.addf %268, %269 : vector<2x8x16xf32>
    %cst_66 = arith.constant 0.000000e+00 : f32
    %271 = vector.broadcast %cst_66 : f32 to vector<2x8x16xf32>
    %272 = arith.cmpf ogt, %270, %271 : vector<2x8x16xf32>
    %cst_67 = arith.constant 2.000000e-01 : f32
    %273 = vector.broadcast %cst_67 : f32 to vector<2x8x16xf32>
    %274 = arith.mulf %273, %270 : vector<2x8x16xf32>
    %275 = arith.select %272, %270, %274 : vector<2x8x16xi1>, vector<2x8x16xf32>
    %276 = vector.broadcast %155 : vector<1x1x16xf32> to vector<2x8x16xf32>
    %277 = arith.mulf %275, %276 : vector<2x8x16xf32>
    %cst_68 = arith.constant dense<0.000000e+00> : vector<2x8xf32>
    %278 = vector.multi_reduction <add>, %277, %cst_68 [2] : vector<2x8x16xf32> to vector<2x8xf32>
    %279 = vector.shape_cast %278 : vector<2x8xf32> to vector<2x8x1xf32>
    %280 = vector.extract_strided_slice %157 {offsets = [0, 6], sizes = [8, 1], strides = [1, 1]} : vector<8x8xf32> to vector<8x1xf32>
    %281 = vector.shape_cast %280 : vector<8x1xf32> to vector<1x8x1xf32>
    %282 = vector.broadcast %281 : vector<1x8x1xf32> to vector<2x8x1xf32>
    %283 = arith.addf %279, %282 : vector<2x8x1xf32>
    %284 = vector.extract_strided_slice %149 {offsets = [0, 7, 0], sizes = [2, 1, 16], strides = [1, 1, 1]} : vector<2x8x16xf32> to vector<2x1x16xf32>
    %285 = vector.broadcast %284 : vector<2x1x16xf32> to vector<2x8x16xf32>
    %286 = arith.addf %145, %285 : vector<2x8x16xf32>
    %287 = vector.broadcast %152 : vector<1x1x16xf32> to vector<2x8x16xf32>
    %288 = arith.addf %286, %287 : vector<2x8x16xf32>
    %cst_69 = arith.constant 0.000000e+00 : f32
    %289 = vector.broadcast %cst_69 : f32 to vector<2x8x16xf32>
    %290 = arith.cmpf ogt, %288, %289 : vector<2x8x16xf32>
    %cst_70 = arith.constant 2.000000e-01 : f32
    %291 = vector.broadcast %cst_70 : f32 to vector<2x8x16xf32>
    %292 = arith.mulf %291, %288 : vector<2x8x16xf32>
    %293 = arith.select %290, %288, %292 : vector<2x8x16xi1>, vector<2x8x16xf32>
    %294 = vector.broadcast %155 : vector<1x1x16xf32> to vector<2x8x16xf32>
    %295 = arith.mulf %293, %294 : vector<2x8x16xf32>
    %cst_71 = arith.constant dense<0.000000e+00> : vector<2x8xf32>
    %296 = vector.multi_reduction <add>, %295, %cst_71 [2] : vector<2x8x16xf32> to vector<2x8xf32>
    %297 = vector.shape_cast %296 : vector<2x8xf32> to vector<2x8x1xf32>
    %298 = vector.extract_strided_slice %157 {offsets = [0, 7], sizes = [8, 1], strides = [1, 1]} : vector<8x8xf32> to vector<8x1xf32>
    %299 = vector.shape_cast %298 : vector<8x1xf32> to vector<1x8x1xf32>
    %300 = vector.broadcast %299 : vector<1x8x1xf32> to vector<2x8x1xf32>
    %301 = arith.addf %297, %300 : vector<2x8x1xf32>
    %302 = arith.maximumf %175, %193 : vector<2x8x1xf32>
    %303 = arith.maximumf %302, %211 : vector<2x8x1xf32>
    %304 = arith.maximumf %303, %229 : vector<2x8x1xf32>
    %305 = arith.maximumf %304, %247 : vector<2x8x1xf32>
    %306 = arith.maximumf %305, %265 : vector<2x8x1xf32>
    %307 = arith.maximumf %306, %283 : vector<2x8x1xf32>
    %308 = arith.maximumf %307, %301 : vector<2x8x1xf32>
    %309 = arith.subf %175, %308 : vector<2x8x1xf32>
    %310 = math.exp %309 : vector<2x8x1xf32>
    %311 = arith.subf %193, %308 : vector<2x8x1xf32>
    %312 = math.exp %311 : vector<2x8x1xf32>
    %313 = arith.subf %211, %308 : vector<2x8x1xf32>
    %314 = math.exp %313 : vector<2x8x1xf32>
    %315 = arith.subf %229, %308 : vector<2x8x1xf32>
    %316 = math.exp %315 : vector<2x8x1xf32>
    %317 = arith.subf %247, %308 : vector<2x8x1xf32>
    %318 = math.exp %317 : vector<2x8x1xf32>
    %319 = arith.subf %265, %308 : vector<2x8x1xf32>
    %320 = math.exp %319 : vector<2x8x1xf32>
    %321 = arith.subf %283, %308 : vector<2x8x1xf32>
    %322 = math.exp %321 : vector<2x8x1xf32>
    %323 = arith.subf %301, %308 : vector<2x8x1xf32>
    %324 = math.exp %323 : vector<2x8x1xf32>
    %325 = arith.addf %310, %312 : vector<2x8x1xf32>
    %326 = arith.addf %325, %314 : vector<2x8x1xf32>
    %327 = arith.addf %326, %316 : vector<2x8x1xf32>
    %328 = arith.addf %327, %318 : vector<2x8x1xf32>
    %329 = arith.addf %328, %320 : vector<2x8x1xf32>
    %330 = arith.addf %329, %322 : vector<2x8x1xf32>
    %331 = arith.addf %330, %324 : vector<2x8x1xf32>
    %332 = vector.extract_strided_slice %140 {offsets = [0, 0, 0], sizes = [2, 1, 4], strides = [1, 1, 1]} : vector<2x8x4xf32> to vector<2x1x4xf32>
    %333 = vector.broadcast %310 : vector<2x8x1xf32> to vector<2x8x4xf32>
    %334 = vector.broadcast %332 : vector<2x1x4xf32> to vector<2x8x4xf32>
    %335 = arith.mulf %333, %334 : vector<2x8x4xf32>
    %336 = vector.extract_strided_slice %140 {offsets = [0, 1, 0], sizes = [2, 1, 4], strides = [1, 1, 1]} : vector<2x8x4xf32> to vector<2x1x4xf32>
    %337 = vector.broadcast %312 : vector<2x8x1xf32> to vector<2x8x4xf32>
    %338 = vector.broadcast %336 : vector<2x1x4xf32> to vector<2x8x4xf32>
    %339 = arith.mulf %337, %338 : vector<2x8x4xf32>
    %340 = arith.addf %335, %339 : vector<2x8x4xf32>
    %341 = vector.extract_strided_slice %140 {offsets = [0, 2, 0], sizes = [2, 1, 4], strides = [1, 1, 1]} : vector<2x8x4xf32> to vector<2x1x4xf32>
    %342 = vector.broadcast %314 : vector<2x8x1xf32> to vector<2x8x4xf32>
    %343 = vector.broadcast %341 : vector<2x1x4xf32> to vector<2x8x4xf32>
    %344 = arith.mulf %342, %343 : vector<2x8x4xf32>
    %345 = arith.addf %340, %344 : vector<2x8x4xf32>
    %346 = vector.extract_strided_slice %140 {offsets = [0, 3, 0], sizes = [2, 1, 4], strides = [1, 1, 1]} : vector<2x8x4xf32> to vector<2x1x4xf32>
    %347 = vector.broadcast %316 : vector<2x8x1xf32> to vector<2x8x4xf32>
    %348 = vector.broadcast %346 : vector<2x1x4xf32> to vector<2x8x4xf32>
    %349 = arith.mulf %347, %348 : vector<2x8x4xf32>
    %350 = arith.addf %345, %349 : vector<2x8x4xf32>
    %351 = vector.extract_strided_slice %140 {offsets = [0, 4, 0], sizes = [2, 1, 4], strides = [1, 1, 1]} : vector<2x8x4xf32> to vector<2x1x4xf32>
    %352 = vector.broadcast %318 : vector<2x8x1xf32> to vector<2x8x4xf32>
    %353 = vector.broadcast %351 : vector<2x1x4xf32> to vector<2x8x4xf32>
    %354 = arith.mulf %352, %353 : vector<2x8x4xf32>
    %355 = arith.addf %350, %354 : vector<2x8x4xf32>
    %356 = vector.extract_strided_slice %140 {offsets = [0, 5, 0], sizes = [2, 1, 4], strides = [1, 1, 1]} : vector<2x8x4xf32> to vector<2x1x4xf32>
    %357 = vector.broadcast %320 : vector<2x8x1xf32> to vector<2x8x4xf32>
    %358 = vector.broadcast %356 : vector<2x1x4xf32> to vector<2x8x4xf32>
    %359 = arith.mulf %357, %358 : vector<2x8x4xf32>
    %360 = arith.addf %355, %359 : vector<2x8x4xf32>
    %361 = vector.extract_strided_slice %140 {offsets = [0, 6, 0], sizes = [2, 1, 4], strides = [1, 1, 1]} : vector<2x8x4xf32> to vector<2x1x4xf32>
    %362 = vector.broadcast %322 : vector<2x8x1xf32> to vector<2x8x4xf32>
    %363 = vector.broadcast %361 : vector<2x1x4xf32> to vector<2x8x4xf32>
    %364 = arith.mulf %362, %363 : vector<2x8x4xf32>
    %365 = arith.addf %360, %364 : vector<2x8x4xf32>
    %366 = vector.extract_strided_slice %140 {offsets = [0, 7, 0], sizes = [2, 1, 4], strides = [1, 1, 1]} : vector<2x8x4xf32> to vector<2x1x4xf32>
    %367 = vector.broadcast %324 : vector<2x8x1xf32> to vector<2x8x4xf32>
    %368 = vector.broadcast %366 : vector<2x1x4xf32> to vector<2x8x4xf32>
    %369 = arith.mulf %367, %368 : vector<2x8x4xf32>
    %370 = arith.addf %365, %369 : vector<2x8x4xf32>
    %371 = vector.broadcast %331 : vector<2x8x1xf32> to vector<2x8x4xf32>
    %372 = arith.divf %370, %371 : vector<2x8x4xf32>
    %373 = arith.negf %372 : vector<2x8x4xf32>
    %374 = math.exp %373 : vector<2x8x4xf32>
    %cst_72 = arith.constant 1.000000e+00 : f32
    %375 = vector.broadcast %cst_72 : f32 to vector<2x8x4xf32>
    %376 = arith.addf %375, %374 : vector<2x8x4xf32>
    %377 = arith.divf %375, %376 : vector<2x8x4xf32>
    %c1 = arith.constant 1 : index
    %c0_73 = arith.constant 0 : index
    %c0_74 = arith.constant 0 : index
    %378 = vector.load %arg2[%c1, %c0_73, %c0_74] : memref<2x16x8xf32, #tpu.memory_space<vmem>>, vector<1x16x8xf32>
    %379 = vector.shape_cast %378 : vector<1x16x8xf32> to vector<16x8xf32>
    %380 = vector.shape_cast %379 : vector<16x8xf32> to vector<1x16x8xf32>
    %381 = vector.broadcast %380 : vector<1x16x8xf32> to vector<2x16x8xf32>
    %c1_75 = arith.constant 1 : index
    %c0_76 = arith.constant 0 : index
    %c0_77 = arith.constant 0 : index
    %382 = vector.load %arg3[%c1_75, %c0_76, %c0_77] : memref<2x16x8xf32, #tpu.memory_space<vmem>>, vector<1x16x8xf32>
    %383 = vector.shape_cast %382 : vector<1x16x8xf32> to vector<16x8xf32>
    %384 = vector.shape_cast %383 : vector<16x8xf32> to vector<1x16x8xf32>
    %385 = vector.broadcast %384 : vector<1x16x8xf32> to vector<2x16x8xf32>
    "tpu.trace_start"() <{level = 10 : i32, message = "ben,bnk->bek"}> : () -> ()
    %cst_78 = arith.constant dense<0.000000e+00> : vector<2x16x4xf32>
    %386 = tpu.matmul %381, %377, %cst_78 {dimension_numbers = #tpu.dot_dimension_numbers<[2], [1], [1], [2], [0, 0, 0, 1, 1, 2], [0], [0]>} : vector<2x16x8xf32>, vector<2x8x4xf32>, vector<2x16x4xf32> -> vector<2x16x4xf32>
    %cst_79 = arith.constant dense<0.000000e+00> : vector<2x16x4xf32>
    %387 = tpu.matmul %385, %377, %cst_79 {dimension_numbers = #tpu.dot_dimension_numbers<[2], [1], [1], [2], [0, 0, 0, 1, 1, 2], [0], [0]>} : vector<2x16x8xf32>, vector<2x8x4xf32>, vector<2x16x4xf32> -> vector<2x16x4xf32>
    "tpu.trace_stop"() : () -> ()
    %c1_80 = arith.constant 1 : index
    %c0_81 = arith.constant 0 : index
    %c0_82 = arith.constant 0 : index
    %388 = vector.load %arg4[%c1_80, %c0_81, %c0_82] : memref<2x16x1xf32, #tpu.memory_space<vmem>>, vector<1x16x1xf32>
    %389 = vector.shape_cast %388 : vector<1x16x1xf32> to vector<16x1xf32>
    %390 = vector.shape_cast %389 : vector<16x1xf32> to vector<1x16x1xf32>
    %c1_83 = arith.constant 1 : index
    %c0_84 = arith.constant 0 : index
    %c0_85 = arith.constant 0 : index
    %391 = vector.load %arg5[%c1_83, %c0_84, %c0_85] : memref<2x16x1xf32, #tpu.memory_space<vmem>>, vector<1x16x1xf32>
    %392 = vector.shape_cast %391 : vector<1x16x1xf32> to vector<16x1xf32>
    %393 = vector.shape_cast %392 : vector<16x1xf32> to vector<1x16x1xf32>
    %c1_86 = arith.constant 1 : index
    %c0_87 = arith.constant 0 : index
    %c0_88 = arith.constant 0 : index
    %394 = vector.load %arg6[%c1_86, %c0_87, %c0_88] : memref<2x4x4xf32, #tpu.memory_space<vmem>>, vector<1x4x4xf32>
    %395 = vector.shape_cast %394 : vector<1x4x4xf32> to vector<4x4xf32>
    %396 = vector.extract_strided_slice %387 {offsets = [0, 0, 0], sizes = [2, 16, 1], strides = [1, 1, 1]} : vector<2x16x4xf32> to vector<2x16x1xf32>
    %397 = vector.broadcast %396 : vector<2x16x1xf32> to vector<2x16x4xf32>
    %398 = arith.addf %386, %397 : vector<2x16x4xf32>
    %399 = vector.broadcast %390 : vector<1x16x1xf32> to vector<2x16x4xf32>
    %400 = arith.addf %398, %399 : vector<2x16x4xf32>
    %cst_89 = arith.constant 0.000000e+00 : f32
    %401 = vector.broadcast %cst_89 : f32 to vector<2x16x4xf32>
    %402 = arith.cmpf ogt, %400, %401 : vector<2x16x4xf32>
    %cst_90 = arith.constant 2.000000e-01 : f32
    %403 = vector.broadcast %cst_90 : f32 to vector<2x16x4xf32>
    %404 = arith.mulf %403, %400 : vector<2x16x4xf32>
    %405 = arith.select %402, %400, %404 : vector<2x16x4xi1>, vector<2x16x4xf32>
    %406 = vector.broadcast %393 : vector<1x16x1xf32> to vector<2x16x4xf32>
    %407 = arith.mulf %405, %406 : vector<2x16x4xf32>
    %cst_91 = arith.constant dense<0.000000e+00> : vector<2x4xf32>
    %408 = vector.multi_reduction <add>, %407, %cst_91 [1] : vector<2x16x4xf32> to vector<2x4xf32>
    %409 = vector.shape_cast %408 : vector<2x4xf32> to vector<2x1x4xf32>
    %410 = vector.extract_strided_slice %395 {offsets = [0, 0], sizes = [1, 4], strides = [1, 1]} : vector<4x4xf32> to vector<1x4xf32>
    %411 = vector.shape_cast %410 : vector<1x4xf32> to vector<1x1x4xf32>
    %412 = vector.broadcast %411 : vector<1x1x4xf32> to vector<2x1x4xf32>
    %413 = arith.addf %409, %412 : vector<2x1x4xf32>
    %414 = vector.extract_strided_slice %387 {offsets = [0, 0, 1], sizes = [2, 16, 1], strides = [1, 1, 1]} : vector<2x16x4xf32> to vector<2x16x1xf32>
    %415 = vector.broadcast %414 : vector<2x16x1xf32> to vector<2x16x4xf32>
    %416 = arith.addf %386, %415 : vector<2x16x4xf32>
    %417 = vector.broadcast %390 : vector<1x16x1xf32> to vector<2x16x4xf32>
    %418 = arith.addf %416, %417 : vector<2x16x4xf32>
    %cst_92 = arith.constant 0.000000e+00 : f32
    %419 = vector.broadcast %cst_92 : f32 to vector<2x16x4xf32>
    %420 = arith.cmpf ogt, %418, %419 : vector<2x16x4xf32>
    %cst_93 = arith.constant 2.000000e-01 : f32
    %421 = vector.broadcast %cst_93 : f32 to vector<2x16x4xf32>
    %422 = arith.mulf %421, %418 : vector<2x16x4xf32>
    %423 = arith.select %420, %418, %422 : vector<2x16x4xi1>, vector<2x16x4xf32>
    %424 = vector.broadcast %393 : vector<1x16x1xf32> to vector<2x16x4xf32>
    %425 = arith.mulf %423, %424 : vector<2x16x4xf32>
    %cst_94 = arith.constant dense<0.000000e+00> : vector<2x4xf32>
    %426 = vector.multi_reduction <add>, %425, %cst_94 [1] : vector<2x16x4xf32> to vector<2x4xf32>
    %427 = vector.shape_cast %426 : vector<2x4xf32> to vector<2x1x4xf32>
    %428 = vector.extract_strided_slice %395 {offsets = [1, 0], sizes = [1, 4], strides = [1, 1]} : vector<4x4xf32> to vector<1x4xf32>
    %429 = vector.shape_cast %428 : vector<1x4xf32> to vector<1x1x4xf32>
    %430 = vector.broadcast %429 : vector<1x1x4xf32> to vector<2x1x4xf32>
    %431 = arith.addf %427, %430 : vector<2x1x4xf32>
    %432 = vector.extract_strided_slice %387 {offsets = [0, 0, 2], sizes = [2, 16, 1], strides = [1, 1, 1]} : vector<2x16x4xf32> to vector<2x16x1xf32>
    %433 = vector.broadcast %432 : vector<2x16x1xf32> to vector<2x16x4xf32>
    %434 = arith.addf %386, %433 : vector<2x16x4xf32>
    %435 = vector.broadcast %390 : vector<1x16x1xf32> to vector<2x16x4xf32>
    %436 = arith.addf %434, %435 : vector<2x16x4xf32>
    %cst_95 = arith.constant 0.000000e+00 : f32
    %437 = vector.broadcast %cst_95 : f32 to vector<2x16x4xf32>
    %438 = arith.cmpf ogt, %436, %437 : vector<2x16x4xf32>
    %cst_96 = arith.constant 2.000000e-01 : f32
    %439 = vector.broadcast %cst_96 : f32 to vector<2x16x4xf32>
    %440 = arith.mulf %439, %436 : vector<2x16x4xf32>
    %441 = arith.select %438, %436, %440 : vector<2x16x4xi1>, vector<2x16x4xf32>
    %442 = vector.broadcast %393 : vector<1x16x1xf32> to vector<2x16x4xf32>
    %443 = arith.mulf %441, %442 : vector<2x16x4xf32>
    %cst_97 = arith.constant dense<0.000000e+00> : vector<2x4xf32>
    %444 = vector.multi_reduction <add>, %443, %cst_97 [1] : vector<2x16x4xf32> to vector<2x4xf32>
    %445 = vector.shape_cast %444 : vector<2x4xf32> to vector<2x1x4xf32>
    %446 = vector.extract_strided_slice %395 {offsets = [2, 0], sizes = [1, 4], strides = [1, 1]} : vector<4x4xf32> to vector<1x4xf32>
    %447 = vector.shape_cast %446 : vector<1x4xf32> to vector<1x1x4xf32>
    %448 = vector.broadcast %447 : vector<1x1x4xf32> to vector<2x1x4xf32>
    %449 = arith.addf %445, %448 : vector<2x1x4xf32>
    %450 = vector.extract_strided_slice %387 {offsets = [0, 0, 3], sizes = [2, 16, 1], strides = [1, 1, 1]} : vector<2x16x4xf32> to vector<2x16x1xf32>
    %451 = vector.broadcast %450 : vector<2x16x1xf32> to vector<2x16x4xf32>
    %452 = arith.addf %386, %451 : vector<2x16x4xf32>
    %453 = vector.broadcast %390 : vector<1x16x1xf32> to vector<2x16x4xf32>
    %454 = arith.addf %452, %453 : vector<2x16x4xf32>
    %cst_98 = arith.constant 0.000000e+00 : f32
    %455 = vector.broadcast %cst_98 : f32 to vector<2x16x4xf32>
    %456 = arith.cmpf ogt, %454, %455 : vector<2x16x4xf32>
    %cst_99 = arith.constant 2.000000e-01 : f32
    %457 = vector.broadcast %cst_99 : f32 to vector<2x16x4xf32>
    %458 = arith.mulf %457, %454 : vector<2x16x4xf32>
    %459 = arith.select %456, %454, %458 : vector<2x16x4xi1>, vector<2x16x4xf32>
    %460 = vector.broadcast %393 : vector<1x16x1xf32> to vector<2x16x4xf32>
    %461 = arith.mulf %459, %460 : vector<2x16x4xf32>
    %cst_100 = arith.constant dense<0.000000e+00> : vector<2x4xf32>
    %462 = vector.multi_reduction <add>, %461, %cst_100 [1] : vector<2x16x4xf32> to vector<2x4xf32>
    %463 = vector.shape_cast %462 : vector<2x4xf32> to vector<2x1x4xf32>
    %464 = vector.extract_strided_slice %395 {offsets = [3, 0], sizes = [1, 4], strides = [1, 1]} : vector<4x4xf32> to vector<1x4xf32>
    %465 = vector.shape_cast %464 : vector<1x4xf32> to vector<1x1x4xf32>
    %466 = vector.broadcast %465 : vector<1x1x4xf32> to vector<2x1x4xf32>
    %467 = arith.addf %463, %466 : vector<2x1x4xf32>
    %468 = arith.maximumf %413, %431 : vector<2x1x4xf32>
    %469 = arith.maximumf %468, %449 : vector<2x1x4xf32>
    %470 = arith.maximumf %469, %467 : vector<2x1x4xf32>
    %471 = arith.subf %413, %470 : vector<2x1x4xf32>
    %472 = math.exp %471 : vector<2x1x4xf32>
    %473 = arith.subf %431, %470 : vector<2x1x4xf32>
    %474 = math.exp %473 : vector<2x1x4xf32>
    %475 = arith.subf %449, %470 : vector<2x1x4xf32>
    %476 = math.exp %475 : vector<2x1x4xf32>
    %477 = arith.subf %467, %470 : vector<2x1x4xf32>
    %478 = math.exp %477 : vector<2x1x4xf32>
    %479 = arith.addf %472, %474 : vector<2x1x4xf32>
    %480 = arith.addf %479, %476 : vector<2x1x4xf32>
    %481 = arith.addf %480, %478 : vector<2x1x4xf32>
    %482 = vector.extract_strided_slice %377 {offsets = [0, 0, 0], sizes = [2, 8, 1], strides = [1, 1, 1]} : vector<2x8x4xf32> to vector<2x8x1xf32>
    %483 = vector.broadcast %472 : vector<2x1x4xf32> to vector<2x8x4xf32>
    %484 = vector.broadcast %482 : vector<2x8x1xf32> to vector<2x8x4xf32>
    %485 = arith.mulf %483, %484 : vector<2x8x4xf32>
    %486 = vector.extract_strided_slice %377 {offsets = [0, 0, 1], sizes = [2, 8, 1], strides = [1, 1, 1]} : vector<2x8x4xf32> to vector<2x8x1xf32>
    %487 = vector.broadcast %474 : vector<2x1x4xf32> to vector<2x8x4xf32>
    %488 = vector.broadcast %486 : vector<2x8x1xf32> to vector<2x8x4xf32>
    %489 = arith.mulf %487, %488 : vector<2x8x4xf32>
    %490 = arith.addf %485, %489 : vector<2x8x4xf32>
    %491 = vector.extract_strided_slice %377 {offsets = [0, 0, 2], sizes = [2, 8, 1], strides = [1, 1, 1]} : vector<2x8x4xf32> to vector<2x8x1xf32>
    %492 = vector.broadcast %476 : vector<2x1x4xf32> to vector<2x8x4xf32>
    %493 = vector.broadcast %491 : vector<2x8x1xf32> to vector<2x8x4xf32>
    %494 = arith.mulf %492, %493 : vector<2x8x4xf32>
    %495 = arith.addf %490, %494 : vector<2x8x4xf32>
    %496 = vector.extract_strided_slice %377 {offsets = [0, 0, 3], sizes = [2, 8, 1], strides = [1, 1, 1]} : vector<2x8x4xf32> to vector<2x8x1xf32>
    %497 = vector.broadcast %478 : vector<2x1x4xf32> to vector<2x8x4xf32>
    %498 = vector.broadcast %496 : vector<2x8x1xf32> to vector<2x8x4xf32>
    %499 = arith.mulf %497, %498 : vector<2x8x4xf32>
    %500 = arith.addf %495, %499 : vector<2x8x4xf32>
    %501 = vector.broadcast %481 : vector<2x1x4xf32> to vector<2x8x4xf32>
    %502 = arith.divf %500, %501 : vector<2x8x4xf32>
    %503 = arith.negf %502 : vector<2x8x4xf32>
    %504 = math.exp %503 : vector<2x8x4xf32>
    %cst_101 = arith.constant 1.000000e+00 : f32
    %505 = vector.broadcast %cst_101 : f32 to vector<2x8x4xf32>
    %506 = arith.addf %505, %504 : vector<2x8x4xf32>
    %507 = arith.divf %505, %506 : vector<2x8x4xf32>
    %508 = vector.shape_cast %507 : vector<2x8x4xf32> to vector<16x4xf32>
    %c1_102 = arith.constant 1 : index
    %c0_103 = arith.constant 0 : index
    %c0_104 = arith.constant 0 : index
    %509 = vector.load %arg7[%c1_102, %c0_103, %c0_104] : memref<2x4x16xf32, #tpu.memory_space<vmem>>, vector<1x4x16xf32>
    %510 = vector.shape_cast %509 : vector<1x4x16xf32> to vector<4x16xf32>
    %cst_105 = arith.constant dense<0.000000e+00> : vector<16x16xf32>
    %511 = tpu.matmul %508, %510, %cst_105 {dimension_numbers = #tpu.dot_dimension_numbers<[1], [0], [0], [1], [0, 0, 1, 1], [], []>} : vector<16x4xf32>, vector<4x16xf32>, vector<16x16xf32> -> vector<16x16xf32>
    %512 = vector.shape_cast %511 : vector<16x16xf32> to vector<2x8x16xf32>
    %c1_106 = arith.constant 1 : index
    %c0_107 = arith.constant 0 : index
    %c0_108 = arith.constant 0 : index
    %513 = vector.load %arg8[%c1_106, %c0_107, %c0_108] : memref<2x4x16xf32, #tpu.memory_space<vmem>>, vector<1x4x16xf32>
    %514 = vector.shape_cast %513 : vector<1x4x16xf32> to vector<4x16xf32>
    %cst_109 = arith.constant dense<0.000000e+00> : vector<16x16xf32>
    %515 = tpu.matmul %508, %514, %cst_109 {dimension_numbers = #tpu.dot_dimension_numbers<[1], [0], [0], [1], [0, 0, 1, 1], [], []>} : vector<16x4xf32>, vector<4x16xf32>, vector<16x16xf32> -> vector<16x16xf32>
    %516 = vector.shape_cast %515 : vector<16x16xf32> to vector<2x8x16xf32>
    %c1_110 = arith.constant 1 : index
    %c0_111 = arith.constant 0 : index
    %c0_112 = arith.constant 0 : index
    %517 = vector.load %arg9[%c1_110, %c0_111, %c0_112] : memref<2x1x16xf32, #tpu.memory_space<vmem>>, vector<1x1x16xf32>
    %518 = vector.shape_cast %517 : vector<1x1x16xf32> to vector<1x16xf32>
    %519 = vector.shape_cast %518 : vector<1x16xf32> to vector<1x1x16xf32>
    %c1_113 = arith.constant 1 : index
    %c0_114 = arith.constant 0 : index
    %c0_115 = arith.constant 0 : index
    %520 = vector.load %arg10[%c1_113, %c0_114, %c0_115] : memref<2x1x16xf32, #tpu.memory_space<vmem>>, vector<1x1x16xf32>
    %521 = vector.shape_cast %520 : vector<1x1x16xf32> to vector<1x16xf32>
    %522 = vector.shape_cast %521 : vector<1x16xf32> to vector<1x1x16xf32>
    %c1_116 = arith.constant 1 : index
    %c0_117 = arith.constant 0 : index
    %c0_118 = arith.constant 0 : index
    %523 = vector.load %arg11[%c1_116, %c0_117, %c0_118] : memref<2x8x8xf32, #tpu.memory_space<vmem>>, vector<1x8x8xf32>
    %524 = vector.shape_cast %523 : vector<1x8x8xf32> to vector<8x8xf32>
    %525 = vector.extract_strided_slice %516 {offsets = [0, 0, 0], sizes = [2, 1, 16], strides = [1, 1, 1]} : vector<2x8x16xf32> to vector<2x1x16xf32>
    %526 = vector.broadcast %525 : vector<2x1x16xf32> to vector<2x8x16xf32>
    %527 = arith.addf %512, %526 : vector<2x8x16xf32>
    %528 = vector.broadcast %519 : vector<1x1x16xf32> to vector<2x8x16xf32>
    %529 = arith.addf %527, %528 : vector<2x8x16xf32>
    %cst_119 = arith.constant 0.000000e+00 : f32
    %530 = vector.broadcast %cst_119 : f32 to vector<2x8x16xf32>
    %531 = arith.cmpf ogt, %529, %530 : vector<2x8x16xf32>
    %cst_120 = arith.constant 2.000000e-01 : f32
    %532 = vector.broadcast %cst_120 : f32 to vector<2x8x16xf32>
    %533 = arith.mulf %532, %529 : vector<2x8x16xf32>
    %534 = arith.select %531, %529, %533 : vector<2x8x16xi1>, vector<2x8x16xf32>
    %535 = vector.broadcast %522 : vector<1x1x16xf32> to vector<2x8x16xf32>
    %536 = arith.mulf %534, %535 : vector<2x8x16xf32>
    %cst_121 = arith.constant dense<0.000000e+00> : vector<2x8xf32>
    %537 = vector.multi_reduction <add>, %536, %cst_121 [2] : vector<2x8x16xf32> to vector<2x8xf32>
    %538 = vector.shape_cast %537 : vector<2x8xf32> to vector<2x8x1xf32>
    %539 = vector.extract_strided_slice %524 {offsets = [0, 0], sizes = [8, 1], strides = [1, 1]} : vector<8x8xf32> to vector<8x1xf32>
    %540 = vector.shape_cast %539 : vector<8x1xf32> to vector<1x8x1xf32>
    %541 = vector.broadcast %540 : vector<1x8x1xf32> to vector<2x8x1xf32>
    %542 = arith.addf %538, %541 : vector<2x8x1xf32>
    %543 = vector.extract_strided_slice %516 {offsets = [0, 1, 0], sizes = [2, 1, 16], strides = [1, 1, 1]} : vector<2x8x16xf32> to vector<2x1x16xf32>
    %544 = vector.broadcast %543 : vector<2x1x16xf32> to vector<2x8x16xf32>
    %545 = arith.addf %512, %544 : vector<2x8x16xf32>
    %546 = vector.broadcast %519 : vector<1x1x16xf32> to vector<2x8x16xf32>
    %547 = arith.addf %545, %546 : vector<2x8x16xf32>
    %cst_122 = arith.constant 0.000000e+00 : f32
    %548 = vector.broadcast %cst_122 : f32 to vector<2x8x16xf32>
    %549 = arith.cmpf ogt, %547, %548 : vector<2x8x16xf32>
    %cst_123 = arith.constant 2.000000e-01 : f32
    %550 = vector.broadcast %cst_123 : f32 to vector<2x8x16xf32>
    %551 = arith.mulf %550, %547 : vector<2x8x16xf32>
    %552 = arith.select %549, %547, %551 : vector<2x8x16xi1>, vector<2x8x16xf32>
    %553 = vector.broadcast %522 : vector<1x1x16xf32> to vector<2x8x16xf32>
    %554 = arith.mulf %552, %553 : vector<2x8x16xf32>
    %cst_124 = arith.constant dense<0.000000e+00> : vector<2x8xf32>
    %555 = vector.multi_reduction <add>, %554, %cst_124 [2] : vector<2x8x16xf32> to vector<2x8xf32>
    %556 = vector.shape_cast %555 : vector<2x8xf32> to vector<2x8x1xf32>
    %557 = vector.extract_strided_slice %524 {offsets = [0, 1], sizes = [8, 1], strides = [1, 1]} : vector<8x8xf32> to vector<8x1xf32>
    %558 = vector.shape_cast %557 : vector<8x1xf32> to vector<1x8x1xf32>
    %559 = vector.broadcast %558 : vector<1x8x1xf32> to vector<2x8x1xf32>
    %560 = arith.addf %556, %559 : vector<2x8x1xf32>
    %561 = vector.extract_strided_slice %516 {offsets = [0, 2, 0], sizes = [2, 1, 16], strides = [1, 1, 1]} : vector<2x8x16xf32> to vector<2x1x16xf32>
    %562 = vector.broadcast %561 : vector<2x1x16xf32> to vector<2x8x16xf32>
    %563 = arith.addf %512, %562 : vector<2x8x16xf32>
    %564 = vector.broadcast %519 : vector<1x1x16xf32> to vector<2x8x16xf32>
    %565 = arith.addf %563, %564 : vector<2x8x16xf32>
    %cst_125 = arith.constant 0.000000e+00 : f32
    %566 = vector.broadcast %cst_125 : f32 to vector<2x8x16xf32>
    %567 = arith.cmpf ogt, %565, %566 : vector<2x8x16xf32>
    %cst_126 = arith.constant 2.000000e-01 : f32
    %568 = vector.broadcast %cst_126 : f32 to vector<2x8x16xf32>
    %569 = arith.mulf %568, %565 : vector<2x8x16xf32>
    %570 = arith.select %567, %565, %569 : vector<2x8x16xi1>, vector<2x8x16xf32>
    %571 = vector.broadcast %522 : vector<1x1x16xf32> to vector<2x8x16xf32>
    %572 = arith.mulf %570, %571 : vector<2x8x16xf32>
    %cst_127 = arith.constant dense<0.000000e+00> : vector<2x8xf32>
    %573 = vector.multi_reduction <add>, %572, %cst_127 [2] : vector<2x8x16xf32> to vector<2x8xf32>
    %574 = vector.shape_cast %573 : vector<2x8xf32> to vector<2x8x1xf32>
    %575 = vector.extract_strided_slice %524 {offsets = [0, 2], sizes = [8, 1], strides = [1, 1]} : vector<8x8xf32> to vector<8x1xf32>
    %576 = vector.shape_cast %575 : vector<8x1xf32> to vector<1x8x1xf32>
    %577 = vector.broadcast %576 : vector<1x8x1xf32> to vector<2x8x1xf32>
    %578 = arith.addf %574, %577 : vector<2x8x1xf32>
    %579 = vector.extract_strided_slice %516 {offsets = [0, 3, 0], sizes = [2, 1, 16], strides = [1, 1, 1]} : vector<2x8x16xf32> to vector<2x1x16xf32>
    %580 = vector.broadcast %579 : vector<2x1x16xf32> to vector<2x8x16xf32>
    %581 = arith.addf %512, %580 : vector<2x8x16xf32>
    %582 = vector.broadcast %519 : vector<1x1x16xf32> to vector<2x8x16xf32>
    %583 = arith.addf %581, %582 : vector<2x8x16xf32>
    %cst_128 = arith.constant 0.000000e+00 : f32
    %584 = vector.broadcast %cst_128 : f32 to vector<2x8x16xf32>
    %585 = arith.cmpf ogt, %583, %584 : vector<2x8x16xf32>
    %cst_129 = arith.constant 2.000000e-01 : f32
    %586 = vector.broadcast %cst_129 : f32 to vector<2x8x16xf32>
    %587 = arith.mulf %586, %583 : vector<2x8x16xf32>
    %588 = arith.select %585, %583, %587 : vector<2x8x16xi1>, vector<2x8x16xf32>
    %589 = vector.broadcast %522 : vector<1x1x16xf32> to vector<2x8x16xf32>
    %590 = arith.mulf %588, %589 : vector<2x8x16xf32>
    %cst_130 = arith.constant dense<0.000000e+00> : vector<2x8xf32>
    %591 = vector.multi_reduction <add>, %590, %cst_130 [2] : vector<2x8x16xf32> to vector<2x8xf32>
    %592 = vector.shape_cast %591 : vector<2x8xf32> to vector<2x8x1xf32>
    %593 = vector.extract_strided_slice %524 {offsets = [0, 3], sizes = [8, 1], strides = [1, 1]} : vector<8x8xf32> to vector<8x1xf32>
    %594 = vector.shape_cast %593 : vector<8x1xf32> to vector<1x8x1xf32>
    %595 = vector.broadcast %594 : vector<1x8x1xf32> to vector<2x8x1xf32>
    %596 = arith.addf %592, %595 : vector<2x8x1xf32>
    %597 = vector.extract_strided_slice %516 {offsets = [0, 4, 0], sizes = [2, 1, 16], strides = [1, 1, 1]} : vector<2x8x16xf32> to vector<2x1x16xf32>
    %598 = vector.broadcast %597 : vector<2x1x16xf32> to vector<2x8x16xf32>
    %599 = arith.addf %512, %598 : vector<2x8x16xf32>
    %600 = vector.broadcast %519 : vector<1x1x16xf32> to vector<2x8x16xf32>
    %601 = arith.addf %599, %600 : vector<2x8x16xf32>
    %cst_131 = arith.constant 0.000000e+00 : f32
    %602 = vector.broadcast %cst_131 : f32 to vector<2x8x16xf32>
    %603 = arith.cmpf ogt, %601, %602 : vector<2x8x16xf32>
    %cst_132 = arith.constant 2.000000e-01 : f32
    %604 = vector.broadcast %cst_132 : f32 to vector<2x8x16xf32>
    %605 = arith.mulf %604, %601 : vector<2x8x16xf32>
    %606 = arith.select %603, %601, %605 : vector<2x8x16xi1>, vector<2x8x16xf32>
    %607 = vector.broadcast %522 : vector<1x1x16xf32> to vector<2x8x16xf32>
    %608 = arith.mulf %606, %607 : vector<2x8x16xf32>
    %cst_133 = arith.constant dense<0.000000e+00> : vector<2x8xf32>
    %609 = vector.multi_reduction <add>, %608, %cst_133 [2] : vector<2x8x16xf32> to vector<2x8xf32>
    %610 = vector.shape_cast %609 : vector<2x8xf32> to vector<2x8x1xf32>
    %611 = vector.extract_strided_slice %524 {offsets = [0, 4], sizes = [8, 1], strides = [1, 1]} : vector<8x8xf32> to vector<8x1xf32>
    %612 = vector.shape_cast %611 : vector<8x1xf32> to vector<1x8x1xf32>
    %613 = vector.broadcast %612 : vector<1x8x1xf32> to vector<2x8x1xf32>
    %614 = arith.addf %610, %613 : vector<2x8x1xf32>
    %615 = vector.extract_strided_slice %516 {offsets = [0, 5, 0], sizes = [2, 1, 16], strides = [1, 1, 1]} : vector<2x8x16xf32> to vector<2x1x16xf32>
    %616 = vector.broadcast %615 : vector<2x1x16xf32> to vector<2x8x16xf32>
    %617 = arith.addf %512, %616 : vector<2x8x16xf32>
    %618 = vector.broadcast %519 : vector<1x1x16xf32> to vector<2x8x16xf32>
    %619 = arith.addf %617, %618 : vector<2x8x16xf32>
    %cst_134 = arith.constant 0.000000e+00 : f32
    %620 = vector.broadcast %cst_134 : f32 to vector<2x8x16xf32>
    %621 = arith.cmpf ogt, %619, %620 : vector<2x8x16xf32>
    %cst_135 = arith.constant 2.000000e-01 : f32
    %622 = vector.broadcast %cst_135 : f32 to vector<2x8x16xf32>
    %623 = arith.mulf %622, %619 : vector<2x8x16xf32>
    %624 = arith.select %621, %619, %623 : vector<2x8x16xi1>, vector<2x8x16xf32>
    %625 = vector.broadcast %522 : vector<1x1x16xf32> to vector<2x8x16xf32>
    %626 = arith.mulf %624, %625 : vector<2x8x16xf32>
    %cst_136 = arith.constant dense<0.000000e+00> : vector<2x8xf32>
    %627 = vector.multi_reduction <add>, %626, %cst_136 [2] : vector<2x8x16xf32> to vector<2x8xf32>
    %628 = vector.shape_cast %627 : vector<2x8xf32> to vector<2x8x1xf32>
    %629 = vector.extract_strided_slice %524 {offsets = [0, 5], sizes = [8, 1], strides = [1, 1]} : vector<8x8xf32> to vector<8x1xf32>
    %630 = vector.shape_cast %629 : vector<8x1xf32> to vector<1x8x1xf32>
    %631 = vector.broadcast %630 : vector<1x8x1xf32> to vector<2x8x1xf32>
    %632 = arith.addf %628, %631 : vector<2x8x1xf32>
    %633 = vector.extract_strided_slice %516 {offsets = [0, 6, 0], sizes = [2, 1, 16], strides = [1, 1, 1]} : vector<2x8x16xf32> to vector<2x1x16xf32>
    %634 = vector.broadcast %633 : vector<2x1x16xf32> to vector<2x8x16xf32>
    %635 = arith.addf %512, %634 : vector<2x8x16xf32>
    %636 = vector.broadcast %519 : vector<1x1x16xf32> to vector<2x8x16xf32>
    %637 = arith.addf %635, %636 : vector<2x8x16xf32>
    %cst_137 = arith.constant 0.000000e+00 : f32
    %638 = vector.broadcast %cst_137 : f32 to vector<2x8x16xf32>
    %639 = arith.cmpf ogt, %637, %638 : vector<2x8x16xf32>
    %cst_138 = arith.constant 2.000000e-01 : f32
    %640 = vector.broadcast %cst_138 : f32 to vector<2x8x16xf32>
    %641 = arith.mulf %640, %637 : vector<2x8x16xf32>
    %642 = arith.select %639, %637, %641 : vector<2x8x16xi1>, vector<2x8x16xf32>
    %643 = vector.broadcast %522 : vector<1x1x16xf32> to vector<2x8x16xf32>
    %644 = arith.mulf %642, %643 : vector<2x8x16xf32>
    %cst_139 = arith.constant dense<0.000000e+00> : vector<2x8xf32>
    %645 = vector.multi_reduction <add>, %644, %cst_139 [2] : vector<2x8x16xf32> to vector<2x8xf32>
    %646 = vector.shape_cast %645 : vector<2x8xf32> to vector<2x8x1xf32>
    %647 = vector.extract_strided_slice %524 {offsets = [0, 6], sizes = [8, 1], strides = [1, 1]} : vector<8x8xf32> to vector<8x1xf32>
    %648 = vector.shape_cast %647 : vector<8x1xf32> to vector<1x8x1xf32>
    %649 = vector.broadcast %648 : vector<1x8x1xf32> to vector<2x8x1xf32>
    %650 = arith.addf %646, %649 : vector<2x8x1xf32>
    %651 = vector.extract_strided_slice %516 {offsets = [0, 7, 0], sizes = [2, 1, 16], strides = [1, 1, 1]} : vector<2x8x16xf32> to vector<2x1x16xf32>
    %652 = vector.broadcast %651 : vector<2x1x16xf32> to vector<2x8x16xf32>
    %653 = arith.addf %512, %652 : vector<2x8x16xf32>
    %654 = vector.broadcast %519 : vector<1x1x16xf32> to vector<2x8x16xf32>
    %655 = arith.addf %653, %654 : vector<2x8x16xf32>
    %cst_140 = arith.constant 0.000000e+00 : f32
    %656 = vector.broadcast %cst_140 : f32 to vector<2x8x16xf32>
    %657 = arith.cmpf ogt, %655, %656 : vector<2x8x16xf32>
    %cst_141 = arith.constant 2.000000e-01 : f32
    %658 = vector.broadcast %cst_141 : f32 to vector<2x8x16xf32>
    %659 = arith.mulf %658, %655 : vector<2x8x16xf32>
    %660 = arith.select %657, %655, %659 : vector<2x8x16xi1>, vector<2x8x16xf32>
    %661 = vector.broadcast %522 : vector<1x1x16xf32> to vector<2x8x16xf32>
    %662 = arith.mulf %660, %661 : vector<2x8x16xf32>
    %cst_142 = arith.constant dense<0.000000e+00> : vector<2x8xf32>
    %663 = vector.multi_reduction <add>, %662, %cst_142 [2] : vector<2x8x16xf32> to vector<2x8xf32>
    %664 = vector.shape_cast %663 : vector<2x8xf32> to vector<2x8x1xf32>
    %665 = vector.extract_strided_slice %524 {offsets = [0, 7], sizes = [8, 1], strides = [1, 1]} : vector<8x8xf32> to vector<8x1xf32>
    %666 = vector.shape_cast %665 : vector<8x1xf32> to vector<1x8x1xf32>
    %667 = vector.broadcast %666 : vector<1x8x1xf32> to vector<2x8x1xf32>
    %668 = arith.addf %664, %667 : vector<2x8x1xf32>
    %669 = arith.maximumf %542, %560 : vector<2x8x1xf32>
    %670 = arith.maximumf %669, %578 : vector<2x8x1xf32>
    %671 = arith.maximumf %670, %596 : vector<2x8x1xf32>
    %672 = arith.maximumf %671, %614 : vector<2x8x1xf32>
    %673 = arith.maximumf %672, %632 : vector<2x8x1xf32>
    %674 = arith.maximumf %673, %650 : vector<2x8x1xf32>
    %675 = arith.maximumf %674, %668 : vector<2x8x1xf32>
    %676 = arith.subf %542, %675 : vector<2x8x1xf32>
    %677 = math.exp %676 : vector<2x8x1xf32>
    %678 = arith.subf %560, %675 : vector<2x8x1xf32>
    %679 = math.exp %678 : vector<2x8x1xf32>
    %680 = arith.subf %578, %675 : vector<2x8x1xf32>
    %681 = math.exp %680 : vector<2x8x1xf32>
    %682 = arith.subf %596, %675 : vector<2x8x1xf32>
    %683 = math.exp %682 : vector<2x8x1xf32>
    %684 = arith.subf %614, %675 : vector<2x8x1xf32>
    %685 = math.exp %684 : vector<2x8x1xf32>
    %686 = arith.subf %632, %675 : vector<2x8x1xf32>
    %687 = math.exp %686 : vector<2x8x1xf32>
    %688 = arith.subf %650, %675 : vector<2x8x1xf32>
    %689 = math.exp %688 : vector<2x8x1xf32>
    %690 = arith.subf %668, %675 : vector<2x8x1xf32>
    %691 = math.exp %690 : vector<2x8x1xf32>
    %692 = arith.addf %677, %679 : vector<2x8x1xf32>
    %693 = arith.addf %692, %681 : vector<2x8x1xf32>
    %694 = arith.addf %693, %683 : vector<2x8x1xf32>
    %695 = arith.addf %694, %685 : vector<2x8x1xf32>
    %696 = arith.addf %695, %687 : vector<2x8x1xf32>
    %697 = arith.addf %696, %689 : vector<2x8x1xf32>
    %698 = arith.addf %697, %691 : vector<2x8x1xf32>
    %699 = vector.extract_strided_slice %507 {offsets = [0, 0, 0], sizes = [2, 1, 4], strides = [1, 1, 1]} : vector<2x8x4xf32> to vector<2x1x4xf32>
    %700 = vector.broadcast %677 : vector<2x8x1xf32> to vector<2x8x4xf32>
    %701 = vector.broadcast %699 : vector<2x1x4xf32> to vector<2x8x4xf32>
    %702 = arith.mulf %700, %701 : vector<2x8x4xf32>
    %703 = vector.extract_strided_slice %507 {offsets = [0, 1, 0], sizes = [2, 1, 4], strides = [1, 1, 1]} : vector<2x8x4xf32> to vector<2x1x4xf32>
    %704 = vector.broadcast %679 : vector<2x8x1xf32> to vector<2x8x4xf32>
    %705 = vector.broadcast %703 : vector<2x1x4xf32> to vector<2x8x4xf32>
    %706 = arith.mulf %704, %705 : vector<2x8x4xf32>
    %707 = arith.addf %702, %706 : vector<2x8x4xf32>
    %708 = vector.extract_strided_slice %507 {offsets = [0, 2, 0], sizes = [2, 1, 4], strides = [1, 1, 1]} : vector<2x8x4xf32> to vector<2x1x4xf32>
    %709 = vector.broadcast %681 : vector<2x8x1xf32> to vector<2x8x4xf32>
    %710 = vector.broadcast %708 : vector<2x1x4xf32> to vector<2x8x4xf32>
    %711 = arith.mulf %709, %710 : vector<2x8x4xf32>
    %712 = arith.addf %707, %711 : vector<2x8x4xf32>
    %713 = vector.extract_strided_slice %507 {offsets = [0, 3, 0], sizes = [2, 1, 4], strides = [1, 1, 1]} : vector<2x8x4xf32> to vector<2x1x4xf32>
    %714 = vector.broadcast %683 : vector<2x8x1xf32> to vector<2x8x4xf32>
    %715 = vector.broadcast %713 : vector<2x1x4xf32> to vector<2x8x4xf32>
    %716 = arith.mulf %714, %715 : vector<2x8x4xf32>
    %717 = arith.addf %712, %716 : vector<2x8x4xf32>
    %718 = vector.extract_strided_slice %507 {offsets = [0, 4, 0], sizes = [2, 1, 4], strides = [1, 1, 1]} : vector<2x8x4xf32> to vector<2x1x4xf32>
    %719 = vector.broadcast %685 : vector<2x8x1xf32> to vector<2x8x4xf32>
    %720 = vector.broadcast %718 : vector<2x1x4xf32> to vector<2x8x4xf32>
    %721 = arith.mulf %719, %720 : vector<2x8x4xf32>
    %722 = arith.addf %717, %721 : vector<2x8x4xf32>
    %723 = vector.extract_strided_slice %507 {offsets = [0, 5, 0], sizes = [2, 1, 4], strides = [1, 1, 1]} : vector<2x8x4xf32> to vector<2x1x4xf32>
    %724 = vector.broadcast %687 : vector<2x8x1xf32> to vector<2x8x4xf32>
    %725 = vector.broadcast %723 : vector<2x1x4xf32> to vector<2x8x4xf32>
    %726 = arith.mulf %724, %725 : vector<2x8x4xf32>
    %727 = arith.addf %722, %726 : vector<2x8x4xf32>
    %728 = vector.extract_strided_slice %507 {offsets = [0, 6, 0], sizes = [2, 1, 4], strides = [1, 1, 1]} : vector<2x8x4xf32> to vector<2x1x4xf32>
    %729 = vector.broadcast %689 : vector<2x8x1xf32> to vector<2x8x4xf32>
    %730 = vector.broadcast %728 : vector<2x1x4xf32> to vector<2x8x4xf32>
    %731 = arith.mulf %729, %730 : vector<2x8x4xf32>
    %732 = arith.addf %727, %731 : vector<2x8x4xf32>
    %733 = vector.extract_strided_slice %507 {offsets = [0, 7, 0], sizes = [2, 1, 4], strides = [1, 1, 1]} : vector<2x8x4xf32> to vector<2x1x4xf32>
    %734 = vector.broadcast %691 : vector<2x8x1xf32> to vector<2x8x4xf32>
    %735 = vector.broadcast %733 : vector<2x1x4xf32> to vector<2x8x4xf32>
    %736 = arith.mulf %734, %735 : vector<2x8x4xf32>
    %737 = arith.addf %732, %736 : vector<2x8x4xf32>
    %738 = vector.broadcast %698 : vector<2x8x1xf32> to vector<2x8x4xf32>
    %739 = arith.divf %737, %738 : vector<2x8x4xf32>
    %740 = arith.negf %739 : vector<2x8x4xf32>
    %741 = math.exp %740 : vector<2x8x4xf32>
    %cst_143 = arith.constant 1.000000e+00 : f32
    %742 = vector.broadcast %cst_143 : f32 to vector<2x8x4xf32>
    %743 = arith.addf %742, %741 : vector<2x8x4xf32>
    %744 = arith.divf %742, %743 : vector<2x8x4xf32>
    %745 = vector.extract_strided_slice %744 {offsets = [0, 0, 0], sizes = [2, 1, 4], strides = [1, 1, 1]} : vector<2x8x4xf32> to vector<2x1x4xf32>
    %746 = vector.extract_strided_slice %744 {offsets = [0, 1, 0], sizes = [2, 1, 4], strides = [1, 1, 1]} : vector<2x8x4xf32> to vector<2x1x4xf32>
    %747 = vector.extract_strided_slice %744 {offsets = [0, 2, 0], sizes = [2, 1, 4], strides = [1, 1, 1]} : vector<2x8x4xf32> to vector<2x1x4xf32>
    %748 = vector.extract_strided_slice %744 {offsets = [0, 3, 0], sizes = [2, 1, 4], strides = [1, 1, 1]} : vector<2x8x4xf32> to vector<2x1x4xf32>
    %749 = vector.extract_strided_slice %744 {offsets = [0, 4, 0], sizes = [2, 1, 4], strides = [1, 1, 1]} : vector<2x8x4xf32> to vector<2x1x4xf32>
    %750 = vector.extract_strided_slice %744 {offsets = [0, 5, 0], sizes = [2, 1, 4], strides = [1, 1, 1]} : vector<2x8x4xf32> to vector<2x1x4xf32>
    %751 = vector.extract_strided_slice %744 {offsets = [0, 6, 0], sizes = [2, 1, 4], strides = [1, 1, 1]} : vector<2x8x4xf32> to vector<2x1x4xf32>
    %752 = vector.extract_strided_slice %744 {offsets = [0, 7, 0], sizes = [2, 1, 4], strides = [1, 1, 1]} : vector<2x8x4xf32> to vector<2x1x4xf32>
    %753 = tpu.concatenate %745, %746, %747, %748, %749, %750, %751, %752 in 2 : vector<2x1x4xf32>, vector<2x1x4xf32>, vector<2x1x4xf32>, vector<2x1x4xf32>, vector<2x1x4xf32>, vector<2x1x4xf32>, vector<2x1x4xf32>, vector<2x1x4xf32> -> vector<2x1x32xf32>
    %754 = vector.shape_cast %753 : vector<2x1x32xf32> to vector<2x32xf32>
    %c0_144 = arith.constant 0 : index
    %c0_145 = arith.constant 0 : index
    %755 = vector.load %arg12[%c0_144, %c0_145] : memref<32x32xf32, #tpu.memory_space<vmem>>, vector<32x32xf32>
    %cst_146 = arith.constant dense<0.000000e+00> : vector<2x32xf32>
    %756 = tpu.matmul %754, %755, %cst_146 {dimension_numbers = #tpu.dot_dimension_numbers<[1], [0], [0], [1], [0, 0, 1, 1], [], []>} : vector<2x32xf32>, vector<32x32xf32>, vector<2x32xf32> -> vector<2x32xf32>
    %c0_147 = arith.constant 0 : index
    %c0_148 = arith.constant 0 : index
    %757 = vector.load %arg13[%c0_147, %c0_148] : memref<1x32xf32, #tpu.memory_space<vmem>>, vector<1x32xf32>
    %758 = vector.broadcast %757 : vector<1x32xf32> to vector<2x32xf32>
    %759 = arith.addf %756, %758 : vector<2x32xf32>
    %cst_149 = arith.constant 0.000000e+00 : f32
    %760 = vector.broadcast %cst_149 : f32 to vector<2x32xf32>
    %761 = arith.maximumf %759, %760 : vector<2x32xf32>
    %c0_150 = arith.constant 0 : index
    %c0_151 = arith.constant 0 : index
    %762 = vector.load %arg14[%c0_150, %c0_151] : memref<32x32xf32, #tpu.memory_space<vmem>>, vector<32x32xf32>
    %cst_152 = arith.constant dense<0.000000e+00> : vector<2x32xf32>
    %763 = tpu.matmul %761, %762, %cst_152 {dimension_numbers = #tpu.dot_dimension_numbers<[1], [0], [0], [1], [0, 0, 1, 1], [], []>} : vector<2x32xf32>, vector<32x32xf32>, vector<2x32xf32> -> vector<2x32xf32>
    %c0_153 = arith.constant 0 : index
    %c0_154 = arith.constant 0 : index
    %764 = vector.load %arg15[%c0_153, %c0_154] : memref<1x32xf32, #tpu.memory_space<vmem>>, vector<1x32xf32>
    %765 = vector.broadcast %764 : vector<1x32xf32> to vector<2x32xf32>
    %766 = arith.addf %763, %765 : vector<2x32xf32>
    %767 = arith.addf %766, %10 : vector<2x32xf32>
    %c0_155 = arith.constant 0 : index
    %c0_156 = arith.constant 0 : index
    %768 = vector.load %arg16[%c0_155, %c0_156] : memref<2x32xf32, #tpu.memory_space<vmem>>, vector<2x32xf32>
    tpu.vector_store %arg16[%c0_155, %c0_156], %767 {strides = array<i32>} : memref<2x32xf32, #tpu.memory_space<vmem>>, vector<2x32xf32>,
    return
  }
  func.func @transform_0(%arg0: i32) -> (i32, i32, i32) {
    %c0_i32 = arith.constant 0 : i32
    %c0_i32_0 = arith.constant 0 : i32
    %c0_i32_1 = arith.constant 0 : i32
    return %arg0, %c0_i32, %c0_i32_0 : i32, i32, i32
  }
  func.func @transform_1(%arg0: i32) -> (i32, i32, i32) {
    %c0_i32 = arith.constant 0 : i32
    %c0_i32_0 = arith.constant 0 : i32
    %c0_i32_1 = arith.constant 0 : i32
    %c0_i32_2 = arith.constant 0 : i32
    return %c0_i32, %c0_i32_0, %c0_i32_1 : i32, i32, i32
  }
  func.func @transform_2(%arg0: i32) -> (i32, i32, i32) {
    %c0_i32 = arith.constant 0 : i32
    %c0_i32_0 = arith.constant 0 : i32
    %c0_i32_1 = arith.constant 0 : i32
    %c0_i32_2 = arith.constant 0 : i32
    return %c0_i32, %c0_i32_0, %c0_i32_1 : i32, i32, i32
  }
  func.func @transform_3(%arg0: i32) -> (i32, i32, i32) {
    %c0_i32 = arith.constant 0 : i32
    %c0_i32_0 = arith.constant 0 : i32
    %c0_i32_1 = arith.constant 0 : i32
    %c0_i32_2 = arith.constant 0 : i32
    return %c0_i32, %c0_i32_0, %c0_i32_1 : i32, i32, i32
  }
  func.func @transform_4(%arg0: i32) -> (i32, i32, i32) {
    %c0_i32 = arith.constant 0 : i32
    %c0_i32_0 = arith.constant 0 : i32
    %c0_i32_1 = arith.constant 0 : i32
    %c0_i32_2 = arith.constant 0 : i32
    return %c0_i32, %c0_i32_0, %c0_i32_1 : i32, i32, i32
  }
  func.func @transform_5(%arg0: i32) -> (i32, i32, i32) {
    %c0_i32 = arith.constant 0 : i32
    %c0_i32_0 = arith.constant 0 : i32
    %c0_i32_1 = arith.constant 0 : i32
    %c0_i32_2 = arith.constant 0 : i32
    return %c0_i32, %c0_i32_0, %c0_i32_1 : i32, i32, i32
  }
  func.func @transform_6(%arg0: i32) -> (i32, i32, i32) {
    %c0_i32 = arith.constant 0 : i32
    %c0_i32_0 = arith.constant 0 : i32
    %c0_i32_1 = arith.constant 0 : i32
    %c0_i32_2 = arith.constant 0 : i32
    return %c0_i32, %c0_i32_0, %c0_i32_1 : i32, i32, i32
  }
  func.func @transform_7(%arg0: i32) -> (i32, i32, i32) {
    %c0_i32 = arith.constant 0 : i32
    %c0_i32_0 = arith.constant 0 : i32
    %c0_i32_1 = arith.constant 0 : i32
    %c0_i32_2 = arith.constant 0 : i32
    return %c0_i32, %c0_i32_0, %c0_i32_1 : i32, i32, i32
  }
  func.func @transform_8(%arg0: i32) -> (i32, i32, i32) {
    %c0_i32 = arith.constant 0 : i32
    %c0_i32_0 = arith.constant 0 : i32
    %c0_i32_1 = arith.constant 0 : i32
    %c0_i32_2 = arith.constant 0 : i32
    return %c0_i32, %c0_i32_0, %c0_i32_1 : i32, i32, i32
  }
  func.func @transform_9(%arg0: i32) -> (i32, i32, i32) {
    %c0_i32 = arith.constant 0 : i32
    %c0_i32_0 = arith.constant 0 : i32
    %c0_i32_1 = arith.constant 0 : i32
    %c0_i32_2 = arith.constant 0 : i32
    return %c0_i32, %c0_i32_0, %c0_i32_1 : i32, i32, i32
  }
  func.func @transform_10(%arg0: i32) -> (i32, i32, i32) {
    %c0_i32 = arith.constant 0 : i32
    %c0_i32_0 = arith.constant 0 : i32
    %c0_i32_1 = arith.constant 0 : i32
    %c0_i32_2 = arith.constant 0 : i32
    return %c0_i32, %c0_i32_0, %c0_i32_1 : i32, i32, i32
  }
  func.func @transform_11(%arg0: i32) -> (i32, i32) {
    %c0_i32 = arith.constant 0 : i32
    %c0_i32_0 = arith.constant 0 : i32
    %c0_i32_1 = arith.constant 0 : i32
    return %c0_i32, %c0_i32_0 : i32, i32
  }
  func.func @transform_12(%arg0: i32) -> (i32, i32) {
    %c0_i32 = arith.constant 0 : i32
    %c0_i32_0 = arith.constant 0 : i32
    %c0_i32_1 = arith.constant 0 : i32
    return %c0_i32, %c0_i32_0 : i32, i32
  }
  func.func @transform_13(%arg0: i32) -> (i32, i32) {
    %c0_i32 = arith.constant 0 : i32
    %c0_i32_0 = arith.constant 0 : i32
    %c0_i32_1 = arith.constant 0 : i32
    return %c0_i32, %c0_i32_0 : i32, i32
  }
  func.func @transform_14(%arg0: i32) -> (i32, i32) {
    %c0_i32 = arith.constant 0 : i32
    %c0_i32_0 = arith.constant 0 : i32
    %c0_i32_1 = arith.constant 0 : i32
    return %c0_i32, %c0_i32_0 : i32, i32
  }
  func.func @transform_15(%arg0: i32) -> (i32, i32) {
    %c0_i32 = arith.constant 0 : i32
    %c0_i32_0 = arith.constant 0 : i32
    return %arg0, %c0_i32 : i32, i32
  }
}

</mosaic_0001>

<bundles_post_ra>
// kernel: tpu_custom_call.1
= control target key start
LH: loop header
LB: loop body
LE: loop exit
PB: predicated region body
PF: predicated region fallthrough
CT: control target
= control target key end

     0   :  { %vm114_vm0 = vcmask 64512   ;;  %s5327_s0 = inlined_call_operand.vmem [shape: f32[2,8,4], index: 0, kind: input, shape index: {}]   ;;  %s5328_s1 = inlined_call_operand.vmem [shape: f32[2,16,8], index: 1, kind: input, shape index: {}]   ;;  %s5329_s2 = inlined_call_operand.vmem [shape: f32[2,16,8], index: 2, kind: input, shape index: {}]   ;;  %s5330_s3 = inlined_call_operand.vmem [shape: f32[2,16,1], index: 3, kind: input, shape index: {}]   ;;  %s5331_s4 = inlined_call_operand.vmem [shape: f32[2,16,1], index: 4, kind: input, shape index: {}]   ;;  %s5332_s5 = inlined_call_operand.vmem [shape: f32[2,4,4], index: 5, kind: input, shape index: {}]   ;;  %s5333_s6 = inlined_call_operand.vmem [shape: f32[2,4,16], index: 6, kind: input, shape index: {}]   ;;  %s5334_s7 = inlined_call_operand.vmem [shape: f32[2,4,16], index: 7, kind: input, shape index: {}]   ;;  %s5335_s8 = inlined_call_operand.vmem [shape: f32[2,1,16], index: 8, kind: input, shape index: {}]   ;;  %s5336_s9 = inlined_call_operand.vmem [shape: f32[2,1,16], index: 9, kind: input, shape index: {}]   ;;  %s5337_s10 = inlined_call_operand.vmem [shape: f32[2,8,8], index: 10, kind: input, shape index: {}]   ;;  %s5338_s11 = inlined_call_operand.vmem [shape: f32[32,32], index: 11, kind: input, shape index: {}]   ;;  %s5339_s12 = inlined_call_operand.vmem [shape: f32[1,32], index: 12, kind: input, shape index: {}]   ;;  %s5340_s13 = inlined_call_operand.vmem [shape: f32[32,32], index: 13, kind: input, shape index: {}]   ;;  %s5341_s14 = inlined_call_operand.vmem [shape: f32[1,32], index: 14, kind: input, shape index: {}]   ;;  %s5342_s15 = inlined_call_operand.hbm [shape: f32[2,32], index: 15, kind: output, shape index: {}]  }
   0x1   :  { %v4195_v0 = vld [vmem:[%s5327_s0] sm:$0xff]  ;;  %v4200_v1 = vld [vmem:[%s5327_s0 + $0x8] sm:$0xff] }
   0x2   :  { %v132_v2 = vld [vmem:[%s5328_s1] sm:$0xff]  ;;  %3705 = vmatprep.subr.mxu0 %v4195_v0  ;;  %3710 = vmatprep.subr.mxu1 %v4200_v1  ;;  %v133_v3 = vld [vmem:[%s5328_s1 + $0x8] sm:$0xff] }
   0x3   :  { %3706 = vmatpush3.msra.mxu0 %v4195_v0  ;;  %3707 = vmatprep.mubr.msk.f32.mxu0 %vm114_vm0, %v132_v2 }
   0x4   :  { %20 = vsyncpa [#allocation3], 0  ;;  %3711 = vmatpush3.msra.mxu1 %v4200_v1  ;;  %3712 = vmatprep.mubr.msk.f32.mxu1 %vm114_vm0, %v132_v2  ;;  %v134_v4 = vld [vmem:[%s5329_s2] sm:$0xff]  ;;  %v135_v5 = vld [vmem:[%s5329_s2 + $0x8] sm:$0xff]  ;;  %v4080_v8 = vmov 0   ;;  %v4081_v9 = vmov 1  }
   0x5   :  { %3708 = vmatmul.mubr.msk.f32.vlgmr.msra.gmra.mrb[0].mxu0 %vm114_vm0, %v133_v3  ;;  %3713 = vmatmul.mubr.msk.f32.vlgmr.msra.gmra.mrb[0].mxu1 %vm114_vm0, %v133_v3  ;;  %v449_v6 = vld [vmem:[%s5330_s3 + $0x8] sm:$0xff]  ;;  %v448_v7 = vld [vmem:[%s5330_s3] sm:$0xff]  ;;  %v4082_v18 = vmov 2   ;;  %v4083_v19 = vmov 3   ;;  %vm912_vm1 = vcmask 1043456   ;;  %vm111_vm9 = vcmask 31744  }
   0x6   :  { %3715 = vmatprep.subr.mxu0 %v4195_v0  ;;  %3720 = vmatprep.subr.mxu1 %v4200_v1  ;;  %v451_v20 = vld [vmem:[%s5331_s4 + $0x8] sm:$0xff]  ;;  %v450_v21 = vld [vmem:[%s5331_s4] sm:$0xff]  ;;  %s4084_s20 = smov 127   ;;  %s4085_s21 = smov 126  }
   0x7   :  { %3716 = vmatpush3.msra.mxu0 %v4195_v0  ;;  %3717 = vmatprep.mubr.msk.f32.mxu0 %vm114_vm0, %v134_v4  ;;  %v905_v26 = vld [vmem:[%s5333_s6] sm:$0xf]  ;;  %s4086_s22 = smov 125   ;;  %s4087_s23 = smov 124  }
   0x8   :  { %3721 = vmatpush3.msra.mxu1 %v4200_v1  ;;  %3722 = vmatprep.mubr.msk.f32.mxu1 %vm114_vm0, %v134_v4  ;;  %v991_v27 = vld [vmem:[%s5334_s7] sm:$0xf]  ;;  %s4088_s24 = smov 123   ;;  %s4089_s25 = smov 122  }
   0x9   :  { %3718 = vmatmul.mubr.msk.f32.vlgmr.msra.gmra.mrb[2].mxu0 %vm114_vm0, %v135_v5  ;;  %3723 = vmatmul.mubr.msk.f32.vlgmr.msra.gmra.mrb[2].mxu1 %vm114_vm0, %v135_v5  ;;  %s4090_s26 = smov 121   ;;  %s4091_s27 = smov 1  }
   0xa   :  { %3832 = vset.pattern.permute.xlu0 %v4080_v8  ;;  %3831 = vset.pattern.permute.xlu1 %v4080_v8  ;;  %s4092_s28 = smov 2   ;;  %s5351_s29 = smov 3  }
   0xb   :  { %484 = vperm.xlu0 %3832, %v449_v6   ;;  %479 = vperm.xlu1 %3831, %v448_v7   ;;  %s5349_s30 = smov 4   ;;  %s5347_s16 = smov 5  }
   0xc   :  { %3725 = vmatprep.subr.msk.mxu0 %vm912_vm1, %v905_v26  ;;  %3730 = vmatprep.subr.msk.mxu1 %vm912_vm1, %v991_v27  ;;  %s5345_s17 = smov 6   ;;  %s5343_s18 = smov 7  }
   0xd   :  { %3726 = vmatpush3.msk.msra.mxu0 %vm912_vm1, %v905_v26  ;;  %3731 = vmatpush3.msk.msra.mxu1 %vm912_vm1, %v991_v27  ;;  %s5355_s19 = smov 5  }
   0xf   :  { %3833 = vset.pattern.permute.xlu0 %v4081_v9  ;;  %3834 = vset.pattern.permute.xlu1 %v4081_v9 }
  0x8a   :  { %v4284_v22 = vpop.permute.xlu1 %479  ;;  %v485_v23 = vpop.permute.xlu0 %484 }
  0xd8   :  { %v4240_v10 = vpop.f32.mrb[0].mxu1  ;;  %v4242_v11 = vpop.f32.mrb[0].mxu0 }
  0xd9   :  { %v4244_v12 = vpop.f32.mrb[1].mxu1  ;;  %v4246_v13 = vpop.f32.mrb[1].mxu0 }
  0xdc   :  { %v3719_v14 = vpop.f32.mrb[2].mxu0  ;;  %v3724_v15 = vpop.f32.mrb[2].mxu1 }
  0xdd   :  { %550 = vperm.xlu1 %3834, %v3724_v15   ;;  %v439_v16 = vpop.f32.mrb[3].mxu1  ;;  %542 = vperm.xlu0 %3833, %v3719_v14   ;;  %v364_v17 = vpop.f32.mrb[3].mxu0 }
  0xe1   :  { %3835 = vset.pattern.permute.xlu1 %v4080_v8  ;;  %3836 = vset.pattern.permute.xlu0 %v4082_v18 }
  0xe2   :  { %460 = vperm.xlu1 %3835, %v3719_v14   ;;  %602 = vperm.xlu0 %3836, %v3719_v14  }
  0xe6   :  { %470 = vperm.xlu1 %3835, %v3724_v15   ;;  %3839 = vset.pattern.permute.xlu0 %v4083_v19 }
  0xe7   :  { %670 = vperm.xlu0 %3839, %v3724_v15  }
  0xea   :  { %3837 = vset.pattern.permute.xlu1 %v4082_v18 }
  0xeb   :  { %610 = vperm.xlu1 %3837, %v3724_v15   ;;  %3840 = vset.pattern.permute.xlu0 %v4081_v9 }
  0xec   :  { %538 = vperm.xlu0 %3840, %v364_v17  }
  0xef   :  { %3838 = vset.pattern.permute.xlu1 %v4083_v19 }
  0xf0   :  { %662 = vperm.xlu1 %3838, %v3719_v14   ;;  %3842 = vset.pattern.permute.xlu0 %v4080_v8 }
  0xf1   :  { %455 = vperm.xlu0 %3842, %v364_v17  }
  0xf4   :  { %3841 = vset.pattern.permute.xlu1 %v4081_v9 }
  0xf5   :  { %546 = vperm.xlu1 %3841, %v439_v16   ;;  %3845 = vset.pattern.permute.xlu0 %v4082_v18 }
  0xf6   :  { %606 = vperm.xlu0 %3845, %v439_v16  }
  0xf9   :  { %3843 = vset.pattern.permute.xlu1 %v4082_v18 }
  0xfa   :  { %598 = vperm.xlu1 %3843, %v364_v17   ;;  %3846 = vset.pattern.permute.xlu0 %v4083_v19 }
  0xfb   :  { %658 = vperm.xlu0 %3846, %v364_v17  }
  0xfe   :  { %3844 = vset.pattern.permute.xlu1 %v4080_v8 }
  0xff   :  { %465 = vperm.xlu1 %3844, %v439_v16   ;;  %3849 = vset.pattern.permute.xlu0 %v4080_v8 }
 0x100   :  { %510 = vperm.xlu0 %3849, %v451_v20  }
 0x103   :  { %3847 = vset.pattern.permute.xlu1 %v4083_v19 }
 0x104   :  { %666 = vperm.xlu1 %3847, %v439_v16   ;;  %816 = vperm.xlu0 %3849, %v4200_v1  }
 0x108   :  { %3848 = vset.pattern.permute.xlu1 %v4080_v8  ;;  %3851 = vset.pattern.permute.xlu0 %v4082_v18 }
 0x109   :  { %505 = vperm.xlu1 %3848, %v450_v21   ;;  %850 = vperm.xlu0 %3851, %v4195_v0  }
 0x10d   :  { %812 = vperm.xlu1 %3848, %v4195_v0   ;;  %3854 = vset.pattern.permute.xlu0 %v4083_v19 }
 0x10e   :  { %874 = vperm.xlu0 %3854, %v4200_v1  }
 0x111   :  { %3850 = vset.pattern.permute.xlu1 %v4081_v9 }
 0x112   :  { %830 = vperm.xlu1 %3850, %v4195_v0   ;;  %3855 = vset.pattern.permute.xlu0 %v4080_v8 }
 0x116   :  { %834 = vperm.xlu1 %3850, %v4200_v1  }
 0x11a   :  { %3852 = vset.pattern.permute.xlu1 %v4082_v18 }
 0x11b   :  { %854 = vperm.xlu1 %3852, %v4200_v1  }
 0x11f   :  { %3853 = vset.pattern.permute.xlu1 %v4083_v19 }
 0x120   :  { %870 = vperm.xlu1 %3853, %v4195_v0  }
 0x124   :  { %3856 = vset.pattern.permute.xlu1 %v4080_v8 }
 0x15c   :  { %v551_v24 = vpop.permute.xlu1 %550  ;;  %v543_v25 = vpop.permute.xlu0 %542 }
 0x15d   :  { %v556_v34 = vadd.f32 %v4240_v10, %v551_v24  ;;  %v554_v35 = vadd.f32 %v4242_v11, %v543_v25 }
 0x15f   :  { %v560_v41 = vadd.f32 %v556_v34, %v485_v23  ;;  %v558_v44 = vadd.f32 %v554_v35, %v485_v23 }
 0x161   :  { %v461_v28 = vpop.permute.xlu1 %460  ;;  %v603_v29 = vpop.permute.xlu0 %602  ;;  %vm564_vm2 = vcmp.gt.f32.partialorder %v560_v41, 0.0  ;;  %v568_v52 = vmul.f32 0.2, %v560_v41  ;;  %vm562_vm3 = vcmp.gt.f32.partialorder %v558_v44, 0.0  ;;  %v566_v56 = vmul.f32 0.2, %v558_v44 }
 0x162   :  { %v474_v36 = vadd.f32 %v4242_v11, %v461_v28  ;;  %v614_v38 = vadd.f32 %v4242_v11, %v603_v29 }
 0x163   :  { %v572_v3 = vsel %vm564_vm2, %v560_v41, %v568_v52  ;;  %v570_v17 = vsel %vm562_vm3, %v558_v44, %v566_v56 }
 0x164   :  { %v488_v47 = vadd.f32 %v485_v23, %v474_v36  ;;  %v618_v49 = vadd.f32 %v614_v38, %v485_v23 }
 0x165   :  { %v471_v30 = vpop.permute.xlu1 %470 }
 0x166   :  { %v671_v31 = vpop.permute.xlu0 %670  ;;  %v476_v39 = vadd.f32 %v4240_v10, %v471_v30  ;;  %vm492_vm4 = vcmp.gt.f32.partialorder %v488_v47, 0.0  ;;  %v496_v59 = vmul.f32 0.2, %v488_v47  ;;  %vm622_vm5 = vcmp.gt.f32.partialorder %v618_v49, 0.0 }
 0x167   :  { %v676_v42 = vadd.f32 %v4240_v10, %v671_v31  ;;  %v626_v62 = vmul.f32 0.2, %v618_v49 }
 0x168   :  { %v490_v50 = vadd.f32 %v485_v23, %v476_v39  ;;  %v500_v20 = vsel %vm492_vm4, %v488_v47, %v496_v59 }
 0x169   :  { %v680_v53 = vadd.f32 %v676_v42, %v485_v23  ;;  %v630_v24 = vsel %vm622_vm5, %v618_v49, %v626_v62  ;;  %vm120_vm5 = vcmask 130048  }
 0x16a   :  { %v611_v32 = vpop.permute.xlu1 %610  ;;  %vm494_vm6 = vcmp.gt.f32.partialorder %v490_v50, 0.0  ;;  %v498_v0 = vmul.f32 0.2, %v490_v50 }
 0x16b   :  { %v539_v33 = vpop.permute.xlu0 %538  ;;  %v616_v43 = vadd.f32 %v4240_v10, %v611_v32  ;;  %vm684_vm7 = vcmp.gt.f32.partialorder %v680_v53, 0.0  ;;  %v688_v1 = vmul.f32 0.2, %v680_v53 }
 0x16c   :  { %v553_v45 = vadd.f32 %v539_v33, %v4246_v13  ;;  %v502_v25 = vsel %vm494_vm6, %v490_v50, %v498_v0 }
 0x16d   :  { %v620_v54 = vadd.f32 %v616_v43, %v485_v23 }
 0x16e   :  { %v557_v57 = vadd.f32 %v553_v45, %v4284_v22 }
 0x16f   :  { %v663_v37 = vpop.permute.xlu1 %662  ;;  %vm624_vm8 = vcmp.gt.f32.partialorder %v620_v54, 0.0  ;;  %v628_v4 = vmul.f32 0.2, %v620_v54 }
 0x170   :  { %v456_v40 = vpop.permute.xlu0 %455  ;;  %v674_v46 = vadd.f32 %v4242_v11, %v663_v37  ;;  %v565_v5 = vmul.f32 0.2, %v557_v57  ;;  %vm561_vm10 = vcmp.gt.f32.partialorder %v557_v57, 0.0 }
 0x171   :  { %v473_v48 = vadd.f32 %v456_v40, %v4246_v13  ;;  %v632_v26 = vsel %vm624_vm8, %v620_v54, %v628_v4 }
 0x172   :  { %v678_v58 = vadd.f32 %v674_v46, %v485_v23  ;;  %v569_v28 = vsel %vm561_vm10, %v557_v57, %v565_v5 }
 0x173   :  { %v487_v60 = vadd.f32 %v4284_v22, %v473_v48 }
 0x174   :  { %v547_v51 = vpop.permute.xlu1 %546  ;;  %v686_v6 = vmul.f32 0.2, %v678_v58  ;;  %vm682_vm11 = vcmp.gt.f32.partialorder %v678_v58, 0.0 }
 0x175   :  { %v607_v55 = vpop.permute.xlu0 %606  ;;  %v555_v61 = vadd.f32 %v547_v51, %v4244_v12  ;;  %v495_v10 = vmul.f32 0.2, %v487_v60  ;;  %vm491_vm12 = vcmp.gt.f32.partialorder %v487_v60, 0.0 }
 0x176   :  { %v615_v63 = vadd.f32 %v607_v55, %v4244_v12  ;;  %v690_v29 = vsel %vm682_vm11, %v678_v58, %v686_v6 }
 0x177   :  { %v559_v11 = vadd.f32 %v555_v61, %v4284_v22  ;;  %v499_v30 = vsel %vm491_vm12, %v487_v60, %v495_v10 }
 0x178   :  { %v619_v16 = vadd.f32 %v615_v63, %v4284_v22 }
 0x179   :  { %v599_v2 = vpop.permute.xlu1 %598  ;;  %vm563_vm13 = vcmp.gt.f32.partialorder %v559_v11, 0.0  ;;  %v567_v32 = vmul.f32 0.2, %v559_v11 }
 0x17a   :  { %v659_v7 = vpop.permute.xlu0 %658  ;;  %v613_v14 = vadd.f32 %v599_v2, %v4246_v13  ;;  %vm623_vm14 = vcmp.gt.f32.partialorder %v619_v16, 0.0  ;;  %v627_v33 = vmul.f32 0.2, %v619_v16 }
 0x17b   :  { %v673_v15 = vadd.f32 %v659_v7, %v4246_v13  ;;  %v692_v13 = vsel %vm684_vm7, %v680_v53, %v688_v1  ;;  %v571_v46 = vsel %vm563_vm13, %v559_v11, %v567_v32 }
 0x17c   :  { %v617_v21 = vadd.f32 %v613_v14, %v4284_v22  ;;  %v631_v50 = vsel %vm623_vm14, %v619_v16, %v627_v33 }
 0x17d   :  { %v677_v23 = vadd.f32 %v673_v15, %v4284_v22 }
 0x17e   :  { %v466_v27 = vpop.permute.xlu1 %465  ;;  %vm621_vm15 = vcmp.gt.f32.partialorder %v617_v21, 0.0  ;;  %v625_v35 = vmul.f32 0.2, %v617_v21 }
 0x17f   :  { %v511_v31 = vpop.permute.xlu0 %510  ;;  %v475_v34 = vadd.f32 %v466_v27, %v4244_v12  ;;  %vm681_vm2 = vcmp.gt.f32.partialorder %v677_v23, 0.0  ;;  %v685_v36 = vmul.f32 0.2, %v677_v23 }
 0x180   :  { %v514_v38 = vmul.f32 %v511_v31, %v500_v20  ;;  %v516_v39 = vmul.f32 %v511_v31, %v502_v25  ;;  %v574_v40 = vmul.f32 %v570_v17, %v511_v31  ;;  %v576_v41 = vmul.f32 %v572_v3, %v511_v31 }
 0x181   :  { %v489_v37 = vadd.f32 %v4284_v22, %v475_v34  ;;  %v634_v42 = vmul.f32 %v630_v24, %v511_v31  ;;  %v636_v43 = vmul.f32 %v632_v26, %v511_v31  ;;  %v694_v44 = vmul.f32 %v690_v29, %v511_v31 }
 0x182   :  { %v696_v48 = vmul.f32 %v692_v13, %v511_v31  ;;  %v629_v51 = vsel %vm621_vm15, %v617_v21, %v625_v35  ;;  %v689_v52 = vsel %vm681_vm2, %v677_v23, %v685_v36  ;;  %v518_v53 = vsel %vm111_vm9, %v514_v38, 0.0 }
 0x183   :  { %v667_v45 = vpop.permute.xlu1 %666  ;;  %v497_v47 = vmul.f32 0.2, %v489_v37  ;;  %vm493_vm3 = vcmp.gt.f32.partialorder %v489_v37, 0.0  ;;  %v527_v54 = vsel %vm111_vm9, %v516_v39, 0.0  ;;  %v578_v55 = vsel %vm111_vm9, %v574_v40, 0.0 }
 0x184   :  { %v675_v49 = vadd.f32 %v667_v45, %v4244_v12  ;;  %v587_v57 = vsel %vm111_vm9, %v576_v41, 0.0  ;;  %v638_v58 = vsel %vm111_vm9, %v634_v42, 0.0  ;;  %v647_v12 = vsel %vm111_vm9, %v636_v43, 0.0 }
 0x185   :  { %v698_v59 = vsel %vm111_vm9, %v694_v44, 0.0  ;;  %v501_v60 = vsel %vm493_vm3, %v489_v37, %v497_v47  ;;  %v707_v61 = vsel %vm111_vm9, %v696_v48, 0.0 }
 0x186   :  { %v679_v56 = vadd.f32 %v675_v49, %v4284_v22 }
 0x188   :  { %vm683_vm4 = vcmp.gt.f32.partialorder %v679_v56, 0.0  ;;  %v687_v62 = vmul.f32 0.2, %v679_v56  ;;  %v506_v63 = vpop.permute.xlu1 %505 }
 0x189   :  { %v513_v0 = vmul.f32 %v506_v63, %v499_v30  ;;  %v515_v1 = vmul.f32 %v506_v63, %v501_v60  ;;  %v573_v2 = vmul.f32 %v569_v28, %v506_v63  ;;  %v575_v3 = vmul.f32 %v571_v46, %v506_v63 }
 0x18a   :  { %v691_v4 = vsel %vm683_vm4, %v679_v56, %v687_v62  ;;  %v633_v22 = vmul.f32 %v629_v51, %v506_v63  ;;  %v635_v5 = vmul.f32 %v631_v50, %v506_v63  ;;  %v693_v6 = vmul.f32 %v689_v52, %v506_v63  ;;  %v452_v62 = vld [vmem:[%s5332_s5] sm:$0xf] }
 0x18b   :  { %v517_v7 = vsel %vm111_vm9, %v513_v0, 0.0  ;;  %v526_v10 = vsel %vm111_vm9, %v515_v1, 0.0  ;;  %v577_v11 = vsel %vm111_vm9, %v573_v2, 0.0  ;;  %v586_v14 = vsel %vm111_vm9, %v575_v3, 0.0 }
 0x18c   :  { %v579_v15 = vadd.f32 %v578_v55, %v577_v11  ;;  %v588_v16 = vadd.f32 %v587_v57, %v586_v14  ;;  %v637_v17 = vsel %vm111_vm9, %v633_v22, 0.0  ;;  %v646_v20 = vsel %vm111_vm9, %v635_v5, 0.0 }
 0x18d   :  { %v639_v21 = vadd.f32 %v638_v58, %v637_v17  ;;  %v648_v23 = vadd.f32 %v647_v12, %v646_v20  ;;  %v695_v24 = vmul.f32 %v691_v4, %v506_v63  ;;  %v697_v25 = vsel %vm111_vm9, %v693_v6, 0.0 }
 0x18e   :  { %v580_v13 = vrot.slane %v579_v15, 4  ;;  %v589_v26 = vrot.slane %v588_v16, 4  ;;  %v699_v27 = vadd.f32 %v698_v59, %v697_v25  ;;  %v528_v28 = vadd.f32 %v527_v54, %v526_v10 }
 0x18f   :  { %v640_v29 = vrot.slane %v639_v21, 4  ;;  %v649_v30 = vrot.slane %v648_v23, 4  ;;  %v706_v31 = vsel %vm111_vm9, %v695_v24, 0.0  ;;  %v519_v32 = vadd.f32 %v518_v53, %v517_v7 }
 0x190   :  { %v581_v33 = vadd.f32 %v580_v13, %v579_v15  ;;  %v590_v34 = vadd.f32 %v589_v26, %v588_v16  ;;  %v700_v35 = vrot.slane %v699_v27, 4  ;;  %v708_v36 = vadd.f32 %v707_v61, %v706_v31 }
 0x191   :  { %v641_v37 = vadd.f32 %v640_v29, %v639_v21  ;;  %v650_v38 = vadd.f32 %v649_v30, %v648_v23  ;;  %v529_v39 = vrot.slane %v528_v28, 4  ;;  %v520_v40 = vrot.slane %v519_v32, 4 }
 0x192   :  { %v582_v41 = vrot.slane %v581_v33, 2  ;;  %v591_v42 = vrot.slane %v590_v34, 2  ;;  %v701_v43 = vadd.f32 %v700_v35, %v699_v27  ;;  %v709_v44 = vrot.slane %v708_v36, 4 }
 0x193   :  { %v642_v45 = vrot.slane %v641_v37, 2  ;;  %v651_v46 = vrot.slane %v650_v38, 2  ;;  %v530_v47 = vadd.f32 %v529_v39, %v528_v28  ;;  %v521_v48 = vadd.f32 %v520_v40, %v519_v32  ;;  %v813_v40 = vpop.permute.xlu1 %812 }
 0x194   :  { %v583_v49 = vadd.f32 %v582_v41, %v581_v33  ;;  %v592_v50 = vadd.f32 %v591_v42, %v590_v34  ;;  %v702_v51 = vrot.slane %v701_v43, 2  ;;  %v710_v52 = vadd.f32 %v709_v44, %v708_v36 }
 0x195   :  { %v643_v53 = vadd.f32 %v642_v45, %v641_v37  ;;  %v652_v54 = vadd.f32 %v651_v46, %v650_v38  ;;  %v531_v55 = vrot.slane %v530_v47, 2  ;;  %v522_v56 = vrot.slane %v521_v48, 2 }
 0x196   :  { %v584_v57 = vrot.slane %v583_v49, 1  ;;  %v593_v58 = vrot.slane %v592_v50, 1  ;;  %v703_v12 = vadd.f32 %v702_v51, %v701_v43  ;;  %v711_v59 = vrot.slane %v710_v52, 2 }
 0x197   :  { %v644_v60 = vrot.slane %v643_v53, 1  ;;  %v653_v61 = vrot.slane %v652_v54, 1  ;;  %v532_v63 = vadd.f32 %v531_v55, %v530_v47  ;;  %v523_v0 = vadd.f32 %v522_v56, %v521_v48 }
 0x198   :  { %v585_v1 = vadd.f32 %v584_v57, %v583_v49  ;;  %v594_v2 = vadd.f32 %v593_v58, %v592_v50  ;;  %v712_v3 = vadd.f32 %v711_v59, %v710_v52  ;;  %v704_v4 = vrot.slane %v703_v12, 1 }
 0x199   :  { %v533_v22 = vrot.slane %v532_v63, 1  ;;  %v654_v5 = vadd.f32 %v653_v61, %v652_v54  ;;  %v524_v6 = vrot.slane %v523_v0, 1  ;;  %v645_v7 = vadd.f32 %v644_v60, %v643_v53  ;;  %v831_v53 = vpop.permute.xlu1 %830 }
 0x19a   :  { %v596_v10 = vadd.f32 %v594_v2, %v452_v62  ;;  %v713_v11 = vrot.slane %v712_v3, 1  ;;  %v595_v14 = vadd.f32 %v585_v1, %v452_v62  ;;  %v705_v15 = vadd.f32 %v704_v4, %v703_v12  ;;  %v817_v2 = vpop.permute.xlu0 %816 }
 0x19b   :  { %v534_v16 = vadd.f32 %v533_v22, %v532_v63  ;;  %v656_v17 = vadd.f32 %v654_v5, %v452_v62  ;;  %v525_v20 = vadd.f32 %v524_v6, %v523_v0  ;;  %v655_v21 = vadd.f32 %v645_v7, %v452_v62 }
 0x19c   :  { %v714_v23 = vadd.f32 %v713_v11, %v712_v3  ;;  %v720_v24 = vrot.slane %v596_v10, 1  ;;  %v719_v25 = vrot.slane %v595_v14, 1  ;;  %v715_v27 = vadd.f32 %v705_v15, %v452_v62 }
 0x19d   :  { %v536_v13 = vadd.f32 %v534_v16, %v452_v62  ;;  %v535_v26 = vadd.f32 %v525_v20, %v452_v62  ;;  %v728_v30 = vrot.slane %v656_v17, 2  ;;  %v727_v32 = vrot.slane %v655_v21, 2  ;;  %v835_v0 = vpop.permute.xlu1 %834 }
 0x19e   :  { %v716_v28 = vadd.f32 %v714_v23, %v452_v62  ;;  %v735_v36 = vrot.slane %v715_v27, 3  ;;  %v803_v39 = vlaneseq }
 0x19f   :  { %v724_v29 = vmax.f32 %v536_v13, %v720_v24  ;;  %v723_v31 = vmax.f32 %v535_v26, %v719_v25 }
 0x1a0   :  { %v736_v34 = vrot.slane %v716_v28, 3  ;;  %v4350_v62 = vshrl.u32 %v803_v39, 7 }
 0x1a1   :  { %v732_v33 = vmax.f32 %v724_v29, %v728_v30  ;;  %v731_v35 = vmax.f32 %v723_v31, %v727_v32  ;;  %v855_v7 = vpop.permute.xlu1 %854 }
 0x1a2   :  { %v4353_v1 = vsub.s32 0, %v4350_v62  ;;  %v4356_v3 = vsub.s32 1, %v4350_v62  ;;  %v4360_v6 = vsub.s32 2, %v4350_v62 }
 0x1a3   :  { %v740_v37 = vmax.f32 %v732_v33, %v736_v34  ;;  %v739_v38 = vmax.f32 %v731_v35, %v735_v36 }
 0x1a5   :  { %v742_v41 = vsub.f32 %v536_v13, %v740_v37  ;;  %v741_v42 = vsub.f32 %v535_v26, %v739_v38  ;;  %v749_v43 = vrot.slane %v739_v38, 7  ;;  %v750_v44 = vrot.slane %v740_v37, 7  ;;  %v871_v39 = vpop.permute.xlu1 %870 }
 0x1a6   :  { %v760_v45 = vrot.slane %v740_v37, 6  ;;  %v759_v46 = vrot.slane %v739_v38, 6  ;;  %v769_v47 = vrot.slane %v739_v38, 5  ;;  %v770_v48 = vrot.slane %v740_v37, 5 }
 0x1a7   :  { %v745_v49 = vmul.f32 1.442695, %v742_v41  ;;  %v743_v50 = vmul.f32 1.442695, %v741_v42  ;;  %v753_v51 = vsub.f32 %v595_v14, %v749_v43  ;;  %v754_v52 = vsub.f32 %v596_v10, %v750_v44  ;;  %v851_v14 = vpop.permute.xlu0 %850 }
 0x1a8   :  { %v764_v54 = vsub.f32 %v656_v17, %v760_v45  ;;  %v763_v55 = vsub.f32 %v655_v21, %v759_v46  ;;  %v773_v56 = vsub.f32 %v715_v27, %v769_v47  ;;  %v774_v57 = vsub.f32 %v716_v28, %v770_v48 }
 0x1a9   :  { %3910 = vpow2.f32 %v745_v49  ;;  %v755_v58 = vmul.f32 1.442695, %v753_v51  ;;  %v757_v12 = vmul.f32 1.442695, %v754_v52  ;;  %v4365_v17 = vsub.s32 3, %v4350_v62 }
 0x1aa   :  { %3912 = vpow2.f32 %v743_v50  ;;  %v767_v59 = vmul.f32 1.442695, %v764_v54  ;;  %v765_v60 = vmul.f32 1.442695, %v763_v55  ;;  %v775_v61 = vmul.f32 1.442695, %v773_v56 }
 0x1ab   :  { %3914 = vpow2.f32 %v755_v58  ;;  %v777_v63 = vmul.f32 1.442695, %v774_v57  ;;  %v875_v46 = vpop.permute.xlu0 %874 }
 0x1ac   :  { %3916 = vpow2.f32 %v757_v12 }
 0x1ad   :  { %3918 = vpow2.f32 %v767_v59 }
 0x1ae   :  { %3920 = vpow2.f32 %v765_v60 }
 0x1af   :  { %3922 = vpow2.f32 %v775_v61 }
 0x1b0   :  { %3924 = vpow2.f32 %v777_v63 }
 0x1b3   :  { %v3911_v4 = vpop.eup %3910 }
 0x1b4   :  { %v3913_v22 = vpop.eup %3912  ;;  %v810_v5 = vrot.slane %v3911_v4, %v4353_v1 }
 0x1b5   :  { %v3915_v10 = vpop.eup %3914  ;;  %v806_v11 = vrot.slane %v3913_v22, %v4353_v1 }
 0x1b6   :  { %v3917_v15 = vpop.eup %3916  ;;  %v824_v16 = vrot.slane %v3915_v10, %v4356_v3  ;;  %v781_v20 = vrot.slane %v3915_v10, 1  ;;  %v820_v23 = vmul.f32 %v817_v2, %v810_v5 }
 0x1b7   :  { %v3919_v21 = vpop.eup %3918  ;;  %v819_v24 = vmul.f32 %v813_v40, %v806_v11  ;;  %v828_v25 = vrot.slane %v3917_v15, %v4356_v3  ;;  %v782_v13 = vrot.slane %v3917_v15, 1  ;;  %v4387_v11 = vsub.s32 4, %v4350_v62 }
 0x1b8   :  { %v3921_v26 = vpop.eup %3920  ;;  %v837_v27 = vmul.f32 %v831_v53, %v824_v16  ;;  %v848_v28 = vrot.slane %v3919_v21, %v4360_v6  ;;  %v785_v29 = vadd.f32 %v3913_v22, %v781_v20  ;;  %v790_v30 = vrot.slane %v3919_v21, 2 }
 0x1b9   :  { %v3923_v31 = vpop.eup %3922  ;;  %v838_v32 = vmul.f32 %v835_v0, %v828_v25  ;;  %v844_v33 = vrot.slane %v3921_v26, %v4360_v6  ;;  %v789_v34 = vrot.slane %v3921_v26, 2  ;;  %v786_v35 = vadd.f32 %v3911_v4, %v782_v13  ;;  %v4411_v26 = vld [vmem:[%s5335_s8] ss:$0 sm:$0xff] }
 0x1ba   :  { %v3925_v36 = vpop.eup %3924  ;;  %v839_v37 = vadd.f32 %v837_v27, %v819_v24  ;;  %v858_v38 = vmul.f32 %v855_v7, %v848_v28  ;;  %v797_v40 = vrot.slane %v3923_v31, 3  ;;  %v864_v41 = vrot.slane %v3923_v31, %v4365_v17 }
 0x1bb   :  { %v840_v42 = vadd.f32 %v838_v32, %v820_v23  ;;  %v857_v43 = vmul.f32 %v851_v14, %v844_v33  ;;  %v793_v44 = vadd.f32 %v789_v34, %v785_v29  ;;  %v794_v45 = vadd.f32 %v790_v30, %v786_v35 }
 0x1bc   :  { %v798_v47 = vrot.slane %v3925_v36, 3  ;;  %v868_v48 = vrot.slane %v3925_v36, %v4365_v17  ;;  %v877_v52 = vmul.f32 %v871_v39, %v864_v41  ;;  %v4394_v16 = vsub.s32 5, %v4350_v62 }
 0x1bd   :  { %v860_v49 = vadd.f32 %v858_v38, %v840_v42  ;;  %v859_v50 = vadd.f32 %v857_v43, %v839_v37  ;;  %v801_v51 = vadd.f32 %v797_v40, %v793_v44  ;;  %v4436_v43 = vld [vmem:[%s5336_s9] ss:$0 sm:$0xff] }
 0x1be   :  { %v802_v53 = vadd.f32 %v798_v47, %v794_v45  ;;  %v878_v54 = vmul.f32 %v875_v46, %v868_v48 }
 0x1bf   :  { %v879_v55 = vadd.f32 %v877_v52, %v859_v50  ;;  %v884_v56 = vrot.slane %v801_v51, %v4353_v1 }
 0x1c0   :  { %v888_v57 = vrot.slane %v802_v53, %v4353_v1  ;;  %v880_v58 = vadd.f32 %v878_v54, %v860_v49 }
 0x1c1   :  { %3926 = vrcp.f32 %v884_v56 }
 0x1c2   :  { %3928 = vrcp.f32 %v888_v57 }
 0x1cb   :  { %v3927_v12 = vpop.eup %3926 }
 0x1cc   :  { %v3929_v59 = vpop.eup %3928  ;;  %v890_v60 = vmul.f32 %v3927_v12, %v879_v55 }
 0x1cd   :  { %v892_v61 = vmul.f32 %v3929_v59, %v880_v58 }
 0x1ce   :  { %v3609_v63 = vmul.f32 -1.442695, %v890_v60  ;;  %v4446_v60 = vsub.s32 6, %v4350_v62 }
 0x1cf   :  { %v3610_v0 = vmul.f32 -1.442695, %v892_v61 }
 0x1d0   :  { %3930 = vpow2.f32 %v3609_v63 }
 0x1d1   :  { %3932 = vpow2.f32 %v3610_v0 }
 0x1da   :  { %v3931_v2 = vpop.eup %3930 }
 0x1db   :  { %v3933_v4 = vpop.eup %3932  ;;  %v899_v22 = vadd.f32 1.0, %v3931_v2  ;;  %v4451_v2 = vsub.s32 7, %v4350_v62 }
 0x1dc   :  { %v900_v5 = vadd.f32 1.0, %v3933_v4 }
 0x1dd   :  { %3934 = vrcp.f32 %v899_v22 }
 0x1de   :  { %3936 = vrcp.f32 %v900_v5 }
 0x1e7   :  { %v4374_v7 = vpop.eup %3934 }
 0x1e8   :  { %v4376_v10 = vpop.eup %3936  ;;  %3727 = vmatprep.mubr.msk.f32.mxu0 %vm111_vm9, %v4374_v7  ;;  %3732 = vmatprep.mubr.msk.f32.mxu1 %vm111_vm9, %v4374_v7 }
 0x1e9   :  { %3728 = vmatmul.mubr.msk.f32.vlgmr.msra.gmra.mrb[4].mxu0 %vm111_vm9, %v4376_v10  ;;  %3733 = vmatmul.mubr.msk.f32.vlgmr.msra.gmra.mrb[4].mxu1 %vm111_vm9, %v4376_v10 }
 0x2bc   :  { %v4389_v14 = vpop.f32.mrb[4].mxu0  ;;  %v4391_v15 = vpop.f32.mrb[4].mxu1 }
 0x2bd   :  { %v4396_v20 = vpop.f32.mrb[5].mxu0  ;;  %v4398_v21 = vpop.f32.mrb[5].mxu1  ;;  %v1120_v23 = vrot.slane %v4391_v15, %v4356_v3  ;;  %v1148_v24 = vrot.slane %v4391_v15, %v4360_v6  ;;  %v1176_v25 = vrot.slane %v4391_v15, %v4365_v17  ;;  %v1204_v13 = vrot.slane %v4391_v15, %v4387_v11 }
 0x2be   :  { %v1116_v27 = vrot.slane %v4398_v21, %v4356_v3  ;;  %v1144_v28 = vrot.slane %v4398_v21, %v4360_v6  ;;  %v1172_v29 = vrot.slane %v4398_v21, %v4365_v17  ;;  %v1200_v30 = vrot.slane %v4398_v21, %v4387_v11 }
 0x2bf   :  { %v1122_v31 = vadd.f32 %v4389_v14, %v1120_v23  ;;  %v1150_v32 = vadd.f32 %v4389_v14, %v1148_v24  ;;  %v1178_v33 = vadd.f32 %v4389_v14, %v1176_v25  ;;  %v1206_v34 = vadd.f32 %v4389_v14, %v1204_v13 }
 0x2c0   :  { %v1121_v35 = vadd.f32 %v1116_v27, %v4396_v20  ;;  %v1149_v36 = vadd.f32 %v1144_v28, %v4396_v20  ;;  %v1177_v37 = vadd.f32 %v1172_v29, %v4396_v20  ;;  %v1205_v38 = vadd.f32 %v1200_v30, %v4396_v20 }
 0x2c1   :  { %v1124_v39 = vadd.f32 %v4411_v26, %v1122_v31  ;;  %v1152_v40 = vadd.f32 %v4411_v26, %v1150_v32  ;;  %v1180_v41 = vadd.f32 %v4411_v26, %v1178_v33  ;;  %v1208_v42 = vadd.f32 %v4411_v26, %v1206_v34 }
 0x2c2   :  { %v1123_v44 = vadd.f32 %v4411_v26, %v1121_v35  ;;  %v1151_v45 = vadd.f32 %v4411_v26, %v1149_v36  ;;  %v1179_v46 = vadd.f32 %v4411_v26, %v1177_v37  ;;  %v1207_v47 = vadd.f32 %v4411_v26, %v1205_v38 }
 0x2c3   :  { %vm1126_vm6 = vcmp.gt.f32.partialorder %v1124_v39, 0.0  ;;  %v1128_v48 = vmul.f32 0.2, %v1124_v39  ;;  %vm1154_vm7 = vcmp.gt.f32.partialorder %v1152_v40, 0.0  ;;  %v1156_v49 = vmul.f32 0.2, %v1152_v40 }
 0x2c4   :  { %vm1125_vm8 = vcmp.gt.f32.partialorder %v1123_v44, 0.0  ;;  %v1127_v50 = vmul.f32 0.2, %v1123_v44  ;;  %vm1153_vm10 = vcmp.gt.f32.partialorder %v1151_v45, 0.0  ;;  %v1155_v51 = vmul.f32 0.2, %v1151_v45 }
 0x2c5   :  { %v1130_v52 = vsel %vm1126_vm6, %v1124_v39, %v1128_v48  ;;  %v1158_v53 = vsel %vm1154_vm7, %v1152_v40, %v1156_v49  ;;  %vm1182_vm11 = vcmp.gt.f32.partialorder %v1180_v41, 0.0  ;;  %v1184_v54 = vmul.f32 0.2, %v1180_v41 }
 0x2c6   :  { %v1132_v55 = vmul.f32 %v4436_v43, %v1130_v52  ;;  %v1129_v56 = vsel %vm1125_vm8, %v1123_v44, %v1127_v50  ;;  %v1160_v57 = vmul.f32 %v4436_v43, %v1158_v53  ;;  %v1157_v58 = vsel %vm1153_vm10, %v1151_v45, %v1155_v51 }
 0x2c7   :  { %v1131_v12 = vmul.f32 %v4436_v43, %v1129_v56  ;;  %v1186_v59 = vsel %vm1182_vm11, %v1180_v41, %v1184_v54  ;;  %vm1181_vm12 = vcmp.gt.f32.partialorder %v1179_v46, 0.0  ;;  %v1159_v63 = vmul.f32 %v4436_v43, %v1157_v58 }
 0x2c8   :  { %v1136_v61 = vsel %vm120_vm5, %v1132_v55, 0.0  ;;  %v1183_v0 = vmul.f32 0.2, %v1179_v46  ;;  %v1188_v22 = vmul.f32 %v4436_v43, %v1186_v59  ;;  %vm1210_vm13 = vcmp.gt.f32.partialorder %v1208_v42, 0.0 }
 0x2c9   :  { %1137 = vadd.xlane.f32.xlu0 %v1136_v61  ;;  %v1133_v4 = vsel %vm120_vm5, %v1131_v12, 0.0  ;;  %v1212_v5 = vmul.f32 0.2, %v1208_v42  ;;  %v1164_v23 = vsel %vm120_vm5, %v1160_v57, 0.0  ;;  %vm1209_vm14 = vcmp.gt.f32.partialorder %v1207_v47, 0.0 }
 0x2ca   :  { %1134 = vadd.xlane.f32.xlu1 %v1133_v4  ;;  %v1185_v24 = vsel %vm1181_vm12, %v1179_v46, %v1183_v0  ;;  %v1211_v25 = vmul.f32 0.2, %v1207_v47  ;;  %v1232_v62 = vrot.slane %v4391_v15, %v4394_v16  ;;  %v1228_v28 = vrot.slane %v4398_v21, %v4394_v16 }
 0x2cb   :  { %v1187_v13 = vmul.f32 %v4436_v43, %v1185_v24  ;;  %v1214_v27 = vsel %vm1210_vm13, %v1208_v42, %v1212_v5  ;;  %v1161_v29 = vsel %vm120_vm5, %v1159_v63, 0.0  ;;  %v1260_v31 = vrot.slane %v4391_v15, %v4446_v60 }
 0x2cc   :  { %v1213_v30 = vsel %vm1209_vm14, %v1207_v47, %v1211_v25  ;;  %v1256_v32 = vrot.slane %v4398_v21, %v4446_v60  ;;  %v1192_v33 = vsel %vm120_vm5, %v1188_v22, 0.0  ;;  %v1216_v34 = vmul.f32 %v4436_v43, %v1214_v27 }
 0x2cd   :  { %1165 = vadd.xlane.f32.xlu0 %v1164_v23  ;;  %v1234_v35 = vadd.f32 %v4389_v14, %v1232_v62  ;;  %v1233_v36 = vadd.f32 %v1228_v28, %v4396_v20  ;;  %v1189_v37 = vsel %vm120_vm5, %v1187_v13, 0.0  ;;  %v1262_v38 = vadd.f32 %v4389_v14, %v1260_v31 }
 0x2ce   :  { %1162 = vadd.xlane.f32.xlu1 %v1161_v29  ;;  %v1261_v39 = vadd.f32 %v1256_v32, %v4396_v20  ;;  %v1288_v40 = vrot.slane %v4391_v15, %v4451_v2  ;;  %v1215_v41 = vmul.f32 %v4436_v43, %v1213_v30  ;;  %v1284_v45 = vrot.slane %v4398_v21, %v4451_v2 }
 0x2cf   :  { %v1236_v42 = vadd.f32 %v4411_v26, %v1234_v35  ;;  %v1235_v44 = vadd.f32 %v4411_v26, %v1233_v36  ;;  %v1264_v46 = vadd.f32 %v4411_v26, %v1262_v38  ;;  %v1080_v49 = vrot.slane %v4391_v15, %v4353_v1 }
 0x2d0   :  { %v1263_v47 = vadd.f32 %v4411_v26, %v1261_v39  ;;  %v1290_v48 = vadd.f32 %v4389_v14, %v1288_v40  ;;  %v1289_v57 = vadd.f32 %v1284_v45, %v4396_v20  ;;  %v1220_v58 = vsel %vm120_vm5, %v1216_v34, 0.0 }
 0x2d1   :  { %1193 = vadd.xlane.f32.xlu0 %v1192_v33  ;;  %vm1238_vm15 = vcmp.gt.f32.partialorder %v1236_v42, 0.0  ;;  %v1240_v50 = vmul.f32 0.2, %v1236_v42  ;;  %vm1237_vm2 = vcmp.gt.f32.partialorder %v1235_v44, 0.0  ;;  %v1239_v51 = vmul.f32 0.2, %v1235_v44 }
 0x2d2   :  { %1190 = vadd.xlane.f32.xlu1 %v1189_v37  ;;  %vm1266_vm3 = vcmp.gt.f32.partialorder %v1264_v46, 0.0  ;;  %v1268_v52 = vmul.f32 0.2, %v1264_v46  ;;  %vm1265_vm4 = vcmp.gt.f32.partialorder %v1263_v47, 0.0  ;;  %v1267_v53 = vmul.f32 0.2, %v1263_v47 }
 0x2d3   :  { %v1242_v54 = vsel %vm1238_vm15, %v1236_v42, %v1240_v50  ;;  %v1241_v55 = vsel %vm1237_vm2, %v1235_v44, %v1239_v51  ;;  %v1292_v56 = vadd.f32 %v4411_v26, %v1290_v48  ;;  %v1217_v61 = vsel %vm120_vm5, %v1215_v41, 0.0  ;;  %v1072_v42 = vld [vmem:[%s5337_s10] sm:$0xff] }
 0x2d4   :  { %v1244_v15 = vmul.f32 %v4436_v43, %v1242_v54  ;;  %v1270_v12 = vsel %vm1266_vm3, %v1264_v46, %v1268_v52  ;;  %v1269_v59 = vsel %vm1265_vm4, %v1263_v47, %v1267_v53  ;;  %v1243_v63 = vmul.f32 %v4436_v43, %v1241_v55 }
 0x2d5   :  { %1221 = vadd.xlane.f32.xlu0 %v1220_v58  ;;  %v1296_v0 = vmul.f32 0.2, %v1292_v56  ;;  %vm1294_vm6 = vcmp.gt.f32.partialorder %v1292_v56, 0.0  ;;  %v1291_v4 = vadd.f32 %v4411_v26, %v1289_v57  ;;  %v1082_v22 = vadd.f32 %v4389_v14, %v1080_v49 }
 0x2d6   :  { %1218 = vadd.xlane.f32.xlu1 %v1217_v61  ;;  %v1272_v5 = vmul.f32 %v4436_v43, %v1270_v12  ;;  %v1271_v23 = vmul.f32 %v4436_v43, %v1269_v59  ;;  %v1076_v24 = vrot.slane %v4398_v21, %v4353_v1  ;;  %v1248_v25 = vsel %vm120_vm5, %v1244_v15, 0.0 }
 0x2d7   :  { %vm1293_vm7 = vcmp.gt.f32.partialorder %v1291_v4, 0.0  ;;  %v1295_v13 = vmul.f32 0.2, %v1291_v4  ;;  %v1090_v27 = vadd.f32 %v4411_v26, %v1082_v22  ;;  %v1245_v62 = vsel %vm120_vm5, %v1243_v63, 0.0 }
 0x2d8   :  { %v1298_v28 = vsel %vm1294_vm6, %v1292_v56, %v1296_v0  ;;  %v1081_v29 = vadd.f32 %v1076_v24, %v4396_v20  ;;  %v1276_v21 = vsel %vm120_vm5, %v1272_v5, 0.0  ;;  %v1273_v32 = vsel %vm120_vm5, %v1271_v23, 0.0 }
 0x2d9   :  { %1249 = vadd.xlane.f32.xlu0 %v1248_v25  ;;  %v1297_v14 = vsel %vm1293_vm7, %v1291_v4, %v1295_v13  ;;  %vm1092_vm8 = vcmp.gt.f32.partialorder %v1090_v27, 0.0  ;;  %v1094_v30 = vmul.f32 0.2, %v1090_v27  ;;  %v1300_v33 = vmul.f32 %v4436_v43, %v1298_v28 }
 0x2da   :  { %1246 = vadd.xlane.f32.xlu1 %v1245_v62  ;;  %v1089_v31 = vadd.f32 %v4411_v26, %v1081_v29  ;;  %v1299_v34 = vmul.f32 %v4436_v43, %v1297_v14 }
 0x2db   :  { %v1096_v35 = vsel %vm1092_vm8, %v1090_v27, %v1094_v30  ;;  %v1304_v37 = vsel %vm120_vm5, %v1300_v33, 0.0 }
 0x2dc   :  { %vm1091_vm10 = vcmp.gt.f32.partialorder %v1089_v31, 0.0  ;;  %v1093_v36 = vmul.f32 0.2, %v1089_v31  ;;  %v1104_v38 = vmul.f32 %v4436_v43, %v1096_v35  ;;  %v1301_v26 = vsel %vm120_vm5, %v1299_v34, 0.0 }
 0x2dd   :  { %1277 = vadd.xlane.f32.xlu0 %v1276_v21 }
 0x2de   :  { %1274 = vadd.xlane.f32.xlu1 %v1273_v32  ;;  %v1095_v20 = vsel %vm1091_vm10, %v1089_v31, %v1093_v36  ;;  %v1108_v40 = vsel %vm120_vm5, %v1104_v38, 0.0 }
 0x2df   :  { %v1103_v39 = vmul.f32 %v4436_v43, %v1095_v20 }
 0x2e1   :  { %1305 = vadd.xlane.f32.xlu0 %v1304_v37  ;;  %v1105_v41 = vsel %vm120_vm5, %v1103_v39, 0.0 }
 0x2e2   :  { %1302 = vadd.xlane.f32.xlu1 %v1301_v26 }
 0x2e5   :  { %1109 = vadd.xlane.f32.xlu0 %v1108_v40 }
 0x2e6   :  { %1106 = vadd.xlane.f32.xlu1 %v1105_v41 }
 0x356   :  { %v1138_v44 = vpop.xlane.xlu0 %1137 }
 0x357   :  { %v4515_v45 = vadd.f32 %v1138_v44, %v1072_v42  ;;  %v1135_v46 = vpop.xlane.xlu1 %1134 }
 0x358   :  { %v4539_v57 = vadd.f32 %v1135_v46, %v1072_v42 }
 0x359   :  { %1313 = vrot.lane.b32.xlu0 %v4515_v45, %s4084_s20 }
 0x35a   :  { %v1166_v43 = vpop.xlane.xlu0 %1165 }
 0x35b   :  { %v4519_v47 = vadd.f32 %v1166_v43, %v1072_v42  ;;  %v1163_v48 = vpop.xlane.xlu1 %1162 }
 0x35c   :  { %v4547_v59 = vadd.f32 %v1163_v48, %v1072_v42 }
 0x35d   :  { %1323 = vrot.lane.b32.xlu1 %v4519_v47, %s4085_s21 }
 0x35e   :  { %v1194_v49 = vpop.xlane.xlu0 %1193 }
 0x35f   :  { %v4523_v50 = vadd.f32 %v1194_v49, %v1072_v42  ;;  %v1191_v51 = vpop.xlane.xlu1 %1190 }
 0x360   :  { %v4525_v52 = vadd.f32 %v1191_v51, %v1072_v42 }
 0x361   :  { %1333 = vrot.lane.b32.xlu1 %v4523_v50, %s4086_s22 }
 0x362   :  { %v1222_v53 = vpop.xlane.xlu0 %1221  ;;  %1331 = vrot.lane.b32.xlu0 %v4525_v52, %s4086_s22 }
 0x363   :  { %v4531_v54 = vadd.f32 %v1222_v53, %v1072_v42  ;;  %v1219_v55 = vpop.xlane.xlu1 %1218 }
 0x364   :  { %v4533_v56 = vadd.f32 %v1219_v55, %v1072_v42 }
 0x365   :  { %1343 = vrot.lane.b32.xlu1 %v4531_v54, %s4087_s23 }
 0x366   :  { %1341 = vrot.lane.b32.xlu0 %v4533_v56, %s4087_s23  ;;  %v1250_v15 = vpop.xlane.xlu0 %1249 }
 0x367   :  { %v1247_v58 = vpop.xlane.xlu1 %1246  ;;  %v4555_v4 = vadd.f32 %v1250_v15, %v1072_v42 }
 0x368   :  { %v4541_v12 = vadd.f32 %v1247_v58, %v1072_v42 }
 0x369   :  { %1311 = vrot.lane.b32.xlu1 %v4539_v57, %s4084_s20 }
 0x36a   :  { %1351 = vrot.lane.b32.xlu0 %v4541_v12, %s4088_s24  ;;  %v1278_v0 = vpop.xlane.xlu0 %1277 }
 0x36b   :  { %v1275_v61 = vpop.xlane.xlu1 %1274  ;;  %v4563_v23 = vadd.f32 %v1278_v0, %v1072_v42 }
 0x36c   :  { %v4549_v63 = vadd.f32 %v1275_v61, %v1072_v42 }
 0x36d   :  { %1321 = vrot.lane.b32.xlu1 %v4547_v59, %s4085_s21 }
 0x36e   :  { %1361 = vrot.lane.b32.xlu0 %v4549_v63, %s4089_s25  ;;  %v1306_v24 = vpop.xlane.xlu0 %1305 }
 0x36f   :  { %v1303_v22 = vpop.xlane.xlu1 %1302  ;;  %v4567_v25 = vadd.f32 %v1306_v24, %v1072_v42 }
 0x370   :  { %v4557_v5 = vadd.f32 %v1303_v22, %v1072_v42 }
 0x371   :  { %1353 = vrot.lane.b32.xlu1 %v4555_v4, %s4088_s24 }
 0x372   :  { %1371 = vrot.lane.b32.xlu0 %v4557_v5, %s4090_s26  ;;  %v1110_v27 = vpop.xlane.xlu0 %1109 }
 0x373   :  { %v1107_v13 = vpop.xlane.xlu1 %1106  ;;  %v4573_v34 = vadd.f32 %v1110_v27, %v1072_v42 }
 0x374   :  { %v4571_v32 = vadd.f32 %v1107_v13, %v1072_v42 }
 0x375   :  { %1363 = vrot.lane.b32.xlu1 %v4563_v23, %s4089_s25 }
 0x379   :  { %1373 = vrot.lane.b32.xlu1 %v4567_v25, %s4090_s26 }
 0x3cb   :  { %v1314_v28 = vpop.permute.xlu0 %1313 }
 0x3cc   :  { %v1318_v20 = vmax.f32 %v4573_v34, %v1314_v28 }
 0x3cf   :  { %v1324_v62 = vpop.permute.xlu1 %1323 }
 0x3d0   :  { %v1328_v38 = vmax.f32 %v1318_v20, %v1324_v62 }
 0x3d3   :  { %v1334_v29 = vpop.permute.xlu1 %1333 }
 0x3d4   :  { %v1332_v14 = vpop.permute.xlu0 %1331  ;;  %v1338_v41 = vmax.f32 %v1328_v38, %v1334_v29 }
 0x3d7   :  { %v1344_v30 = vpop.permute.xlu1 %1343 }
 0x3d8   :  { %v1342_v31 = vpop.permute.xlu0 %1341  ;;  %v1348_v46 = vmax.f32 %v1338_v41, %v1344_v30 }
 0x3db   :  { %v1312_v21 = vpop.permute.xlu1 %1311 }
 0x3dc   :  { %v1352_v33 = vpop.permute.xlu0 %1351  ;;  %v1317_v35 = vmax.f32 %v4571_v32, %v1312_v21 }
 0x3df   :  { %v1322_v36 = vpop.permute.xlu1 %1321 }
 0x3e0   :  { %v1327_v37 = vmax.f32 %v1317_v35, %v1322_v36  ;;  %v1362_v39 = vpop.permute.xlu0 %1361 }
 0x3e2   :  { %v1337_v26 = vmax.f32 %v1327_v37, %v1332_v14 }
 0x3e3   :  { %v1354_v40 = vpop.permute.xlu1 %1353 }
 0x3e4   :  { %v1347_v44 = vmax.f32 %v1337_v26, %v1342_v31  ;;  %v1358_v51 = vmax.f32 %v1348_v46, %v1354_v40  ;;  %v1372_v53 = vpop.permute.xlu0 %1371 }
 0x3e6   :  { %v1357_v43 = vmax.f32 %v1347_v44, %v1352_v33 }
 0x3e7   :  { %v1364_v48 = vpop.permute.xlu1 %1363 }
 0x3e8   :  { %v1367_v49 = vmax.f32 %v1357_v43, %v1362_v39  ;;  %v1368_v55 = vmax.f32 %v1358_v51, %v1364_v48 }
 0x3ea   :  { %v4577_v42 = vmax.f32 %v1367_v49, %v1372_v53 }
 0x3eb   :  { %v1374_v58 = vpop.permute.xlu1 %1373 }
 0x3ec   :  { %v4579_v15 = vmax.f32 %v1368_v55, %v1374_v58  ;;  %1387 = vrot.lane.b32.xlu0 %v4577_v42, %s4091_s27  ;;  %v1379_v61 = vsub.f32 %v4571_v32, %v4577_v42 }
 0x3ee   :  { %1389 = vrot.lane.b32.xlu1 %v4579_v15, %s4091_s27  ;;  %v1380_v0 = vsub.f32 %v4573_v34, %v4579_v15 }
 0x3f0   :  { %1399 = vrot.lane.b32.xlu0 %v4577_v42, %s4092_s28 }
 0x3f2   :  { %1401 = vrot.lane.b32.xlu1 %v4579_v15, %s4092_s28 }
 0x3f4   :  { %1411 = vrot.lane.b32.xlu0 %v4577_v42, %s5351_s29 }
 0x3f6   :  { %1413 = vrot.lane.b32.xlu1 %v4579_v15, %s5351_s29 }
 0x3f8   :  { %1423 = vrot.lane.b32.xlu0 %v4577_v42, %s5349_s30 }
 0x3fa   :  { %1425 = vrot.lane.b32.xlu1 %v4579_v15, %s5349_s30 }
 0x3fc   :  { %1435 = vrot.lane.b32.xlu0 %v4577_v42, %s5347_s16 }
 0x3fe   :  { %1437 = vrot.lane.b32.xlu1 %v4579_v15, %s5347_s16 }
 0x400   :  { %1447 = vrot.lane.b32.xlu0 %v4577_v42, %s5345_s17 }
 0x402   :  { %1449 = vrot.lane.b32.xlu1 %v4579_v15, %s5345_s17 }
 0x404   :  { %1459 = vrot.lane.b32.xlu0 %v4577_v42, %s5343_s18 }
 0x406   :  { %1461 = vrot.lane.b32.xlu1 %v4579_v15, %s5343_s18  ;;  %s5354_s18 = smov 4  }
 0x45e   :  { %v1388_v22 = vpop.permute.xlu0 %1387 }
 0x45f   :  { %v1393_v24 = vsub.f32 %v4539_v57, %v1388_v22 }
 0x460   :  { %v1390_v13 = vpop.permute.xlu1 %1389 }
 0x461   :  { %v1395_v27 = vmul.f32 1.442695, %v1393_v24  ;;  %v1394_v62 = vsub.f32 %v4515_v45, %v1390_v13 }
 0x462   :  { %v1400_v28 = vpop.permute.xlu0 %1399 }
 0x463   :  { %3938 = vpow2.f32 %v1395_v27  ;;  %v1397_v29 = vmul.f32 1.442695, %v1394_v62  ;;  %v1405_v14 = vsub.f32 %v4547_v59, %v1400_v28 }
 0x464   :  { %v1402_v30 = vpop.permute.xlu1 %1401 }
 0x465   :  { %3940 = vpow2.f32 %v1397_v29  ;;  %v1407_v31 = vmul.f32 1.442695, %v1405_v14  ;;  %v1406_v21 = vsub.f32 %v4519_v47, %v1402_v30  ;;  %v1381_v30 = vmul.f32 1.442695, %v1379_v61 }
 0x466   :  { %v1412_v33 = vpop.permute.xlu0 %1411 }
 0x467   :  { %3942 = vpow2.f32 %v1407_v31  ;;  %v1409_v35 = vmul.f32 1.442695, %v1406_v21  ;;  %v1417_v36 = vsub.f32 %v4525_v52, %v1412_v33  ;;  %v1383_v31 = vmul.f32 1.442695, %v1380_v0 }
 0x468   :  { %v1414_v57 = vpop.permute.xlu1 %1413  ;;  %v4098_v0 = vmov 4   ;;  %v4099_v33 = vmov 5  }
 0x469   :  { %3944 = vpow2.f32 %v1409_v35  ;;  %v1419_v20 = vmul.f32 1.442695, %v1417_v36  ;;  %v1418_v45 = vsub.f32 %v4523_v50, %v1414_v57  ;;  %v4100_v35 = vmov 6  }
 0x46a   :  { %v1424_v37 = vpop.permute.xlu0 %1423 }
 0x46b   :  { %3946 = vpow2.f32 %v1419_v20  ;;  %v1421_v38 = vmul.f32 1.442695, %v1418_v45  ;;  %v1429_v59 = vsub.f32 %v4533_v56, %v1424_v37 }
 0x46c   :  { %v1426_v26 = vpop.permute.xlu1 %1425 }
 0x46d   :  { %v4620_v39 = vpop.eup %3938  ;;  %3948 = vpow2.f32 %v1421_v38  ;;  %v1431_v47 = vmul.f32 1.442695, %v1429_v59  ;;  %v1430_v40 = vsub.f32 %v4531_v54, %v1426_v26 }
 0x46e   :  { %1473 = vrot.lane.b32.xlu0 %v4620_v39, %s4084_s20  ;;  %v1436_v52 = vpop.permute.xlu0 %1435 }
 0x46f   :  { %v3941_v41 = vpop.eup %3940  ;;  %3950 = vpow2.f32 %v1431_v47  ;;  %v1433_v44 = vmul.f32 1.442695, %v1430_v40  ;;  %v1441_v50 = vsub.f32 %v4541_v12, %v1436_v52 }
 0x470   :  { %1475 = vrot.lane.b32.xlu1 %v3941_v41, %s4084_s20  ;;  %v1438_v46 = vpop.permute.xlu1 %1437 }
 0x471   :  { %v4627_v56 = vpop.eup %3942  ;;  %3952 = vpow2.f32 %v1433_v44  ;;  %v1443_v43 = vmul.f32 1.442695, %v1441_v50  ;;  %v1442_v48 = vsub.f32 %v4555_v4, %v1438_v46 }
 0x472   :  { %1483 = vrot.lane.b32.xlu0 %v4627_v56, %s4085_s21  ;;  %v1448_v54 = vpop.permute.xlu0 %1447 }
 0x473   :  { %v3945_v49 = vpop.eup %3944  ;;  %3954 = vpow2.f32 %v1443_v43  ;;  %v1445_v51 = vmul.f32 1.442695, %v1442_v48  ;;  %v1453_v53 = vsub.f32 %v4549_v63, %v1448_v54 }
 0x474   :  { %1485 = vrot.lane.b32.xlu1 %v3945_v49, %s4085_s21  ;;  %v1450_v12 = vpop.permute.xlu1 %1449 }
 0x475   :  { %v3947_v55 = vpop.eup %3946  ;;  %3956 = vpow2.f32 %v1445_v51  ;;  %v1455_v58 = vmul.f32 1.442695, %v1453_v53  ;;  %v1454_v22 = vsub.f32 %v4563_v23, %v1450_v12 }
 0x476   :  { %1493 = vrot.lane.b32.xlu0 %v3947_v55, %s4086_s22  ;;  %v1460_v4 = vpop.permute.xlu0 %1459 }
 0x477   :  { %v3949_v24 = vpop.eup %3948  ;;  %3958 = vpow2.f32 %v1455_v58  ;;  %v1457_v13 = vmul.f32 1.442695, %v1454_v22  ;;  %v1465_v27 = vsub.f32 %v4557_v5, %v1460_v4 }
 0x478   :  { %1495 = vrot.lane.b32.xlu1 %v3949_v24, %s4086_s22  ;;  %v1462_v62 = vpop.permute.xlu1 %1461 }
 0x479   :  { %v3951_v63 = vpop.eup %3950  ;;  %3960 = vpow2.f32 %v1457_v13  ;;  %v1467_v28 = vmul.f32 1.442695, %v1465_v27  ;;  %v1466_v29 = vsub.f32 %v4567_v25, %v1462_v62  ;;  %v3621_v13 = vld [vmem:[%s5328_s1 + $0x10] sm:$0xff]  ;;  %v3634_v62 = vld [vmem:[%s5330_s3 + $0x18] sm:$0xff] }
 0x47a   :  { %1503 = vrot.lane.b32.xlu0 %v3951_v63, %s4087_s23  ;;  %3737 = vmatprep.mubr.msk.f32.mxu0 %vm114_vm0, %v3621_v13  ;;  %v3633_v27 = vld [vmem:[%s5330_s3 + $0x10] sm:$0xff]  ;;  %s4106_s3 = smov 20  }
 0x47b   :  { %v3953_v14 = vpop.eup %3952  ;;  %3962 = vpow2.f32 %v1467_v28  ;;  %v1469_v23 = vmul.f32 1.442695, %v1466_v29  ;;  %3742 = vmatprep.mubr.msk.f32.mxu1 %vm114_vm0, %v3621_v13 }
 0x47c   :  { %1505 = vrot.lane.b32.xlu1 %v3953_v14, %s4087_s23 }
 0x47d   :  { %v3955_v5 = vpop.eup %3954  ;;  %3964 = vpow2.f32 %v1469_v23 }
 0x47e   :  { %1513 = vrot.lane.b32.xlu0 %v3955_v5, %s4088_s24  ;;  %3966 = vpow2.f32 %v1381_v30 }
 0x47f   :  { %v3957_v25 = vpop.eup %3956  ;;  %3968 = vpow2.f32 %v1383_v31 }
 0x480   :  { %1515 = vrot.lane.b32.xlu1 %v3957_v25, %s4088_s24 }
 0x481   :  { %v3959_v21 = vpop.eup %3958 }
 0x482   :  { %1523 = vrot.lane.b32.xlu0 %v3959_v21, %s4089_s25 }
 0x483   :  { %v3961_v32 = vpop.eup %3960 }
 0x484   :  { %1525 = vrot.lane.b32.xlu1 %v3961_v32, %s4089_s25 }
 0x485   :  { %v4651_v42 = vpop.eup %3962 }
 0x486   :  { %1533 = vrot.lane.b32.xlu0 %v4651_v42, %s4090_s26 }
 0x487   :  { %v4655_v34 = vpop.eup %3964 }
 0x488   :  { %1535 = vrot.lane.b32.xlu1 %v4655_v34, %s4090_s26  ;;  %v3967_v15 = vpop.eup %3966 }
 0x489   :  { %v3969_v61 = vpop.eup %3968 }
 0x48a   :  { %1543 = vperm.xlu0 %3855, %v3967_v15  }
 0x48c   :  { %1548 = vperm.xlu1 %3856, %v3969_v61  }
 0x48e   :  { %3857 = vset.pattern.permute.xlu0 %v4081_v9 }
 0x48f   :  { %1566 = vperm.xlu0 %3857, %v3941_v41  }
 0x490   :  { %3858 = vset.pattern.permute.xlu1 %v4082_v18 }
 0x491   :  { %1586 = vperm.xlu1 %3858, %v3945_v49  }
 0x493   :  { %3864 = vset.pattern.permute.xlu0 %v4083_v19 }
 0x494   :  { %1602 = vperm.xlu0 %3864, %v3947_v55  }
 0x495   :  { %3859 = vset.pattern.permute.xlu1 %v4083_v19 }
 0x496   :  { %1606 = vperm.xlu1 %3859, %v3949_v24   ;;  %v4101_v24 = vmov 7  }
 0x498   :  { %3865 = vset.pattern.permute.xlu0 %v4098_v0 }
 0x499   :  { %1622 = vperm.xlu0 %3865, %v3951_v63  }
 0x49a   :  { %3860 = vset.pattern.permute.xlu1 %v4098_v0 }
 0x49b   :  { %1626 = vperm.xlu1 %3860, %v3953_v14  }
 0x49d   :  { %3866 = vset.pattern.permute.xlu0 %v4099_v33 }
 0x49e   :  { %1642 = vperm.xlu0 %3866, %v3955_v5  }
 0x49f   :  { %3861 = vset.pattern.permute.xlu1 %v4099_v33 }
 0x4a0   :  { %1646 = vperm.xlu1 %3861, %v3957_v25   ;;  %v1572_v25 = vrot.slane %v4374_v7, %v4356_v3 }
 0x4a2   :  { %3867 = vset.pattern.permute.xlu0 %v4100_v35 }
 0x4a3   :  { %1666 = vperm.xlu0 %3867, %v3961_v32  }
 0x4a4   :  { %3862 = vset.pattern.permute.xlu1 %v4081_v9 }
 0x4a5   :  { %1562 = vperm.xlu1 %3862, %v4620_v39  }
 0x4a7   :  { %3872 = vset.pattern.permute.xlu0 %v4081_v9 }
 0x4a9   :  { %3863 = vset.pattern.permute.xlu1 %v4082_v18 }
 0x4aa   :  { %1582 = vperm.xlu1 %3863, %v4627_v56  }
 0x4ae   :  { %3868 = vset.pattern.permute.xlu1 %v4100_v35 }
 0x4af   :  { %1662 = vperm.xlu1 %3868, %v3959_v21  }
 0x4b3   :  { %3869 = vset.pattern.permute.xlu1 %v4080_v8 }
 0x4e0   :  { %v1474_v36 = vpop.permute.xlu0 %1473 }
 0x4e1   :  { %v1479_v41 = vadd.f32 %v3967_v15, %v1474_v36  ;;  %v1592_v15 = vrot.slane %v4374_v7, %v4360_v6 }
 0x4e2   :  { %v1476_v57 = vpop.permute.xlu1 %1475 }
 0x4e3   :  { %v1480_v39 = vadd.f32 %v3969_v61, %v1476_v57  ;;  %v1576_v57 = vrot.slane %v4376_v10, %v4356_v3 }
 0x4e4   :  { %v1484_v20 = vpop.permute.xlu0 %1483 }
 0x4e5   :  { %v1489_v50 = vadd.f32 %v1484_v20, %v1479_v41  ;;  %v1632_v41 = vrot.slane %v4374_v7, %v4387_v11 }
 0x4e6   :  { %v1486_v45 = vpop.permute.xlu1 %1485 }
 0x4e7   :  { %v1490_v40 = vadd.f32 %v1486_v45, %v1480_v39 }
 0x4e8   :  { %v1494_v37 = vpop.permute.xlu0 %1493 }
 0x4e9   :  { %v1499_v48 = vadd.f32 %v1494_v37, %v1489_v50  ;;  %v1558_v37 = vrot.slane %v4376_v10, %v4353_v1 }
 0x4ea   :  { %v1496_v38 = vpop.permute.xlu1 %1495 }
 0x4eb   :  { %v1500_v44 = vadd.f32 %v1496_v38, %v1490_v40  ;;  %v1596_v40 = vrot.slane %v4376_v10, %v4360_v6 }
 0x4ec   :  { %v1504_v59 = vpop.permute.xlu0 %1503 }
 0x4ed   :  { %v1509_v49 = vadd.f32 %v1504_v59, %v1499_v48  ;;  %v1612_v59 = vrot.slane %v4374_v7, %v4365_v17 }
 0x4ee   :  { %v1506_v26 = vpop.permute.xlu1 %1505 }
 0x4ef   :  { %v1510_v46 = vadd.f32 %v1506_v26, %v1500_v44 }
 0x4f0   :  { %v1514_v47 = vpop.permute.xlu0 %1513 }
 0x4f1   :  { %v1519_v12 = vadd.f32 %v1514_v47, %v1509_v49 }
 0x4f2   :  { %v1516_v52 = vpop.permute.xlu1 %1515 }
 0x4f3   :  { %v1520_v54 = vadd.f32 %v1516_v52, %v1510_v46  ;;  %v1616_v46 = vrot.slane %v4376_v10, %v4365_v17 }
 0x4f4   :  { %v1524_v56 = vpop.permute.xlu0 %1523 }
 0x4f5   :  { %v1529_v22 = vadd.f32 %v1524_v56, %v1519_v12 }
 0x4f6   :  { %v1526_v43 = vpop.permute.xlu1 %1525 }
 0x4f7   :  { %v1530_v51 = vadd.f32 %v1526_v43, %v1520_v54 }
 0x4f8   :  { %v1534_v58 = vpop.permute.xlu0 %1533 }
 0x4f9   :  { %v1539_v4 = vadd.f32 %v1534_v58, %v1529_v22  ;;  %v1656_v58 = vrot.slane %v4376_v10, %v4394_v16 }
 0x4fa   :  { %v1536_v53 = vpop.permute.xlu1 %1535 }
 0x4fb   :  { %v1540_v55 = vadd.f32 %v1536_v53, %v1530_v51  ;;  %v1636_v51 = vrot.slane %v4376_v10, %v4387_v11  ;;  %v1652_v53 = vrot.slane %v4374_v7, %v4394_v16 }
 0x4fd   :  { %1708 = vperm.xlu1 %3869, %v1540_v55  }
 0x501   :  { %1703 = vperm.xlu1 %3869, %v1539_v4  }
 0x505   :  { %3870 = vset.pattern.permute.xlu1 %v4101_v24 }
 0x506   :  { %1682 = vperm.xlu1 %3870, %v4651_v42   ;;  %v1554_v42 = vrot.slane %v4374_v7, %v4353_v1 }
 0x509   :  { %v1544_v23 = vpop.permute.xlu0 %1543 }
 0x50a   :  { %1686 = vperm.xlu1 %3870, %v4655_v34   ;;  %v1559_v61 = vmul.f32 %v1554_v42, %v1544_v23 }
 0x50b   :  { %v1549_v63 = vpop.permute.xlu1 %1548 }
 0x50c   :  { %v1560_v47 = vmul.f32 %v1558_v37, %v1549_v63  ;;  %v1676_v63 = vrot.slane %v4376_v10, %v4446_v60 }
 0x50e   :  { %3871 = vset.pattern.permute.xlu1 %v4080_v8  ;;  %v1567_v5 = vpop.permute.xlu0 %1566 }
 0x50f   :  { %2079 = vperm.xlu1 %3871, %v3633_v27   ;;  %v1578_v38 = vmul.f32 %v1576_v57, %v1567_v5  ;;  %v1672_v5 = vrot.slane %v4374_v7, %v4446_v60 }
 0x510   :  { %v1587_v28 = vpop.permute.xlu1 %1586 }
 0x511   :  { %v1580_v44 = vadd.f32 %v1578_v38, %v1560_v47  ;;  %v1598_v50 = vmul.f32 %v1596_v40, %v1587_v28 }
 0x513   :  { %2084 = vperm.xlu1 %3871, %v3634_v62   ;;  %v1603_v21 = vpop.permute.xlu0 %1602  ;;  %v1600_v12 = vadd.f32 %v1598_v50, %v1580_v44  ;;  %v3623_v50 = vld [vmem:[%s5329_s2 + $0x10] sm:$0xff] }
 0x514   :  { %v1617_v52 = vmul.f32 %v1612_v59, %v1603_v21 }
 0x515   :  { %v1607_v29 = vpop.permute.xlu1 %1606 }
 0x516   :  { %v1618_v54 = vmul.f32 %v1616_v46, %v1607_v29  ;;  %v3624_v46 = vld [vmem:[%s5329_s2 + $0x18] sm:$0xff] }
 0x517   :  { %3874 = vset.pattern.permute.xlu1 %v4082_v18 }
 0x518   :  { %v1623_v45 = vpop.permute.xlu0 %1622  ;;  %v1620_v13 = vadd.f32 %v1618_v54, %v1600_v12 }
 0x519   :  { %v1637_v49 = vmul.f32 %v1632_v41, %v1623_v45  ;;  %v3622_v41 = vld [vmem:[%s5328_s1 + $0x18] sm:$0xff] }
 0x51a   :  { %v1627_v14 = vpop.permute.xlu1 %1626 }
 0x51b   :  { %v1638_v55 = vmul.f32 %v1636_v51, %v1627_v14  ;;  %v1692_v14 = vrot.slane %v4374_v7, %v4451_v2 }
 0x51d   :  { %v1643_v48 = vpop.permute.xlu0 %1642  ;;  %v1640_v29 = vadd.f32 %v1638_v55, %v1620_v13  ;;  %v3636_v55 = vld [vmem:[%s5331_s4 + $0x18] sm:$0xff] }
 0x51e   :  { %v1657_v27 = vmul.f32 %v1652_v53, %v1643_v48 }
 0x51f   :  { %v1647_v30 = vpop.permute.xlu1 %1646 }
 0x520   :  { %v1658_v62 = vmul.f32 %v1656_v58, %v1647_v30  ;;  %v1696_v30 = vrot.slane %v4376_v10, %v4451_v2  ;;  %v3635_v58 = vld [vmem:[%s5331_s4 + $0x10] sm:$0xff] }
 0x522   :  { %v1667_v28 = vpop.permute.xlu0 %1666 }
 0x523   :  { %v1678_v21 = vmul.f32 %v1676_v63, %v1667_v28  ;;  %v3644_v63 = vld [vmem:[%s5334_s7 + $0x4] sm:$0xf] }
 0x524   :  { %v1563_v31 = vpop.permute.xlu1 %1562 }
 0x525   :  { %v1577_v34 = vmul.f32 %v1572_v25, %v1563_v31  ;;  %v1660_v25 = vadd.f32 %v1658_v62, %v1640_v29  ;;  %v3640_v62 = vld [vmem:[%s5333_s6 + $0x4] sm:$0xf] }
 0x527   :  { %v1579_v20 = vadd.f32 %v1577_v34, %v1559_v61  ;;  %v1680_v61 = vadd.f32 %v1678_v21, %v1660_v25 }
 0x529   :  { %v1583_v32 = vpop.permute.xlu1 %1582 }
 0x52a   :  { %v1597_v36 = vmul.f32 %v1592_v15, %v1583_v32 }
 0x52c   :  { %v1599_v26 = vadd.f32 %v1597_v36, %v1579_v20 }
 0x52e   :  { %v1663_v39 = vpop.permute.xlu1 %1662  ;;  %v1619_v56 = vadd.f32 %v1617_v52, %v1599_v26 }
 0x52f   :  { %v1677_v32 = vmul.f32 %v1672_v5, %v1663_v39 }
 0x530   :  { %v1639_v22 = vadd.f32 %v1637_v49, %v1619_v56 }
 0x532   :  { %v1659_v23 = vadd.f32 %v1657_v27, %v1639_v22 }
 0x534   :  { %v1679_v34 = vadd.f32 %v1677_v32, %v1659_v23 }
 0x57c   :  { %v1709_v43 = vpop.permute.xlu1 %1708 }
 0x580   :  { %v1704_v4 = vpop.permute.xlu1 %1703 }
 0x581   :  { %3970 = vrcp.f32 %v1704_v4 }
 0x582   :  { %3972 = vrcp.f32 %v1709_v43 }
 0x585   :  { %v1683_v31 = vpop.permute.xlu1 %1682 }
 0x586   :  { %v1697_v42 = vmul.f32 %v1692_v14, %v1683_v31 }
 0x588   :  { %v1699_v36 = vadd.f32 %v1697_v42, %v1679_v34 }
 0x589   :  { %v1687_v15 = vpop.permute.xlu1 %1686 }
 0x58a   :  { %v1698_v57 = vmul.f32 %v1696_v30, %v1687_v15 }
 0x58b   :  { %v3971_v20 = vpop.eup %3970 }
 0x58c   :  { %v1712_v45 = vmul.f32 %v3971_v20, %v1699_v36  ;;  %v1700_v37 = vadd.f32 %v1698_v57, %v1680_v61  ;;  %v3973_v38 = vpop.eup %3972 }
 0x58e   :  { %v3619_v59 = vmul.f32 -1.442695, %v1712_v45  ;;  %v1714_v26 = vmul.f32 %v3973_v38, %v1700_v37  ;;  %v4793_v22 = vpop.permute.xlu1 %2079 }
 0x590   :  { %3974 = vpow2.f32 %v3619_v59  ;;  %v3620_v7 = vmul.f32 -1.442695, %v1714_v26 }
 0x592   :  { %3976 = vpow2.f32 %v3620_v7  ;;  %v4795_v4 = vpop.permute.xlu1 %2084 }
 0x59a   :  { %v3975_v47 = vpop.eup %3974 }
 0x59b   :  { %v1721_v39 = vadd.f32 1.0, %v3975_v47 }
 0x59c   :  { %v3977_v40 = vpop.eup %3976 }
 0x59d   :  { %3978 = vrcp.f32 %v1721_v39  ;;  %v1722_v52 = vadd.f32 1.0, %v3977_v40 }
 0x59f   :  { %3980 = vrcp.f32 %v1722_v52 }
 0x5a7   :  { %v4723_v10 = vpop.eup %3978 }
 0x5a8   :  { %3735 = vmatprep.subr.mxu0 %v4723_v10 }
 0x5a9   :  { %v4729_v44 = vpop.eup %3980  ;;  %3736 = vmatpush3.msra.mxu0 %v4723_v10 }
 0x5aa   :  { %3740 = vmatprep.subr.mxu1 %v4729_v44  ;;  %3745 = vmatprep.subr.mxu0 %v4723_v10 }
 0x5ab   :  { %3738 = vmatmul.mubr.msk.f32.vlgmr.msra.gmra.mrb[6].mxu0 %vm114_vm0, %v3622_v41  ;;  %3741 = vmatpush3.msra.mxu1 %v4729_v44 }
 0x5ac   :  { %3746 = vmatpush3.msra.mxu0 %v4723_v10  ;;  %3743 = vmatmul.mubr.msk.f32.vlgmr.msra.gmra.mrb[6].mxu1 %vm114_vm0, %v3622_v41 }
 0x5ad   :  { %3750 = vmatprep.subr.mxu1 %v4729_v44  ;;  %3752 = vmatprep.mubr.msk.f32.mxu1 %vm114_vm0, %v3623_v50 }
 0x5ae   :  { %3751 = vmatpush3.msra.mxu1 %v4729_v44  ;;  %3747 = vmatprep.mubr.msk.f32.mxu0 %vm114_vm0, %v3623_v50 }
 0x5af   :  { %3748 = vmatmul.mubr.msk.f32.vlgmr.msra.gmra.mrb[8].mxu0 %vm114_vm0, %v3624_v46  ;;  %3755 = vmatprep.subr.msk.mxu0 %vm912_vm1, %v3640_v62 }
 0x5b0   :  { %3753 = vmatmul.mubr.msk.f32.vlgmr.msra.gmra.mrb[8].mxu1 %vm114_vm0, %v3624_v46  ;;  %3760 = vmatprep.subr.msk.mxu1 %vm912_vm1, %v3644_v63 }
 0x5b1   :  { %3756 = vmatpush3.msk.msra.mxu0 %vm912_vm1, %v3640_v62  ;;  %3761 = vmatpush3.msk.msra.mxu1 %vm912_vm1, %v3644_v63 }
 0x67e   :  { %v4750_v56 = vpop.f32.mrb[6].mxu0 }
 0x67f   :  { %v4752_v43 = vpop.f32.mrb[6].mxu1  ;;  %v4754_v48 = vpop.f32.mrb[7].mxu0 }
 0x680   :  { %v4756_v54 = vpop.f32.mrb[7].mxu1 }
 0x682   :  { %v3749_v49 = vpop.f32.mrb[8].mxu0 }
 0x683   :  { %v3754_v51 = vpop.f32.mrb[8].mxu1  ;;  %v1961_v53 = vpop.f32.mrb[9].mxu0 }
 0x684   :  { %2210 = vperm.xlu1 %3874, %v3754_v51   ;;  %2150 = vperm.xlu0 %3872, %v3754_v51   ;;  %v2036_v12 = vpop.f32.mrb[9].mxu1 }
 0x688   :  { %3875 = vset.pattern.permute.xlu1 %v4081_v9  ;;  %3873 = vset.pattern.permute.xlu0 %v4080_v8 }
 0x689   :  { %2142 = vperm.xlu1 %3875, %v3749_v49   ;;  %2070 = vperm.xlu0 %3873, %v3754_v51  }
 0x68d   :  { %2060 = vperm.xlu0 %3873, %v3749_v49   ;;  %2146 = vperm.xlu1 %3875, %v2036_v12  }
 0x691   :  { %3880 = vset.pattern.permute.xlu0 %v4081_v9  ;;  %3876 = vset.pattern.permute.xlu1 %v4082_v18 }
 0x692   :  { %2138 = vperm.xlu0 %3880, %v1961_v53   ;;  %2202 = vperm.xlu1 %3876, %v3749_v49  }
 0x696   :  { %3883 = vset.pattern.permute.xlu0 %v4083_v19  ;;  %3877 = vset.pattern.permute.xlu1 %v4080_v8 }
 0x697   :  { %2270 = vperm.xlu0 %3883, %v3754_v51   ;;  %2065 = vperm.xlu1 %3877, %v2036_v12  }
 0x69b   :  { %3885 = vset.pattern.permute.xlu0 %v4082_v18  ;;  %3878 = vset.pattern.permute.xlu1 %v4082_v18 }
 0x69c   :  { %2198 = vperm.xlu0 %3885, %v1961_v53   ;;  %2206 = vperm.xlu1 %3878, %v2036_v12  }
 0x6a0   :  { %3886 = vset.pattern.permute.xlu0 %v4083_v19  ;;  %3879 = vset.pattern.permute.xlu1 %v4083_v19 }
 0x6a1   :  { %2258 = vperm.xlu0 %3886, %v1961_v53   ;;  %2262 = vperm.xlu1 %3879, %v3749_v49  }
 0x6a5   :  { %3887 = vset.pattern.permute.xlu0 %v4080_v8  ;;  %3881 = vset.pattern.permute.xlu1 %v4080_v8 }
 0x6a6   :  { %2110 = vperm.xlu0 %3887, %v3636_v55   ;;  %2055 = vperm.xlu1 %3881, %v1961_v53  }
 0x6aa   :  { %2418 = vperm.xlu0 %3887, %v4729_v44   ;;  %3882 = vset.pattern.permute.xlu1 %v4083_v19 }
 0x6ab   :  { %2266 = vperm.xlu1 %3882, %v2036_v12  }
 0x6ae   :  { %3889 = vset.pattern.permute.xlu0 %v4082_v18 }
 0x6af   :  { %2452 = vperm.xlu0 %3889, %v4723_v10   ;;  %3884 = vset.pattern.permute.xlu1 %v4080_v8 }
 0x6b0   :  { %2105 = vperm.xlu1 %3884, %v3635_v58  }
 0x6b3   :  { %3892 = vset.pattern.permute.xlu0 %v4083_v19 }
 0x6b4   :  { %2476 = vperm.xlu0 %3892, %v4729_v44   ;;  %2413 = vperm.xlu1 %3884, %v4723_v10  }
 0x6b8   :  { %3888 = vset.pattern.permute.xlu1 %v4081_v9  ;;  %3893 = vset.pattern.permute.xlu0 %v4080_v8 }
 0x6b9   :  { %2432 = vperm.xlu1 %3888, %v4723_v10  }
 0x6bd   :  { %2436 = vperm.xlu1 %3888, %v4729_v44  }
 0x6c1   :  { %3890 = vset.pattern.permute.xlu1 %v4082_v18 }
 0x6c2   :  { %2456 = vperm.xlu1 %3890, %v4729_v44  }
 0x6c6   :  { %3891 = vset.pattern.permute.xlu1 %v4083_v19 }
 0x6c7   :  { %2472 = vperm.xlu1 %3891, %v4723_v10  }
 0x6cb   :  { %3894 = vset.pattern.permute.xlu1 %v4081_v9 }
 0x703   :  { %v2151_v13 = vpop.permute.xlu0 %2150  ;;  %v2211_v27 = vpop.permute.xlu1 %2210 }
 0x704   :  { %v2156_v14 = vadd.f32 %v4752_v43, %v2151_v13  ;;  %v2216_v21 = vadd.f32 %v4752_v43, %v2211_v27 }
 0x706   :  { %v2160_v32 = vadd.f32 %v2156_v14, %v4795_v4  ;;  %v2220_v42 = vadd.f32 %v2216_v21, %v4795_v4 }
 0x708   :  { %v2071_v28 = vpop.permute.xlu0 %2070  ;;  %v2143_v29 = vpop.permute.xlu1 %2142  ;;  %v2168_v20 = vmul.f32 0.2, %v2160_v32  ;;  %vm2164_vm1 = vcmp.gt.f32.partialorder %v2160_v32, 0.0  ;;  %v2228_v38 = vmul.f32 0.2, %v2220_v42  ;;  %vm2224_vm11 = vcmp.gt.f32.partialorder %v2220_v42, 0.0 }
 0x709   :  { %v2076_v34 = vadd.f32 %v4752_v43, %v2071_v28  ;;  %v2154_v61 = vadd.f32 %v4750_v56, %v2143_v29 }
 0x70a   :  { %v2172_v10 = vsel %vm2164_vm1, %v2160_v32, %v2168_v20  ;;  %v2232_v50 = vsel %vm2224_vm11, %v2220_v42, %v2228_v38 }
 0x70b   :  { %v2090_v59 = vadd.f32 %v4795_v4, %v2076_v34  ;;  %v2158_v26 = vadd.f32 %v2154_v61, %v4795_v4 }
 0x70c   :  { %v2061_v23 = vpop.permute.xlu0 %2060  ;;  %v2147_v5 = vpop.permute.xlu1 %2146 }
 0x70d   :  { %v2074_v36 = vadd.f32 %v4750_v56, %v2061_v23  ;;  %v2155_v57 = vadd.f32 %v2147_v5, %v4756_v54  ;;  %vm2094_vm12 = vcmp.gt.f32.partialorder %v2090_v59, 0.0  ;;  %v2098_v46 = vmul.f32 0.2, %v2090_v59 }
 0x70e   :  { %v2166_v51 = vmul.f32 0.2, %v2158_v26  ;;  %vm2162_vm13 = vcmp.gt.f32.partialorder %v2158_v26, 0.0 }
 0x70f   :  { %v2088_v40 = vadd.f32 %v4795_v4, %v2074_v36  ;;  %v2159_v52 = vadd.f32 %v2155_v57, %v4793_v22  ;;  %v2102_v5 = vsel %vm2094_vm12, %v2090_v59, %v2098_v46 }
 0x710   :  { %v2170_v21 = vsel %vm2162_vm13, %v2158_v26, %v2166_v51 }
 0x711   :  { %v2139_v31 = vpop.permute.xlu0 %2138  ;;  %v2203_v25 = vpop.permute.xlu1 %2202  ;;  %vm2092_vm14 = vcmp.gt.f32.partialorder %v2088_v40, 0.0  ;;  %v2096_v55 = vmul.f32 0.2, %v2088_v40  ;;  %v2167_v58 = vmul.f32 0.2, %v2159_v52  ;;  %vm2163_vm15 = vcmp.gt.f32.partialorder %v2159_v52, 0.0 }
 0x712   :  { %v2153_v45 = vadd.f32 %v2139_v31, %v4754_v48  ;;  %v2214_v37 = vadd.f32 %v4750_v56, %v2203_v25 }
 0x713   :  { %v2100_v34 = vsel %vm2092_vm14, %v2088_v40, %v2096_v55 }
 0x714   :  { %v2157_v41 = vadd.f32 %v2153_v45, %v4793_v22  ;;  %v2218_v44 = vadd.f32 %v2214_v37, %v4795_v4 }
 0x716   :  { %v2271_v30 = vpop.permute.xlu0 %2270  ;;  %v2066_v15 = vpop.permute.xlu1 %2065  ;;  %vm2161_vm2 = vcmp.gt.f32.partialorder %v2157_v41, 0.0  ;;  %v2165_v62 = vmul.f32 0.2, %v2157_v41  ;;  %v2226_v63 = vmul.f32 0.2, %v2218_v44  ;;  %vm2222_vm3 = vcmp.gt.f32.partialorder %v2218_v44, 0.0 }
 0x717   :  { %v2276_v7 = vadd.f32 %v4752_v43, %v2271_v30  ;;  %v2075_v49 = vadd.f32 %v2066_v15, %v4756_v54  ;;  %v2171_v30 = vsel %vm2163_vm15, %v2159_v52, %v2167_v58 }
 0x718   :  { %v2230_v15 = vsel %vm2222_vm3, %v2218_v44, %v2226_v63 }
 0x719   :  { %v2280_v53 = vadd.f32 %v2276_v7, %v4795_v4  ;;  %v2089_v28 = vadd.f32 %v4793_v22, %v2075_v49 }
 0x71b   :  { %v2199_v47 = vpop.permute.xlu0 %2198  ;;  %v2207_v39 = vpop.permute.xlu1 %2206  ;;  %v2288_v14 = vmul.f32 0.2, %v2280_v53  ;;  %vm2284_vm4 = vcmp.gt.f32.partialorder %v2280_v53, 0.0  ;;  %vm2093_vm6 = vcmp.gt.f32.partialorder %v2089_v28, 0.0  ;;  %v2097_v57 = vmul.f32 0.2, %v2089_v28 }
 0x71c   :  { %v2213_v43 = vadd.f32 %v2199_v47, %v4754_v48  ;;  %v2215_v12 = vadd.f32 %v2207_v39, %v4756_v54 }
 0x71d   :  { %v2292_v45 = vsel %vm2284_vm4, %v2280_v53, %v2288_v14  ;;  %v2101_v49 = vsel %vm2093_vm6, %v2089_v28, %v2097_v57 }
 0x71e   :  { %v2217_v31 = vadd.f32 %v2213_v43, %v4793_v22  ;;  %v2219_v25 = vadd.f32 %v2215_v12, %v4793_v22 }
 0x720   :  { %v2259_v13 = vpop.permute.xlu0 %2258  ;;  %v2263_v27 = vpop.permute.xlu1 %2262  ;;  %vm2221_vm8 = vcmp.gt.f32.partialorder %v2217_v31, 0.0  ;;  %v2225_v37 = vmul.f32 0.2, %v2217_v31  ;;  %v2227_v38 = vmul.f32 0.2, %v2219_v25  ;;  %vm2223_vm10 = vcmp.gt.f32.partialorder %v2219_v25, 0.0 }
 0x721   :  { %v2273_v29 = vadd.f32 %v2259_v13, %v4754_v48  ;;  %v2274_v23 = vadd.f32 %v4750_v56, %v2263_v27  ;;  %v2169_v56 = vsel %vm2161_vm2, %v2157_v41, %v2165_v62 }
 0x722   :  { %v2229_v51 = vsel %vm2221_vm8, %v2217_v31, %v2225_v37  ;;  %v2231_v12 = vsel %vm2223_vm10, %v2219_v25, %v2227_v38 }
 0x723   :  { %v2277_v32 = vadd.f32 %v2273_v29, %v4793_v22  ;;  %v2278_v42 = vadd.f32 %v2274_v23, %v4795_v4 }
 0x725   :  { %v2111_v61 = vpop.permute.xlu0 %2110  ;;  %v2056_v36 = vpop.permute.xlu1 %2055  ;;  %vm2282_vm7 = vcmp.gt.f32.partialorder %v2278_v42, 0.0  ;;  %v2286_v20 = vmul.f32 0.2, %v2278_v42  ;;  %v2285_v59 = vmul.f32 0.2, %v2277_v32  ;;  %vm2281_vm1 = vcmp.gt.f32.partialorder %v2277_v32, 0.0 }
 0x726   :  { %v2114_v4 = vmul.f32 %v2111_v61, %v2100_v34  ;;  %v2116_v7 = vmul.f32 %v2111_v61, %v2102_v5  ;;  %v2174_v47 = vmul.f32 %v2170_v21, %v2111_v61  ;;  %v2176_v39 = vmul.f32 %v2172_v10, %v2111_v61 }
 0x727   :  { %v2290_v26 = vsel %vm2282_vm7, %v2278_v42, %v2286_v20  ;;  %v2234_v40 = vmul.f32 %v2230_v15, %v2111_v61  ;;  %v2236_v52 = vmul.f32 %v2232_v50, %v2111_v61  ;;  %v2296_v44 = vmul.f32 %v2292_v45, %v2111_v61 }
 0x728   :  { %v2294_v41 = vmul.f32 %v2290_v26, %v2111_v61  ;;  %v2073_v53 = vadd.f32 %v2056_v36, %v4754_v48  ;;  %v2289_v55 = vsel %vm2281_vm1, %v2277_v32, %v2285_v59  ;;  %v2118_v58 = vsel %vm111_vm9, %v2114_v4, 0.0 }
 0x729   :  { %v2127_v13 = vsel %vm111_vm9, %v2116_v7, 0.0  ;;  %v2178_v10 = vsel %vm111_vm9, %v2174_v47, 0.0  ;;  %v2187_v50 = vsel %vm111_vm9, %v2176_v39, 0.0  ;;  %v2238_v63 = vsel %vm111_vm9, %v2234_v40, 0.0 }
 0x72a   :  { %v2267_v46 = vpop.permute.xlu1 %2266  ;;  %v2087_v27 = vadd.f32 %v4793_v22, %v2073_v53  ;;  %v2247_v48 = vsel %vm111_vm9, %v2236_v52, 0.0  ;;  %v2307_v28 = vsel %vm111_vm9, %v2296_v44, 0.0 }
 0x72b   :  { %v2275_v43 = vadd.f32 %v2267_v46, %v4756_v54  ;;  %v2298_v54 = vsel %vm111_vm9, %v2294_v41, 0.0 }
 0x72c   :  { %vm2091_vm11 = vcmp.gt.f32.partialorder %v2087_v27, 0.0  ;;  %v2095_v29 = vmul.f32 0.2, %v2087_v27 }
 0x72d   :  { %v2279_v62 = vadd.f32 %v2275_v43, %v4793_v22 }
 0x72e   :  { %v2099_v32 = vsel %vm2091_vm11, %v2087_v27, %v2095_v29 }
 0x72f   :  { %vm2283_vm12 = vcmp.gt.f32.partialorder %v2279_v62, 0.0  ;;  %v2287_v23 = vmul.f32 0.2, %v2279_v62  ;;  %v2106_v5 = vpop.permute.xlu1 %2105 }
 0x730   :  { %v2115_v14 = vmul.f32 %v2106_v5, %v2101_v49  ;;  %v2173_v31 = vmul.f32 %v2169_v56, %v2106_v5  ;;  %v2175_v25 = vmul.f32 %v2171_v30, %v2106_v5  ;;  %v2233_v21 = vmul.f32 %v2229_v51, %v2106_v5 }
 0x731   :  { %v2291_v42 = vsel %vm2283_vm12, %v2279_v62, %v2287_v23  ;;  %v2235_v22 = vmul.f32 %v2231_v12, %v2106_v5  ;;  %v2293_v34 = vmul.f32 %v2289_v55, %v2106_v5  ;;  %v2113_v15 = vmul.f32 %v2106_v5, %v2099_v32 }
 0x732   :  { %v2126_v61 = vsel %vm111_vm9, %v2115_v14, 0.0  ;;  %v2177_v36 = vsel %vm111_vm9, %v2173_v31, 0.0  ;;  %v2186_v57 = vsel %vm111_vm9, %v2175_v25, 0.0  ;;  %v2237_v38 = vsel %vm111_vm9, %v2233_v21, 0.0 }
 0x733   :  { %v2128_v20 = vadd.f32 %v2127_v13, %v2126_v61  ;;  %v2179_v45 = vadd.f32 %v2178_v10, %v2177_v36  ;;  %v2188_v37 = vadd.f32 %v2187_v50, %v2186_v57  ;;  %v2117_v56 = vsel %vm111_vm9, %v2113_v15, 0.0  ;;  %v3637_v61 = vld [vmem:[%s5332_s5 + $0x4] sm:$0xf] }
 0x734   :  { %v2239_v30 = vadd.f32 %v2238_v63, %v2237_v38  ;;  %v2246_v59 = vsel %vm111_vm9, %v2235_v22, 0.0  ;;  %v2295_v26 = vmul.f32 %v2291_v42, %v2106_v5  ;;  %v2297_v52 = vsel %vm111_vm9, %v2293_v34, 0.0 }
 0x735   :  { %v2129_v4 = vrot.slane %v2128_v20, 4  ;;  %v2180_v7 = vrot.slane %v2179_v45, 4  ;;  %v2189_v47 = vrot.slane %v2188_v37, 4  ;;  %v2248_v39 = vadd.f32 %v2247_v48, %v2246_v59 }
 0x736   :  { %v2240_v40 = vrot.slane %v2239_v30, 4  ;;  %v2306_v41 = vsel %vm111_vm9, %v2295_v26, 0.0  ;;  %v2119_v44 = vadd.f32 %v2118_v58, %v2117_v56  ;;  %v2299_v12 = vadd.f32 %v2298_v54, %v2297_v52 }
 0x737   :  { %v2130_v46 = vadd.f32 %v2129_v4, %v2128_v20  ;;  %v2181_v49 = vadd.f32 %v2180_v7, %v2179_v45  ;;  %v2190_v51 = vadd.f32 %v2189_v47, %v2188_v37  ;;  %v2249_v53 = vrot.slane %v2248_v39, 4 }
 0x738   :  { %v2241_v43 = vadd.f32 %v2240_v40, %v2239_v30  ;;  %v2308_v55 = vadd.f32 %v2307_v28, %v2306_v41  ;;  %v2120_v13 = vrot.slane %v2119_v44, 4  ;;  %v2300_v48 = vrot.slane %v2299_v12, 4 }
 0x739   :  { %v2131_v10 = vrot.slane %v2130_v46, 2  ;;  %v2182_v50 = vrot.slane %v2181_v49, 2  ;;  %v2191_v27 = vrot.slane %v2190_v51, 2  ;;  %v2250_v62 = vadd.f32 %v2249_v53, %v2248_v39 }
 0x73a   :  { %v2242_v63 = vrot.slane %v2241_v43, 2  ;;  %v2309_v29 = vrot.slane %v2308_v55, 4  ;;  %v2121_v23 = vadd.f32 %v2120_v13, %v2119_v44  ;;  %v2301_v25 = vadd.f32 %v2300_v48, %v2299_v12 }
 0x73b   :  { %v2183_v5 = vadd.f32 %v2182_v50, %v2181_v49  ;;  %v2192_v14 = vadd.f32 %v2191_v27, %v2190_v51  ;;  %v2251_v31 = vrot.slane %v2250_v62, 2  ;;  %v2132_v58 = vadd.f32 %v2131_v10, %v2130_v46 }
 0x73c   :  { %v2310_v21 = vadd.f32 %v2309_v29, %v2308_v55  ;;  %v2122_v32 = vrot.slane %v2121_v23, 2  ;;  %v2243_v42 = vadd.f32 %v2242_v63, %v2241_v43  ;;  %v2302_v15 = vrot.slane %v2301_v25, 2 }
 0x73d   :  { %v2184_v22 = vrot.slane %v2183_v5, 1  ;;  %v2133_v54 = vrot.slane %v2132_v58, 1  ;;  %v2193_v28 = vrot.slane %v2192_v14, 1  ;;  %v2252_v34 = vadd.f32 %v2251_v31, %v2250_v62 }
 0x73e   :  { %v2311_v36 = vrot.slane %v2310_v21, 2  ;;  %v2123_v57 = vadd.f32 %v2122_v32, %v2121_v23  ;;  %v2244_v20 = vrot.slane %v2243_v42, 1  ;;  %v2303_v30 = vadd.f32 %v2302_v15, %v2301_v25 }
 0x73f   :  { %v2185_v45 = vadd.f32 %v2184_v22, %v2183_v5  ;;  %v2134_v37 = vadd.f32 %v2133_v54, %v2132_v58  ;;  %v2194_v38 = vadd.f32 %v2193_v28, %v2192_v14  ;;  %v2253_v56 = vrot.slane %v2252_v34, 1  ;;  %v2414_v58 = vpop.permute.xlu1 %2413 }
 0x740   :  { %v2312_v59 = vadd.f32 %v2311_v36, %v2310_v21  ;;  %v2124_v26 = vrot.slane %v2123_v57, 1  ;;  %v2245_v4 = vadd.f32 %v2244_v20, %v2243_v42  ;;  %v2304_v44 = vrot.slane %v2303_v30, 1 }
 0x741   :  { %v2196_v7 = vadd.f32 %v3637_v61, %v2194_v38  ;;  %v2254_v47 = vadd.f32 %v2253_v56, %v2252_v34  ;;  %v2195_v39 = vadd.f32 %v3637_v61, %v2185_v45  ;;  %v2136_v46 = vadd.f32 %v3637_v61, %v2134_v37 }
 0x742   :  { %v2313_v40 = vrot.slane %v2312_v59, 1  ;;  %v2125_v52 = vadd.f32 %v2124_v26, %v2123_v57  ;;  %v2255_v41 = vadd.f32 %v3637_v61, %v2245_v4  ;;  %v2305_v55 = vadd.f32 %v2304_v44, %v2303_v30 }
 0x743   :  { %v2256_v49 = vadd.f32 %v3637_v61, %v2254_v47  ;;  %v2320_v51 = vrot.slane %v2196_v7, 1  ;;  %v2319_v53 = vrot.slane %v2195_v39, 1 }
 0x744   :  { %v2314_v43 = vadd.f32 %v2313_v40, %v2312_v59  ;;  %v2135_v12 = vadd.f32 %v3637_v61, %v2125_v52  ;;  %v2315_v27 = vadd.f32 %v3637_v61, %v2305_v55  ;;  %v2327_v63 = vrot.slane %v2255_v41, 2  ;;  %v2433_v59 = vpop.permute.xlu1 %2432 }
 0x745   :  { %v2324_v13 = vmax.f32 %v2136_v46, %v2320_v51  ;;  %v2328_v10 = vrot.slane %v2256_v49, 2 }
 0x746   :  { %v2316_v50 = vadd.f32 %v3637_v61, %v2314_v43  ;;  %v2323_v62 = vmax.f32 %v2135_v12, %v2319_v53  ;;  %v2335_v5 = vrot.slane %v2315_v27, 3 }
 0x747   :  { %v2332_v48 = vmax.f32 %v2324_v13, %v2328_v10 }
 0x748   :  { %v2336_v29 = vrot.slane %v2316_v50, 3  ;;  %v2331_v23 = vmax.f32 %v2323_v62, %v2327_v63  ;;  %v2437_v52 = vpop.permute.xlu1 %2436 }
 0x74a   :  { %v2340_v14 = vmax.f32 %v2332_v48, %v2336_v29  ;;  %v2339_v31 = vmax.f32 %v2331_v23, %v2335_v5 }
 0x74c   :  { %v2370_v25 = vrot.slane %v2340_v14, 5  ;;  %v2341_v21 = vsub.f32 %v2135_v12, %v2339_v31  ;;  %v2349_v32 = vrot.slane %v2339_v31, 7  ;;  %v2342_v42 = vsub.f32 %v2136_v46, %v2340_v14  ;;  %v2457_v43 = vpop.permute.xlu1 %2456 }
 0x74d   :  { %v2350_v22 = vrot.slane %v2340_v14, 7  ;;  %v2360_v54 = vrot.slane %v2340_v14, 6  ;;  %v2359_v28 = vrot.slane %v2339_v31, 6  ;;  %v2369_v34 = vrot.slane %v2339_v31, 5 }
 0x74e   :  { %v2374_v15 = vsub.f32 %v2316_v50, %v2370_v25  ;;  %v2343_v36 = vmul.f32 1.442695, %v2341_v21  ;;  %v2353_v61 = vsub.f32 %v2195_v39, %v2349_v32  ;;  %v2345_v57 = vmul.f32 1.442695, %v2342_v42  ;;  %v2419_v39 = vpop.permute.xlu0 %2418 }
 0x74f   :  { %v2354_v20 = vsub.f32 %v2196_v7, %v2350_v22  ;;  %v2364_v45 = vsub.f32 %v2256_v49, %v2360_v54  ;;  %v2363_v37 = vsub.f32 %v2255_v41, %v2359_v28  ;;  %v2373_v38 = vsub.f32 %v2315_v27, %v2369_v34 }
 0x750   :  { %v2377_v56 = vmul.f32 1.442695, %v2374_v15  ;;  %3982 = vpow2.f32 %v2343_v36  ;;  %v2355_v30 = vmul.f32 1.442695, %v2353_v61 }
 0x751   :  { %3984 = vpow2.f32 %v2345_v57  ;;  %v2357_v26 = vmul.f32 1.442695, %v2354_v20  ;;  %v2367_v4 = vmul.f32 1.442695, %v2364_v45  ;;  %v2365_v47 = vmul.f32 1.442695, %v2363_v37  ;;  %v2473_v37 = vpop.permute.xlu1 %2472 }
 0x752   :  { %3986 = vpow2.f32 %v2377_v56  ;;  %v2375_v40 = vmul.f32 1.442695, %v2373_v38  ;;  %v2453_v53 = vpop.permute.xlu0 %2452 }
 0x753   :  { %3988 = vpow2.f32 %v2355_v30 }
 0x754   :  { %3990 = vpow2.f32 %v2357_v26 }
 0x755   :  { %3992 = vpow2.f32 %v2367_v4 }
 0x756   :  { %3994 = vpow2.f32 %v2365_v47  ;;  %v2477_v36 = vpop.permute.xlu0 %2476 }
 0x757   :  { %3996 = vpow2.f32 %v2375_v40 }
 0x75a   :  { %v3983_v7 = vpop.eup %3982 }
 0x75b   :  { %v3985_v41 = vpop.eup %3984  ;;  %v2406_v44 = vrot.slane %v3983_v7, %v4353_v1 }
 0x75c   :  { %v3987_v46 = vpop.eup %3986  ;;  %v2410_v49 = vrot.slane %v3985_v41, %v4353_v1 }
 0x75d   :  { %v3989_v51 = vpop.eup %3988  ;;  %v2470_v55 = vrot.slane %v3987_v46, %v4365_v17  ;;  %v2421_v13 = vmul.f32 %v2414_v58, %v2406_v44  ;;  %v2398_v29 = vrot.slane %v3987_v46, 3 }
 0x75e   :  { %v3991_v12 = vpop.eup %3990  ;;  %v2426_v10 = vrot.slane %v3989_v51, %v4356_v3  ;;  %v2381_v50 = vrot.slane %v3989_v51, 1  ;;  %v2422_v63 = vmul.f32 %v2419_v39, %v2410_v49 }
 0x75f   :  { %v3993_v27 = vpop.eup %3992  ;;  %v2382_v62 = vrot.slane %v3991_v12, 1  ;;  %v2430_v48 = vrot.slane %v3991_v12, %v4356_v3  ;;  %v2480_v38 = vmul.f32 %v2477_v36, %v2470_v55 }
 0x760   :  { %v3995_v23 = vpop.eup %3994  ;;  %v2439_v5 = vmul.f32 %v2433_v59, %v2426_v10  ;;  %v2390_v14 = vrot.slane %v3993_v27, 2  ;;  %v2450_v31 = vrot.slane %v3993_v27, %v4360_v6  ;;  %v2385_v25 = vadd.f32 %v3983_v7, %v2381_v50 }
 0x761   :  { %v3997_v21 = vpop.eup %3996  ;;  %v2440_v32 = vmul.f32 %v2437_v52, %v2430_v48  ;;  %v2386_v42 = vadd.f32 %v3985_v41, %v2382_v62  ;;  %v2389_v22 = vrot.slane %v3995_v23, 2  ;;  %v2446_v58 = vrot.slane %v3995_v23, %v4360_v6 }
 0x762   :  { %v2441_v54 = vadd.f32 %v2439_v5, %v2421_v13  ;;  %v2460_v28 = vmul.f32 %v2457_v43, %v2450_v31  ;;  %v2397_v34 = vrot.slane %v3997_v21, 3  ;;  %v2466_v15 = vrot.slane %v3997_v21, %v4365_v17 }
 0x763   :  { %v2442_v61 = vadd.f32 %v2440_v32, %v2422_v63  ;;  %v2394_v57 = vadd.f32 %v2390_v14, %v2386_v42  ;;  %v2393_v20 = vadd.f32 %v2389_v22, %v2385_v25  ;;  %v2459_v45 = vmul.f32 %v2453_v53, %v2446_v58  ;;  %v4906_v14 = vld [vmem:[%s5335_s8 + $0x1] ss:$0 sm:$0xff]  ;;  %s4109_s8 = smov 24  }
 0x764   :  { %v2479_v56 = vmul.f32 %v2473_v37, %v2466_v15  ;;  %v4931_v37 = vld [vmem:[%s5336_s9 + $0x1] ss:$0 sm:$0xff] }
 0x765   :  { %v2402_v30 = vadd.f32 %v2398_v29, %v2394_v57  ;;  %v2462_v59 = vadd.f32 %v2460_v28, %v2442_v61  ;;  %v2401_v26 = vadd.f32 %v2397_v34, %v2393_v20  ;;  %v2461_v4 = vadd.f32 %v2459_v45, %v2441_v54 }
 0x767   :  { %v2490_v47 = vrot.slane %v2402_v30, %v4353_v1  ;;  %v2482_v40 = vadd.f32 %v2480_v38, %v2462_v59  ;;  %v2486_v39 = vrot.slane %v2401_v26, %v4353_v1  ;;  %v2481_v52 = vadd.f32 %v2479_v56, %v2461_v4 }
 0x769   :  { %3998 = vrcp.f32 %v2490_v47 }
 0x76a   :  { %4000 = vrcp.f32 %v2486_v39 }
 0x773   :  { %v3999_v7 = vpop.eup %3998 }
 0x774   :  { %v4001_v41 = vpop.eup %4000  ;;  %v2494_v44 = vmul.f32 %v3999_v7, %v2482_v40 }
 0x775   :  { %v2492_v46 = vmul.f32 %v4001_v41, %v2481_v52 }
 0x776   :  { %v3639_v49 = vmul.f32 -1.442695, %v2494_v44 }
 0x777   :  { %v3638_v51 = vmul.f32 -1.442695, %v2492_v46 }
 0x778   :  { %4002 = vpow2.f32 %v3639_v49 }
 0x779   :  { %4004 = vpow2.f32 %v3638_v51 }
 0x782   :  { %v4003_v53 = vpop.eup %4002 }
 0x783   :  { %v4005_v43 = vpop.eup %4004  ;;  %v2502_v12 = vadd.f32 1.0, %v4003_v53 }
 0x784   :  { %v2501_v55 = vadd.f32 1.0, %v4005_v43 }
 0x785   :  { %4006 = vrcp.f32 %v2502_v12 }
 0x786   :  { %4008 = vrcp.f32 %v2501_v55 }
 0x78f   :  { %v4875_v13 = vpop.eup %4006 }
 0x790   :  { %v4877_v10 = vpop.eup %4008 }
 0x791   :  { %3757 = vmatprep.mubr.msk.f32.mxu0 %vm111_vm9, %v4877_v10  ;;  %3762 = vmatprep.mubr.msk.f32.mxu1 %vm111_vm9, %v4877_v10 }
 0x792   :  { %3758 = vmatmul.mubr.msk.f32.vlgmr.msra.gmra.mrb[10].mxu0 %vm111_vm9, %v4875_v13  ;;  %3763 = vmatmul.mubr.msk.f32.vlgmr.msra.gmra.mrb[10].mxu1 %vm111_vm9, %v4875_v13 }
 0x865   :  { %v4887_v50 = vpop.f32.mrb[10].mxu0  ;;  %v4889_v27 = vpop.f32.mrb[10].mxu1 }
 0x866   :  { %v4891_v62 = vpop.f32.mrb[11].mxu0  ;;  %v4893_v63 = vpop.f32.mrb[11].mxu1  ;;  %v2726_v48 = vrot.slane %v4889_v27, %v4356_v3  ;;  %v2754_v29 = vrot.slane %v4889_v27, %v4360_v6  ;;  %v2782_v23 = vrot.slane %v4889_v27, %v4365_v17  ;;  %v2810_v5 = vrot.slane %v4889_v27, %v4387_v11 }
 0x867   :  { %v2722_v31 = vrot.slane %v4893_v63, %v4356_v3  ;;  %v2750_v25 = vrot.slane %v4893_v63, %v4360_v6  ;;  %v2778_v21 = vrot.slane %v4893_v63, %v4365_v17  ;;  %v2806_v32 = vrot.slane %v4893_v63, %v4387_v11 }
 0x868   :  { %v2728_v42 = vadd.f32 %v4887_v50, %v2726_v48  ;;  %v2756_v22 = vadd.f32 %v4887_v50, %v2754_v29  ;;  %v2784_v58 = vadd.f32 %v4887_v50, %v2782_v23  ;;  %v2812_v54 = vadd.f32 %v4887_v50, %v2810_v5 }
 0x869   :  { %v2727_v28 = vadd.f32 %v2722_v31, %v4891_v62  ;;  %v2755_v34 = vadd.f32 %v2750_v25, %v4891_v62  ;;  %v2783_v15 = vadd.f32 %v2778_v21, %v4891_v62  ;;  %v2811_v36 = vadd.f32 %v2806_v32, %v4891_v62 }
 0x86a   :  { %v2730_v61 = vadd.f32 %v4906_v14, %v2728_v42  ;;  %v2758_v57 = vadd.f32 %v4906_v14, %v2756_v22  ;;  %v2786_v20 = vadd.f32 %v4906_v14, %v2784_v58  ;;  %v2814_v45 = vadd.f32 %v4906_v14, %v2812_v54 }
 0x86b   :  { %v2729_v38 = vadd.f32 %v4906_v14, %v2727_v28  ;;  %v2757_v56 = vadd.f32 %v4906_v14, %v2755_v34  ;;  %v2785_v30 = vadd.f32 %v4906_v14, %v2783_v15  ;;  %v2813_v59 = vadd.f32 %v4906_v14, %v2811_v36 }
 0x86c   :  { %vm2732_vm13 = vcmp.gt.f32.partialorder %v2730_v61, 0.0  ;;  %v2734_v26 = vmul.f32 0.2, %v2730_v61  ;;  %vm2760_vm14 = vcmp.gt.f32.partialorder %v2758_v57, 0.0  ;;  %v2762_v4 = vmul.f32 0.2, %v2758_v57 }
 0x86d   :  { %vm2731_vm15 = vcmp.gt.f32.partialorder %v2729_v38, 0.0  ;;  %v2733_v47 = vmul.f32 0.2, %v2729_v38  ;;  %vm2759_vm2 = vcmp.gt.f32.partialorder %v2757_v56, 0.0  ;;  %v2761_v40 = vmul.f32 0.2, %v2757_v56 }
 0x86e   :  { %v2736_v39 = vsel %vm2732_vm13, %v2730_v61, %v2734_v26  ;;  %v2764_v52 = vsel %vm2760_vm14, %v2758_v57, %v2762_v4  ;;  %vm2788_vm3 = vcmp.gt.f32.partialorder %v2786_v20, 0.0  ;;  %v2790_v7 = vmul.f32 0.2, %v2786_v20 }
 0x86f   :  { %v2738_v41 = vmul.f32 %v4931_v37, %v2736_v39  ;;  %v2735_v44 = vsel %vm2731_vm15, %v2729_v38, %v2733_v47  ;;  %v2766_v46 = vmul.f32 %v4931_v37, %v2764_v52  ;;  %v2763_v49 = vsel %vm2759_vm2, %v2757_v56, %v2761_v40 }
 0x870   :  { %v2737_v51 = vmul.f32 %v4931_v37, %v2735_v44  ;;  %v2792_v53 = vsel %vm2788_vm3, %v2786_v20, %v2790_v7  ;;  %vm2787_vm4 = vcmp.gt.f32.partialorder %v2785_v30, 0.0  ;;  %v2765_v12 = vmul.f32 %v4931_v37, %v2763_v49 }
 0x871   :  { %v2742_v43 = vsel %vm120_vm5, %v2738_v41, 0.0  ;;  %v2789_v55 = vmul.f32 0.2, %v2785_v30  ;;  %v2794_v29 = vmul.f32 %v4931_v37, %v2792_v53  ;;  %vm2816_vm6 = vcmp.gt.f32.partialorder %v2814_v45, 0.0 }
 0x872   :  { %2743 = vadd.xlane.f32.xlu1 %v2742_v43  ;;  %v2739_v48 = vsel %vm120_vm5, %v2737_v51, 0.0  ;;  %v2818_v23 = vmul.f32 0.2, %v2814_v45  ;;  %v2770_v5 = vsel %vm120_vm5, %v2766_v46, 0.0  ;;  %vm2815_vm7 = vcmp.gt.f32.partialorder %v2813_v59, 0.0 }
 0x873   :  { %2740 = vadd.xlane.f32.xlu0 %v2739_v48  ;;  %v2791_v31 = vsel %vm2787_vm4, %v2785_v30, %v2789_v55  ;;  %v2817_v25 = vmul.f32 0.2, %v2813_v59  ;;  %v2838_v42 = vrot.slane %v4889_v27, %v4394_v16  ;;  %v2834_v22 = vrot.slane %v4893_v63, %v4394_v16 }
 0x874   :  { %v2793_v21 = vmul.f32 %v4931_v37, %v2791_v31  ;;  %v2820_v32 = vsel %vm2816_vm6, %v2814_v45, %v2818_v23  ;;  %v2767_v58 = vsel %vm120_vm5, %v2765_v12, 0.0  ;;  %v2866_v28 = vrot.slane %v4889_v27, %v4446_v60 }
 0x875   :  { %v2819_v54 = vsel %vm2815_vm7, %v2813_v59, %v2817_v25  ;;  %v2862_v34 = vrot.slane %v4893_v63, %v4446_v60  ;;  %v2798_v15 = vsel %vm120_vm5, %v2794_v29, 0.0  ;;  %v2822_v36 = vmul.f32 %v4931_v37, %v2820_v32 }
 0x876   :  { %2771 = vadd.xlane.f32.xlu1 %v2770_v5  ;;  %v2840_v61 = vadd.f32 %v4887_v50, %v2838_v42  ;;  %v2839_v57 = vadd.f32 %v2834_v22, %v4891_v62  ;;  %v2795_v20 = vsel %vm120_vm5, %v2793_v21, 0.0  ;;  %v2868_v45 = vadd.f32 %v4887_v50, %v2866_v28 }
 0x877   :  { %2768 = vadd.xlane.f32.xlu0 %v2767_v58  ;;  %v2867_v38 = vadd.f32 %v2862_v34, %v4891_v62  ;;  %v2894_v56 = vrot.slane %v4889_v27, %v4451_v2  ;;  %v2821_v30 = vmul.f32 %v4931_v37, %v2819_v54  ;;  %v2890_v4 = vrot.slane %v4893_v63, %v4451_v2 }
 0x878   :  { %v2842_v59 = vadd.f32 %v4906_v14, %v2840_v61  ;;  %v2841_v26 = vadd.f32 %v4906_v14, %v2839_v57  ;;  %v2870_v47 = vadd.f32 %v4906_v14, %v2868_v45  ;;  %v2686_v52 = vrot.slane %v4889_v27, %v4353_v1 }
 0x879   :  { %v2869_v40 = vadd.f32 %v4906_v14, %v2867_v38  ;;  %v2896_v39 = vadd.f32 %v4887_v50, %v2894_v56  ;;  %v2895_v43 = vadd.f32 %v2890_v4, %v4891_v62  ;;  %v2826_v12 = vsel %vm120_vm5, %v2822_v36, 0.0 }
 0x87a   :  { %2799 = vadd.xlane.f32.xlu1 %v2798_v15  ;;  %vm2844_vm8 = vcmp.gt.f32.partialorder %v2842_v59, 0.0  ;;  %v2846_v7 = vmul.f32 0.2, %v2842_v59  ;;  %vm2843_vm10 = vcmp.gt.f32.partialorder %v2841_v26, 0.0  ;;  %v2845_v41 = vmul.f32 0.2, %v2841_v26 }
 0x87b   :  { %2796 = vadd.xlane.f32.xlu0 %v2795_v20  ;;  %vm2872_vm1 = vcmp.gt.f32.partialorder %v2870_v47, 0.0  ;;  %v2874_v44 = vmul.f32 0.2, %v2870_v47  ;;  %vm2871_vm11 = vcmp.gt.f32.partialorder %v2869_v40, 0.0  ;;  %v2873_v46 = vmul.f32 0.2, %v2869_v40 }
 0x87c   :  { %v2848_v49 = vsel %vm2844_vm8, %v2842_v59, %v2846_v7  ;;  %v2847_v51 = vsel %vm2843_vm10, %v2841_v26, %v2845_v41  ;;  %v2898_v53 = vadd.f32 %v4906_v14, %v2896_v39  ;;  %v2823_v29 = vsel %vm120_vm5, %v2821_v30, 0.0 }
 0x87d   :  { %v2850_v27 = vmul.f32 %v4931_v37, %v2848_v49  ;;  %v2876_v55 = vsel %vm2872_vm1, %v2870_v47, %v2874_v44  ;;  %v2875_v48 = vsel %vm2871_vm11, %v2869_v40, %v2873_v46  ;;  %v2849_v23 = vmul.f32 %v4931_v37, %v2847_v51  ;;  %v3650_v40 = vld [vmem:[%s5337_s10 + $0x8] sm:$0xff]  ;;  %s5353_s10 = smov 3  }
 0x87e   :  { %2827 = vadd.xlane.f32.xlu1 %v2826_v12  ;;  %v2902_v5 = vmul.f32 0.2, %v2898_v53  ;;  %vm2900_vm12 = vcmp.gt.f32.partialorder %v2898_v53, 0.0  ;;  %v2897_v31 = vadd.f32 %v4906_v14, %v2895_v43  ;;  %v2688_v25 = vadd.f32 %v4887_v50, %v2686_v52 }
 0x87f   :  { %2824 = vadd.xlane.f32.xlu0 %v2823_v29  ;;  %v2878_v21 = vmul.f32 %v4931_v37, %v2876_v55  ;;  %v2877_v32 = vmul.f32 %v4931_v37, %v2875_v48  ;;  %v2682_v42 = vrot.slane %v4893_v63, %v4353_v1  ;;  %v2854_v22 = vsel %vm120_vm5, %v2850_v27, 0.0 }
 0x880   :  { %vm2899_vm13 = vcmp.gt.f32.partialorder %v2897_v31, 0.0  ;;  %v2901_v58 = vmul.f32 0.2, %v2897_v31  ;;  %v2696_v54 = vadd.f32 %v4906_v14, %v2688_v25  ;;  %v2851_v28 = vsel %vm120_vm5, %v2849_v23, 0.0 }
 0x881   :  { %v2904_v34 = vsel %vm2900_vm12, %v2898_v53, %v2902_v5  ;;  %v2687_v15 = vadd.f32 %v2682_v42, %v4891_v62  ;;  %v2882_v63 = vsel %vm120_vm5, %v2878_v21, 0.0  ;;  %v2879_v57 = vsel %vm120_vm5, %v2877_v32, 0.0 }
 0x882   :  { %2855 = vadd.xlane.f32.xlu1 %v2854_v22  ;;  %v2903_v50 = vsel %vm2899_vm13, %v2897_v31, %v2901_v58  ;;  %vm2698_vm14 = vcmp.gt.f32.partialorder %v2696_v54, 0.0  ;;  %v2700_v36 = vmul.f32 0.2, %v2696_v54  ;;  %v2906_v20 = vmul.f32 %v4931_v37, %v2904_v34 }
 0x883   :  { %2852 = vadd.xlane.f32.xlu0 %v2851_v28  ;;  %v2695_v61 = vadd.f32 %v4906_v14, %v2687_v15  ;;  %v2905_v45 = vmul.f32 %v4931_v37, %v2903_v50  ;;  %vm4107_vm2 = vmmov 0   ;;  %vm117_vm3 = vcmask 97280  }
 0x884   :  { %v2702_v38 = vsel %vm2698_vm14, %v2696_v54, %v2700_v36  ;;  %v2910_v30 = vsel %vm120_vm5, %v2906_v20, 0.0  ;;  %vm123_vm4 = vcmask 162816   ;;  %vm126_vm6 = vcmask 195584  }
 0x885   :  { %vm2697_vm15 = vcmp.gt.f32.partialorder %v2695_v61, 0.0  ;;  %v2699_v56 = vmul.f32 0.2, %v2695_v61  ;;  %v2710_v59 = vmul.f32 %v4931_v37, %v2702_v38  ;;  %v2907_v14 = vsel %vm120_vm5, %v2905_v45, 0.0 }
 0x886   :  { %2883 = vadd.xlane.f32.xlu1 %v2882_v63  ;;  %vm129_vm7 = vcmask 228352   ;;  %vm3419_vm8 = vcmask 1041409   ;;  %vm3421_vm10 = vcmask 261120  }
 0x887   :  { %2880 = vadd.xlane.f32.xlu0 %v2879_v57  ;;  %v2701_v62 = vsel %vm2697_vm15, %v2695_v61, %v2699_v56  ;;  %v2714_v4 = vsel %vm120_vm5, %v2710_v59, 0.0 }
 0x888   :  { %v2709_v26 = vmul.f32 %v4931_v37, %v2701_v62 }
 0x88a   :  { %2911 = vadd.xlane.f32.xlu1 %v2910_v30  ;;  %v2711_v47 = vsel %vm120_vm5, %v2709_v26, 0.0 }
 0x88b   :  { %2908 = vadd.xlane.f32.xlu0 %v2907_v14 }
 0x88e   :  { %2715 = vadd.xlane.f32.xlu1 %v2714_v4 }
 0x88f   :  { %2712 = vadd.xlane.f32.xlu0 %v2711_v47 }
 0x8ff   :  { %v2744_v39 = vpop.xlane.xlu1 %2743 }
 0x900   :  { %v5004_v52 = vadd.f32 %v3650_v40, %v2744_v39  ;;  %v2741_v7 = vpop.xlane.xlu0 %2740 }
 0x901   :  { %v5028_v29 = vadd.f32 %v3650_v40, %v2741_v7 }
 0x902   :  { %2919 = vrot.lane.b32.xlu1 %v5004_v52, %s4084_s20 }
 0x903   :  { %v2772_v41 = vpop.xlane.xlu1 %2771 }
 0x904   :  { %v5008_v37 = vadd.f32 %v3650_v40, %v2772_v41  ;;  %v2769_v44 = vpop.xlane.xlu0 %2768 }
 0x905   :  { %v5012_v49 = vadd.f32 %v3650_v40, %v2769_v44 }
 0x906   :  { %2929 = vrot.lane.b32.xlu1 %v5008_v37, %s4085_s21 }
 0x907   :  { %v2800_v46 = vpop.xlane.xlu1 %2799 }
 0x908   :  { %v5014_v51 = vadd.f32 %v3650_v40, %v2800_v46  ;;  %v2797_v53 = vpop.xlane.xlu0 %2796 }
 0x909   :  { %v5020_v12 = vadd.f32 %v3650_v40, %v2797_v53 }
 0x90a   :  { %2927 = vrot.lane.b32.xlu1 %v5012_v49, %s4085_s21  ;;  %2939 = vrot.lane.b32.xlu0 %v5014_v51, %s4086_s22 }
 0x90b   :  { %v2828_v43 = vpop.xlane.xlu1 %2827 }
 0x90c   :  { %v5022_v27 = vadd.f32 %v3650_v40, %v2828_v43  ;;  %v2825_v55 = vpop.xlane.xlu0 %2824 }
 0x90d   :  { %v5030_v23 = vadd.f32 %v3650_v40, %v2825_v55 }
 0x90e   :  { %2937 = vrot.lane.b32.xlu1 %v5020_v12, %s4086_s22  ;;  %2949 = vrot.lane.b32.xlu0 %v5022_v27, %s4087_s23 }
 0x90f   :  { %v2856_v48 = vpop.xlane.xlu1 %2855 }
 0x910   :  { %v2853_v5 = vpop.xlane.xlu0 %2852  ;;  %v5036_v25 = vadd.f32 %v3650_v40, %v2856_v48 }
 0x911   :  { %v5038_v21 = vadd.f32 %v3650_v40, %v2853_v5 }
 0x912   :  { %2947 = vrot.lane.b32.xlu1 %v5030_v23, %s4087_s23  ;;  %2917 = vrot.lane.b32.xlu0 %v5028_v29, %s4084_s20 }
 0x913   :  { %v2884_v31 = vpop.xlane.xlu1 %2883 }
 0x914   :  { %v2881_v32 = vpop.xlane.xlu0 %2880  ;;  %v5044_v42 = vadd.f32 %v3650_v40, %v2884_v31 }
 0x915   :  { %v5046_v22 = vadd.f32 %v3650_v40, %v2881_v32 }
 0x916   :  { %2957 = vrot.lane.b32.xlu1 %v5038_v21, %s4088_s24  ;;  %2959 = vrot.lane.b32.xlu0 %v5036_v25, %s4088_s24 }
 0x917   :  { %v2912_v58 = vpop.xlane.xlu1 %2911 }
 0x918   :  { %v2909_v54 = vpop.xlane.xlu0 %2908  ;;  %v5052_v28 = vadd.f32 %v3650_v40, %v2912_v58 }
 0x919   :  { %v5054_v34 = vadd.f32 %v3650_v40, %v2909_v54 }
 0x91a   :  { %2967 = vrot.lane.b32.xlu1 %v5046_v22, %s4089_s25  ;;  %2969 = vrot.lane.b32.xlu0 %v5044_v42, %s4089_s25 }
 0x91b   :  { %v2716_v15 = vpop.xlane.xlu1 %2715 }
 0x91c   :  { %v2713_v36 = vpop.xlane.xlu0 %2712  ;;  %v5060_v38 = vadd.f32 %v3650_v40, %v2716_v15 }
 0x91d   :  { %v5062_v56 = vadd.f32 %v3650_v40, %v2713_v36 }
 0x91e   :  { %2977 = vrot.lane.b32.xlu1 %v5054_v34, %s4090_s26  ;;  %2979 = vrot.lane.b32.xlu0 %v5052_v28, %s4090_s26 }
 0x974   :  { %v2920_v50 = vpop.permute.xlu1 %2919 }
 0x975   :  { %v2924_v59 = vmax.f32 %v5060_v38, %v2920_v50 }
 0x978   :  { %v2930_v61 = vpop.permute.xlu1 %2929 }
 0x979   :  { %v2934_v26 = vmax.f32 %v2924_v59, %v2930_v61 }
 0x97c   :  { %v2928_v63 = vpop.permute.xlu1 %2927  ;;  %v2940_v57 = vpop.permute.xlu0 %2939 }
 0x97d   :  { %v2944_v7 = vmax.f32 %v2934_v26, %v2940_v57 }
 0x980   :  { %v2938_v20 = vpop.permute.xlu1 %2937  ;;  %v2950_v45 = vpop.permute.xlu0 %2949 }
 0x981   :  { %v2954_v44 = vmax.f32 %v2944_v7, %v2950_v45 }
 0x984   :  { %v2948_v62 = vpop.permute.xlu1 %2947  ;;  %v2918_v30 = vpop.permute.xlu0 %2917 }
 0x985   :  { %v2923_v14 = vmax.f32 %v5062_v56, %v2918_v30 }
 0x987   :  { %v2933_v4 = vmax.f32 %v2923_v14, %v2928_v63 }
 0x988   :  { %v2958_v47 = vpop.permute.xlu1 %2957  ;;  %v2960_v39 = vpop.permute.xlu0 %2959 }
 0x989   :  { %v2943_v41 = vmax.f32 %v2933_v4, %v2938_v20  ;;  %v2964_v48 = vmax.f32 %v2954_v44, %v2960_v39 }
 0x98b   :  { %v2953_v46 = vmax.f32 %v2943_v41, %v2948_v62 }
 0x98c   :  { %v2968_v53 = vpop.permute.xlu1 %2967  ;;  %v2970_v43 = vpop.permute.xlu0 %2969 }
 0x98d   :  { %v2963_v55 = vmax.f32 %v2953_v46, %v2958_v47  ;;  %v2974_v5 = vmax.f32 %v2964_v48, %v2970_v43 }
 0x98f   :  { %v2973_v40 = vmax.f32 %v2963_v55, %v2968_v53 }
 0x990   :  { %v2978_v31 = vpop.permute.xlu1 %2977  ;;  %v2980_v32 = vpop.permute.xlu0 %2979 }
 0x991   :  { %v5066_v58 = vmax.f32 %v2973_v40, %v2978_v31  ;;  %v5068_v54 = vmax.f32 %v2974_v5, %v2980_v32 }
 0x993   :  { %v2985_v15 = vsub.f32 %v5062_v56, %v5066_v58  ;;  %v2986_v50 = vsub.f32 %v5060_v38, %v5068_v54  ;;  %2993 = vrot.lane.b32.xlu1 %v5066_v58, %s4091_s27  ;;  %2995 = vrot.lane.b32.xlu0 %v5068_v54, %s4091_s27  ;;  %s5356_s27 = smov 6  }
 0x997   :  { %3005 = vrot.lane.b32.xlu1 %v5066_v58, %s4092_s28  ;;  %3007 = vrot.lane.b32.xlu0 %v5068_v54, %s4092_s28  ;;  %s5357_s28 = smov 7  }
 0x99b   :  { %3017 = vrot.lane.b32.xlu1 %v5066_v58, %s5353_s10  ;;  %3019 = vrot.lane.b32.xlu0 %v5068_v54, %s5353_s10 }
 0x99f   :  { %3029 = vrot.lane.b32.xlu1 %v5066_v58, %s5354_s18  ;;  %3031 = vrot.lane.b32.xlu0 %v5068_v54, %s5354_s18 }
 0x9a3   :  { %3041 = vrot.lane.b32.xlu1 %v5066_v58, %s5355_s19  ;;  %3043 = vrot.lane.b32.xlu0 %v5068_v54, %s5355_s19 }
 0x9a7   :  { %3053 = vrot.lane.b32.xlu1 %v5066_v58, %s5356_s27  ;;  %3055 = vrot.lane.b32.xlu0 %v5068_v54, %s5356_s27 }
 0x9ab   :  { %3065 = vrot.lane.b32.xlu1 %v5066_v58, %s5357_s28  ;;  %3067 = vrot.lane.b32.xlu0 %v5068_v54, %s5357_s28 }
 0xa05   :  { %v2994_v36 = vpop.permute.xlu1 %2993  ;;  %v2996_v61 = vpop.permute.xlu0 %2995 }
 0xa06   :  { %v2999_v63 = vsub.f32 %v5028_v29, %v2994_v36  ;;  %v3000_v57 = vsub.f32 %v5004_v52, %v2996_v61 }
 0xa08   :  { %v3001_v20 = vmul.f32 1.442695, %v2999_v63  ;;  %v3003_v45 = vmul.f32 1.442695, %v3000_v57 }
 0xa09   :  { %v3006_v62 = vpop.permute.xlu1 %3005  ;;  %v3008_v30 = vpop.permute.xlu0 %3007 }
 0xa0a   :  { %4010 = vpow2.f32 %v3001_v20  ;;  %v3011_v59 = vsub.f32 %v5012_v49, %v3006_v62  ;;  %v3012_v14 = vsub.f32 %v5008_v37, %v3008_v30 }
 0xa0b   :  { %4012 = vpow2.f32 %v3003_v45 }
 0xa0c   :  { %v3013_v26 = vmul.f32 1.442695, %v3011_v59  ;;  %v3015_v4 = vmul.f32 1.442695, %v3012_v14 }
 0xa0d   :  { %v3018_v47 = vpop.permute.xlu1 %3017  ;;  %v3020_v39 = vpop.permute.xlu0 %3019 }
 0xa0e   :  { %4014 = vpow2.f32 %v3013_v26  ;;  %v3023_v7 = vsub.f32 %v5020_v12, %v3018_v47  ;;  %v3024_v29 = vsub.f32 %v5014_v51, %v3020_v39  ;;  %v2989_v47 = vmul.f32 1.442695, %v2986_v50 }
 0xa0f   :  { %4016 = vpow2.f32 %v3015_v4 }
 0xa10   :  { %v3025_v52 = vmul.f32 1.442695, %v3023_v7  ;;  %v3027_v41 = vmul.f32 1.442695, %v3024_v29 }
 0xa11   :  { %v3030_v44 = vpop.permute.xlu1 %3029  ;;  %v3032_v46 = vpop.permute.xlu0 %3031 }
 0xa12   :  { %4018 = vpow2.f32 %v3025_v52  ;;  %v3035_v49 = vsub.f32 %v5030_v23, %v3030_v44  ;;  %v3036_v37 = vsub.f32 %v5022_v27, %v3032_v46 }
 0xa13   :  { %4020 = vpow2.f32 %v3027_v41 }
 0xa14   :  { %v5110_v53 = vpop.eup %4010  ;;  %v3037_v43 = vmul.f32 1.442695, %v3035_v49  ;;  %v3039_v55 = vmul.f32 1.442695, %v3036_v37 }
 0xa15   :  { %v4013_v48 = vpop.eup %4012  ;;  %3079 = vrot.lane.b32.xlu1 %v5110_v53, %s4084_s20  ;;  %v3042_v51 = vpop.permute.xlu1 %3041 }
 0xa16   :  { %v3044_v12 = vpop.permute.xlu0 %3043  ;;  %4022 = vpow2.f32 %v3037_v43  ;;  %v3047_v40 = vsub.f32 %v5038_v21, %v3042_v51  ;;  %3081 = vrot.lane.b32.xlu0 %v4013_v48, %s4084_s20  ;;  %s4102_s20 = smov 8  }
 0xa17   :  { %v3048_v23 = vsub.f32 %v5036_v25, %v3044_v12  ;;  %4024 = vpow2.f32 %v3039_v55 }
 0xa18   :  { %v5117_v27 = vpop.eup %4014  ;;  %v3049_v5 = vmul.f32 1.442695, %v3047_v40 }
 0xa19   :  { %v3051_v31 = vmul.f32 1.442695, %v3048_v23  ;;  %v4017_v32 = vpop.eup %4016  ;;  %3089 = vrot.lane.b32.xlu1 %v5117_v27, %s4085_s21  ;;  %v3054_v36 = vpop.permute.xlu1 %3053 }
 0xa1a   :  { %v3056_v61 = vpop.permute.xlu0 %3055  ;;  %4026 = vpow2.f32 %v3049_v5  ;;  %v3059_v63 = vsub.f32 %v5046_v22, %v3054_v36  ;;  %3091 = vrot.lane.b32.xlu0 %v4017_v32, %s4085_s21  ;;  %s4103_s21 = smov 12  }
 0xa1b   :  { %v3060_v21 = vsub.f32 %v5044_v42, %v3056_v61  ;;  %4028 = vpow2.f32 %v3051_v31 }
 0xa1c   :  { %v4019_v25 = vpop.eup %4018  ;;  %v3061_v57 = vmul.f32 1.442695, %v3059_v63 }
 0xa1d   :  { %v3063_v20 = vmul.f32 1.442695, %v3060_v21  ;;  %v4021_v45 = vpop.eup %4020  ;;  %3099 = vrot.lane.b32.xlu1 %v4019_v25, %s4086_s22  ;;  %v3066_v62 = vpop.permute.xlu1 %3065 }
 0xa1e   :  { %v3068_v30 = vpop.permute.xlu0 %3067  ;;  %4030 = vpow2.f32 %v3061_v57  ;;  %v3071_v59 = vsub.f32 %v5054_v34, %v3066_v62  ;;  %3101 = vrot.lane.b32.xlu0 %v4021_v45, %s4086_s22  ;;  %s4105_s22 = smov 16  }
 0xa1f   :  { %v3072_v22 = vsub.f32 %v5052_v28, %v3068_v30  ;;  %4032 = vpow2.f32 %v3063_v20  ;;  %v2987_v28 = vmul.f32 1.442695, %v2985_v15 }
 0xa20   :  { %v4023_v14 = vpop.eup %4022  ;;  %v3073_v26 = vmul.f32 1.442695, %v3071_v59  ;;  %v3182_v59 = vrot.slane %v4875_v13, %v4356_v3 }
 0xa21   :  { %v3075_v42 = vmul.f32 1.442695, %v3072_v22  ;;  %v4025_v4 = vpop.eup %4024  ;;  %3109 = vrot.lane.b32.xlu1 %v4023_v14, %s4087_s23  ;;  %v3164_v22 = vrot.slane %v4875_v13, %v4353_v1 }
 0xa22   :  { %4034 = vpow2.f32 %v3073_v26  ;;  %3111 = vrot.lane.b32.xlu0 %v4025_v4, %s4087_s23  ;;  %v3202_v26 = vrot.slane %v4875_v13, %v4360_v6 }
 0xa23   :  { %4036 = vpow2.f32 %v3075_v42 }
 0xa24   :  { %v4027_v34 = vpop.eup %4026  ;;  %4038 = vpow2.f32 %v2989_v47 }
 0xa25   :  { %v4029_v39 = vpop.eup %4028  ;;  %3119 = vrot.lane.b32.xlu1 %v4027_v34, %s4088_s24  ;;  %4040 = vpow2.f32 %v2987_v28 }
 0xa26   :  { %3121 = vrot.lane.b32.xlu0 %v4029_v39, %s4088_s24 }
 0xa28   :  { %v4031_v7 = vpop.eup %4030 }
 0xa29   :  { %v4033_v29 = vpop.eup %4032  ;;  %3129 = vrot.lane.b32.xlu1 %v4031_v7, %s4089_s25 }
 0xa2a   :  { %3131 = vrot.lane.b32.xlu0 %v4033_v29, %s4089_s25 }
 0xa2c   :  { %v5140_v38 = vpop.eup %4034 }
 0xa2d   :  { %v5142_v54 = vpop.eup %4036  ;;  %3139 = vrot.lane.b32.xlu1 %v5140_v38, %s4090_s26 }
 0xa2e   :  { %3141 = vrot.lane.b32.xlu0 %v5142_v54, %s4090_s26  ;;  %v4039_v56 = vpop.eup %4038 }
 0xa2f   :  { %v4041_v58 = vpop.eup %4040 }
 0xa31   :  { %3172 = vperm.xlu1 %3894, %v4013_v48  }
 0xa32   :  { %3154 = vperm.xlu0 %3893, %v4039_v56  }
 0xa35   :  { %3895 = vset.pattern.permute.xlu1 %v4080_v8 }
 0xa36   :  { %3897 = vset.pattern.permute.xlu0 %v4083_v19  ;;  %3149 = vperm.xlu1 %3895, %v4041_v58  }
 0xa37   :  { %3212 = vperm.xlu0 %3897, %v4021_v45  }
 0xa3a   :  { %3896 = vset.pattern.permute.xlu1 %v4082_v18 }
 0xa3b   :  { %3898 = vset.pattern.permute.xlu0 %v4098_v0  ;;  %3192 = vperm.xlu1 %3896, %v4017_v32  }
 0xa3c   :  { %3232 = vperm.xlu0 %3898, %v4025_v4  }
 0xa3f   :  { %3901 = vset.pattern.permute.xlu1 %v4100_v35 }
 0xa40   :  { %3899 = vset.pattern.permute.xlu0 %v4081_v9  ;;  %3272 = vperm.xlu1 %3901, %v4033_v29  }
 0xa41   :  { %3168 = vperm.xlu0 %3899, %v5110_v53  }
 0xa44   :  { %3902 = vset.pattern.permute.xlu1 %v4082_v18 }
 0xa45   :  { %3900 = vset.pattern.permute.xlu0 %v4099_v33  ;;  %3188 = vperm.xlu1 %3902, %v5117_v27  }
 0xa46   :  { %3252 = vperm.xlu0 %3900, %v4029_v39   ;;  %v3222_v39 = vrot.slane %v4875_v13, %v4365_v17 }
 0xa49   :  { %3903 = vset.pattern.permute.xlu1 %v4083_v19 }
 0xa4a   :  { %3906 = vset.pattern.permute.xlu0 %v4100_v35  ;;  %3208 = vperm.xlu1 %3903, %v4019_v25  }
 0xa4b   :  { %3268 = vperm.xlu0 %3906, %v4031_v7   ;;  %v3178_v7 = vrot.slane %v4877_v10, %v4356_v3  ;;  %v3218_v3 = vrot.slane %v4877_v10, %v4365_v17 }
 0xa4e   :  { %3904 = vset.pattern.permute.xlu1 %v4098_v0 }
 0xa4f   :  { %3228 = vperm.xlu1 %3904, %v4023_v14   ;;  %3909 = vset.pattern.permute.xlu0 %v4080_v8 }
 0xa53   :  { %3905 = vset.pattern.permute.xlu1 %v4099_v33 }
 0xa54   :  { %3248 = vperm.xlu1 %3905, %v4027_v34  }
 0xa58   :  { %3907 = vset.pattern.permute.xlu1 %v4080_v8 }
 0xa87   :  { %v3080_v9 = vpop.permute.xlu1 %3079 }
 0xa88   :  { %v3082_v18 = vpop.permute.xlu0 %3081  ;;  %v3085_v37 = vadd.f32 %v4041_v58, %v3080_v9  ;;  %v3198_v58 = vrot.slane %v4877_v10, %v4360_v6  ;;  %v3242_v9 = vrot.slane %v4875_v13, %v4387_v11 }
 0xa89   :  { %v3086_v44 = vadd.f32 %v4039_v56, %v3082_v18  ;;  %v3262_v18 = vrot.slane %v4875_v13, %v4394_v16 }
 0xa8b   :  { %v3090_v15 = vpop.permute.xlu1 %3089 }
 0xa8c   :  { %v3092_v50 = vpop.permute.xlu0 %3091  ;;  %v3095_v43 = vadd.f32 %v3090_v15, %v3085_v37 }
 0xa8d   :  { %v3096_v46 = vadd.f32 %v3092_v50, %v3086_v44 }
 0xa8f   :  { %v3100_v52 = vpop.permute.xlu1 %3099 }
 0xa90   :  { %v3102_v19 = vpop.permute.xlu0 %3101  ;;  %v3105_v51 = vadd.f32 %v3100_v52, %v3095_v43 }
 0xa91   :  { %v3106_v53 = vadd.f32 %v3102_v19, %v3096_v46 }
 0xa93   :  { %v3110_v41 = vpop.permute.xlu1 %3109 }
 0xa94   :  { %v3112_v35 = vpop.permute.xlu0 %3111  ;;  %v3115_v12 = vadd.f32 %v3110_v41, %v3105_v51 }
 0xa95   :  { %v3116_v55 = vadd.f32 %v3112_v35, %v3106_v53  ;;  %v3258_v53 = vrot.slane %v4877_v10, %v4394_v16 }
 0xa97   :  { %v3120_v49 = vpop.permute.xlu1 %3119 }
 0xa98   :  { %v3122_v0 = vpop.permute.xlu0 %3121  ;;  %v3125_v27 = vadd.f32 %v3120_v49, %v3115_v12 }
 0xa99   :  { %v3126_v8 = vadd.f32 %v3122_v0, %v3116_v55  ;;  %v3282_v55 = vrot.slane %v4875_v13, %v4446_v60 }
 0xa9b   :  { %v3130_v33 = vpop.permute.xlu1 %3129 }
 0xa9c   :  { %v3132_v48 = vpop.permute.xlu0 %3131  ;;  %v3135_v32 = vadd.f32 %v3130_v33, %v3125_v27 }
 0xa9d   :  { %v3136_v40 = vadd.f32 %v3132_v48, %v3126_v8  ;;  %v3302_v8 = vrot.slane %v4875_v13, %v4451_v2 }
 0xa9f   :  { %v3140_v31 = vpop.permute.xlu1 %3139 }
 0xaa0   :  { %v3142_v23 = vpop.permute.xlu0 %3141  ;;  %v3145_v36 = vadd.f32 %v3140_v31, %v3135_v32 }
 0xaa1   :  { %v3146_v5 = vadd.f32 %v3142_v23, %v3136_v40  ;;  %v3278_v23 = vrot.slane %v4877_v10, %v4446_v60 }
 0xaa3   :  { %3314 = vperm.xlu1 %3907, %v3146_v5  }
 0xaa7   :  { %3309 = vperm.xlu1 %3907, %v3145_v36   ;;  %v3298_v36 = vrot.slane %v4877_v10, %v4451_v2 }
 0xaab   :  { %3908 = vset.pattern.permute.xlu1 %v4101_v24 }
 0xaac   :  { %3292 = vperm.xlu1 %3908, %v5142_v54  }
 0xab0   :  { %3288 = vperm.xlu1 %3908, %v5140_v38   ;;  %v3173_v61 = vpop.permute.xlu1 %3172  ;;  %v3160_v38 = vrot.slane %v4877_v10, %v4353_v1  ;;  %v3238_v1 = vrot.slane %v4877_v10, %v4387_v11 }
 0xab1   :  { %v3155_v57 = vpop.permute.xlu0 %3154  ;;  %v3184_v24 = vmul.f32 %v3182_v59, %v3173_v61 }
 0xab2   :  { %v3166_v14 = vmul.f32 %v3164_v22, %v3155_v57 }
 0xab4   :  { %v3186_v34 = vadd.f32 %v3184_v24, %v3166_v14 }
 0xab5   :  { %v3150_v63 = vpop.permute.xlu1 %3149 }
 0xab6   :  { %v3213_v45 = vpop.permute.xlu0 %3212  ;;  %v3165_v50 = vmul.f32 %v3160_v38, %v3150_v63 }
 0xab7   :  { %v3224_v54 = vmul.f32 %v3222_v39, %v3213_v45 }
 0xaba   :  { %v3193_v21 = vpop.permute.xlu1 %3192 }
 0xabb   :  { %v3233_v30 = vpop.permute.xlu0 %3232  ;;  %v3204_v4 = vmul.f32 %v3202_v26, %v3193_v21 }
 0xabc   :  { %v3244_v35 = vmul.f32 %v3242_v9, %v3233_v30 }
 0xabd   :  { %v3206_v28 = vadd.f32 %v3204_v4, %v3186_v34 }
 0xabf   :  { %v3273_v25 = vpop.permute.xlu1 %3272  ;;  %v3226_v52 = vadd.f32 %v3224_v54, %v3206_v28  ;;  %v3405_v28 = vld [vmem:[%s5338_s11] sm:$0xff] }
 0xac0   :  { %v3169_v47 = vpop.permute.xlu0 %3168  ;;  %v3284_v11 = vmul.f32 %v3282_v55, %v3273_v25 }
 0xac1   :  { %v3183_v56 = vmul.f32 %v3178_v7, %v3169_v47  ;;  %v3246_v49 = vadd.f32 %v3244_v35, %v3226_v52  ;;  %v4104_v47 = vmov 0.0|0.0   ;;  %v3406_v7 = vld [vmem:[%s5338_s11 + $0x8] sm:$0xff]  ;;  %v3495_v52 = vld [vmem:[%s5340_s13] sm:$0xff] }
 0xac2   :  { %3787 = vmatprep.subr.bf16.mxu0 %v4104_v47  ;;  %3793 = vmatprep.subr.bf16.mxu1 %v4104_v47 }
 0xac3   :  { %v3185_v44 = vadd.f32 %v3183_v56, %v3165_v50  ;;  %v3407_v56 = vld [vmem:[%s5338_s11 + $0x10] sm:$0xff]  ;;  %v4108_v50 = vmov 0.0  }
 0xac4   :  { %v3189_v20 = vpop.permute.xlu1 %3188  ;;  %3773 = vmatprep.mubr.msk.f32.mxu0 %vm4107_vm2, %v4108_v50  ;;  %3784 = vmatprep.mubr.msk.f32.mxu1 %vm4107_vm2, %v4108_v50 }
 0xac5   :  { %v3253_v15 = vpop.permute.xlu0 %3252  ;;  %v3203_v19 = vmul.f32 %v3198_v58, %v3189_v20  ;;  %v3408_v58 = vld [vmem:[%s5338_s11 + $0x18] sm:$0xff]  ;;  %s4110_s11 = smov 28  }
 0xac6   :  { %v3264_v6 = vmul.f32 %v3262_v18, %v3253_v15  ;;  %v3791_v15 = vpack.c.bf16 %v3408_v58, %v3407_v56 }
 0xac7   :  { %v3205_v0 = vadd.f32 %v3203_v19, %v3185_v44  ;;  %v3496_v19 = vld [vmem:[%s5340_s13 + $0x8] sm:$0xff] }
 0xac8   :  { %v3266_v17 = vadd.f32 %v3264_v6, %v3246_v49 }
 0xac9   :  { %v3209_v62 = vpop.permute.xlu1 %3208 }
 0xaca   :  { %v3223_v46 = vmul.f32 %v3218_v3, %v3209_v62  ;;  %v3269_v12 = vpop.permute.xlu0 %3268  ;;  %v3286_v16 = vadd.f32 %v3284_v11, %v3266_v17  ;;  %v3794_v3 = vpack.c.bf16 %v3496_v19, %v3495_v52 }
 0xacb   :  { %v3283_v31 = vmul.f32 %v3278_v23, %v3269_v12 }
 0xacc   :  { %v3225_v33 = vadd.f32 %v3223_v46, %v3205_v0  ;;  %3795 = vmatpush3.bf16.msra.mxu1 %v3794_v3 }
 0xacd   :  { %3796 = vmatprep.subr.bf16.mxu1 %v4104_v47 }
 0xace   :  { %v3229_v42 = vpop.permute.xlu1 %3228 }
 0xacf   :  { %v3243_v37 = vmul.f32 %v3238_v1, %v3229_v42 }
 0xad1   :  { %v3245_v51 = vadd.f32 %v3243_v37, %v3225_v33 }
 0xad3   :  { %v3249_v29 = vpop.permute.xlu1 %3248 }
 0xad4   :  { %v3263_v48 = vmul.f32 %v3258_v53, %v3249_v29  ;;  %v3788_v29 = vpack.c.bf16 %v3406_v7, %v3405_v28 }
 0xad6   :  { %v3265_v27 = vadd.f32 %v3263_v48, %v3245_v51  ;;  %3789 = vmatpush3.bf16.msra.mxu0 %v3788_v29 }
 0xad7   :  { %3790 = vmatprep.subr.bf16.mxu0 %v4104_v47 }
 0xad8   :  { %v3285_v25 = vadd.f32 %v3283_v31, %v3265_v27 }
 0xada   :  { %3792 = vmatpush3.bf16.msra.mxu0 %v3791_v15 }
 0xb22   :  { %v3315_v41 = vpop.permute.xlu1 %3314 }
 0xb23   :  { %4042 = vrcp.f32 %v3315_v41 }
 0xb26   :  { %v3310_v43 = vpop.permute.xlu1 %3309 }
 0xb27   :  { %4044 = vrcp.f32 %v3310_v43 }
 0xb2b   :  { %v3293_v40 = vpop.permute.xlu1 %3292 }
 0xb2c   :  { %v3304_v5 = vmul.f32 %v3302_v8, %v3293_v40 }
 0xb2d   :  { %v4043_v61 = vpop.eup %4042 }
 0xb2e   :  { %v3306_v32 = vadd.f32 %v3304_v5, %v3286_v16 }
 0xb2f   :  { %v3289_v63 = vpop.permute.xlu1 %3288 }
 0xb30   :  { %v3320_v21 = vmul.f32 %v4043_v61, %v3306_v32  ;;  %v3303_v57 = vmul.f32 %v3298_v36, %v3289_v63 }
 0xb31   :  { %v4045_v45 = vpop.eup %4044 }
 0xb32   :  { %v3654_v20 = vmul.f32 -1.442695, %v3320_v21  ;;  %v3305_v13 = vadd.f32 %v3303_v57, %v3285_v25 }
 0xb34   :  { %4046 = vpow2.f32 %v3654_v20  ;;  %v3318_v62 = vmul.f32 %v4045_v45, %v3305_v13  ;;  %v3497_v45 = vld [vmem:[%s5340_s13 + $0x10] sm:$0xff] }
 0xb36   :  { %v3653_v30 = vmul.f32 -1.442695, %v3318_v62  ;;  %v3498_v62 = vld [vmem:[%s5340_s13 + $0x18] sm:$0xff] }
 0xb38   :  { %4048 = vpow2.f32 %v3653_v30  ;;  %v3797_v30 = vpack.c.bf16 %v3498_v62, %v3497_v45 }
 0xb3a   :  { %3798 = vmatpush3.bf16.msra.mxu1 %v3797_v30 }
 0xb3e   :  { %v4047_v60 = vpop.eup %4046 }
 0xb3f   :  { %v3328_v59 = vadd.f32 1.0, %v4047_v60  ;;  %v4054_v60 = vld [vmem:[%s5327_s0 + $0x8] sm:$0xff] }
 0xb40   :  { %v104_v28 = vrot.slane %v4054_v60, 7 }
 0xb41   :  { %4050 = vrcp.f32 %v3328_v59  ;;  %v56_v59 = vrot.slane %v4054_v60, 1 }
 0xb42   :  { %v4049_v22 = vpop.eup %4048 }
 0xb43   :  { %v3327_v24 = vadd.f32 1.0, %v4049_v22  ;;  %v64_v22 = vrot.slane %v4054_v60, 2 }
 0xb45   :  { %4052 = vrcp.f32 %v3327_v24  ;;  %v4055_v24 = vld [vmem:[%s5327_s0] sm:$0xff] }
 0xb46   :  { %v79_v47 = vrot.slane %v4055_v24, 4  ;;  %v95_v7 = vrot.slane %v4055_v24, 6  ;;  %v103_v29 = vrot.slane %v4055_v24, 7 }
 0xb4b   :  { %v5199_v14 = vpop.eup %4050 }
 0xb4c   :  { %v3344_v2 = vrot.slane %v5199_v14, 2  ;;  %v3336_v10 = vrot.slane %v5199_v14, 1  ;;  %v3352_v42 = vrot.slane %v5199_v14, 3  ;;  %v3360_v34 = vrot.slane %v5199_v14, 4 }
 0xb4d   :  { %v3368_v38 = vrot.slane %v5199_v14, 5  ;;  %v3376_v9 = vrot.slane %v5199_v14, 6  ;;  %v3384_v41 = vrot.slane %v5199_v14, 7 }
 0xb4e   :  { %3347 = vrot.lane.b32.xlu1 %v3344_v2, %s4102_s20  ;;  %3339 = vrot.lane.b32.xlu0 %v3336_v10, %s5354_s18  ;;  %v72_v2 = vrot.slane %v4054_v60, 3  ;;  %v63_v10 = vrot.slane %v4055_v24, 2 }
 0xb4f   :  { %v5205_v26 = vpop.eup %4052 }
 0xb50   :  { %v3335_v4 = vrot.slane %v5205_v26, 1  ;;  %v3343_v39 = vrot.slane %v5205_v26, 2  ;;  %v3351_v54 = vrot.slane %v5205_v26, 3  ;;  %v3359_v18 = vrot.slane %v5205_v26, 4 }
 0xb51   :  { %v3367_v1 = vrot.slane %v5205_v26, 5  ;;  %v3383_v35 = vrot.slane %v5205_v26, 7  ;;  %v3375_v44 = vrot.slane %v5205_v26, 6 }
 0xb52   :  { %3355 = vrot.lane.b32.xlu1 %v3352_v42, %s4103_s21  ;;  %3337 = vrot.lane.b32.xlu0 %v3335_v4, %s5354_s18  ;;  %v71_v42 = vrot.slane %v4055_v24, 3  ;;  %v88_v4 = vrot.slane %v4054_v60, 5 }
 0xb56   :  { %3363 = vrot.lane.b32.xlu1 %v3360_v34, %s4105_s22  ;;  %3345 = vrot.lane.b32.xlu0 %v3343_v39, %s4102_s20  ;;  %v96_v34 = vrot.slane %v4054_v60, 6  ;;  %v87_v39 = vrot.slane %v4055_v24, 5 }
 0xb5a   :  { %3371 = vrot.lane.b32.xlu1 %v3368_v38, %s4106_s3  ;;  %3353 = vrot.lane.b32.xlu0 %v3351_v54, %s4103_s21  ;;  %v3655_v38 = vld [vmem:[%s5339_s12] ss:$0 sm:$0xff] }
 0xb5e   :  { %3379 = vrot.lane.b32.xlu1 %v3376_v9, %s4109_s8  ;;  %3361 = vrot.lane.b32.xlu0 %v3359_v18, %s4105_s22 }
 0xb62   :  { %3387 = vrot.lane.b32.xlu1 %v3384_v41, %s4110_s11  ;;  %3369 = vrot.lane.b32.xlu0 %v3367_v1, %s4106_s3 }
 0xb66   :  { %3385 = vrot.lane.b32.xlu1 %v3383_v35, %s4110_s11  ;;  %3377 = vrot.lane.b32.xlu0 %v3375_v44, %s4109_s8 }
 0xb6a   :  { %59 = vrot.lane.b32.xlu0 %v56_v59, %s5354_s18  ;;  %67 = vrot.lane.b32.xlu1 %v64_v22, %s4102_s20 }
 0xb6e   :  { %75 = vrot.lane.b32.xlu1 %v72_v2, %s4103_s21 }
 0xbc0   :  { %v3340_v6 = vpop.permute.xlu0 %3339  ;;  %v3348_v46 = vpop.permute.xlu1 %3347 }
 0xbc1   :  { %v3392_v17 = vsel %vm111_vm9, %v5199_v14, %v3340_v6  ;;  %v55_v14 = vrot.slane %v4055_v24, 1 }
 0xbc2   :  { %v3394_v11 = vsel %vm114_vm0, %v3392_v17, %v3348_v46 }
 0xbc3   :  { %57 = vrot.lane.b32.xlu0 %v55_v14, %s5354_s18 }
 0xbc4   :  { %v3338_v49 = vpop.permute.xlu0 %3337  ;;  %v3356_v0 = vpop.permute.xlu1 %3355 }
 0xbc5   :  { %v3396_v51 = vsel %vm117_vm3, %v3394_v11, %v3356_v0  ;;  %v3391_v12 = vsel %vm111_vm9, %v5205_v26, %v3338_v49  ;;  %v80_v26 = vrot.slane %v4054_v60, 4 }
 0xbc7   :  { %65 = vrot.lane.b32.xlu0 %v63_v10, %s4102_s20  ;;  %83 = vrot.lane.b32.xlu1 %v80_v26, %s4105_s22  ;;  %s4111_s20 = smov [#allocation2]  }
 0xbc8   :  { %v3346_v37 = vpop.permute.xlu0 %3345  ;;  %v3364_v53 = vpop.permute.xlu1 %3363 }
 0xbc9   :  { %v3398_v8 = vsel %vm120_vm5, %v3396_v51, %v3364_v53  ;;  %v3393_v16 = vsel %vm114_vm0, %v3391_v12, %v3346_v37 }
 0xbcb   :  { %73 = vrot.lane.b32.xlu0 %v71_v42, %s4103_s21  ;;  %91 = vrot.lane.b32.xlu1 %v88_v4, %s4106_s3  ;;  %s3593_s21 = sshll.u32 %s4111_s20, 4  ;;  %s3594_s21 = int_to_ptr.vmem [resolvable:$true] %s3593_s21 }
 0xbcc   :  { %v3354_v43 = vpop.permute.xlu0 %3353  ;;  %v3372_v55 = vpop.permute.xlu1 %3371  ;;  %p4061_p1 = scmp.lt.s32.totalorder %s3594_s21, %s3594_s21 }
 0xbcd   :  { %v3400_v40 = vsel %vm123_vm4, %v3398_v8, %v3372_v55  ;;  %v3395_v31 = vsel %vm117_vm3, %v3393_v16, %v3354_v43  ;;  %v3657_v16 = vld [vmem:[%s5341_s14] ss:$0 sm:$0xff] }
 0xbcf   :  { %81 = vrot.lane.b32.xlu0 %v79_v47, %s4105_s22  ;;  %99 = vrot.lane.b32.xlu1 %v96_v34, %s4109_s8  ;;  %s4056_s22 = scalar_lea.vmem %s3594_s21, 32 }
 0xbd0   :  { %v3362_v33 = vpop.permute.xlu0 %3361  ;;  %v3380_v48 = vpop.permute.xlu1 %3379  ;;  %p4057_p0 = scmp.ne.s32.totalorder %s3594_s21, %s4056_s22  ;;  %p4062_p2 = scmp.lt.s32.totalorder %s4056_s22, %s4056_s22 }
 0xbd1   :  { %v3402_v5 = vsel %vm126_vm6, %v3400_v40, %v3380_v48  ;;  %v3397_v36 = vsel %vm120_vm5, %v3395_v31, %v3362_v33 }
 0xbd2   :  { %p4063_p3 = por %p4062_p2, %p4061_p1 }
 0xbd3   :  { %89 = vrot.lane.b32.xlu0 %v87_v39, %s4106_s3  ;;  %107 = vrot.lane.b32.xlu1 %v104_v28, %s4110_s11 }
 0xbd4   :  { %v3370_v23 = vpop.permute.xlu0 %3369  ;;  %v3388_v27 = vpop.permute.xlu1 %3387  ;;  %p4064_p4 = pnand %p4063_p3, %p4057_p0 }
 0xbd5   :  { %v3404_v32 = vsel %vm129_vm7, %v3402_v5, %v3388_v27  ;;  %v3399_v61 = vsel %vm123_vm4, %v3397_v36, %v3370_v23 }
 0xbd6   :  { %v3418_v25 = vrot.slane %v3404_v32, 7 }
 0xbd7   :  { %97 = vrot.lane.b32.xlu0 %v95_v7, %s4109_s8  ;;  %105 = vrot.lane.b32.xlu1 %v103_v29, %s4110_s11 }
 0xbd8   :  { %v3378_v63 = vpop.permute.xlu0 %3377  ;;  %v3386_v21 = vpop.permute.xlu1 %3385 }
 0xbd9   :  { %v3401_v57 = vsel %vm126_vm6, %v3399_v61, %v3378_v63 }
 0xbda   :  { %v3403_v20 = vsel %vm129_vm7, %v3401_v57, %v3386_v21 }
 0xbdb   :  { %v3420_v13 = vsel %vm3419_vm8, %v3418_v25, %v3403_v20 }
 0xbdc   :  { %3774 = vmatmul.mubr.msk.f32.vlgmr.msra.gmra.mrb[12].mxu0 %vm3421_vm10, %v3420_v13  ;;  %v60_v18 = vpop.permute.xlu0 %59  ;;  %v68_v15 = vpop.permute.xlu1 %67 }
 0xbdd   :  { %v113_v1 = vsel %vm111_vm9, %v4054_v60, %v60_v18 }
 0xbde   :  { %v116_v44 = vsel %vm114_vm0, %v113_v1, %v68_v15 }
 0xbe0   :  { %v76_v52 = vpop.permute.xlu1 %75 }
 0xbe1   :  { %v119_v49 = vsel %vm117_vm3, %v116_v44, %v76_v52 }
 0xc35   :  { %v58_v50 = vpop.permute.xlu0 %57 }
 0xc36   :  { %v112_v6 = vsel %vm111_vm9, %v4055_v24, %v58_v50 }
 0xc39   :  { %v66_v19 = vpop.permute.xlu0 %65  ;;  %v84_v3 = vpop.permute.xlu1 %83 }
 0xc3a   :  { %v115_v0 = vsel %vm114_vm0, %v112_v6, %v66_v19  ;;  %v122_v53 = vsel %vm120_vm5, %v119_v49, %v84_v3  ;;  %vm3585_vm0 = vcmask 254976  }
 0xc3d   :  { %v74_v41 = vpop.permute.xlu0 %73  ;;  %v92_v35 = vpop.permute.xlu1 %91 }
 0xc3e   :  { %v118_v43 = vsel %vm117_vm3, %v115_v0, %v74_v41  ;;  %v125_v17 = vsel %vm123_vm4, %v122_v53, %v92_v35 }
 0xc41   :  { %v82_v46 = vpop.permute.xlu0 %81  ;;  %v100_v37 = vpop.permute.xlu1 %99 }
 0xc42   :  { %v121_v33 = vsel %vm120_vm5, %v118_v43, %v82_v46  ;;  %v128_v11 = vsel %vm126_vm6, %v125_v17, %v100_v37 }
 0xc45   :  { %v90_v55 = vpop.permute.xlu0 %89  ;;  %v108_v48 = vpop.permute.xlu1 %107 }
 0xc46   :  { %v124_v51 = vsel %vm123_vm4, %v121_v33, %v90_v55  ;;  %v131_v12 = vsel %vm129_vm7, %v128_v11, %v108_v48 }
 0xc47   :  { %v3581_v27 = vrot.slane %v131_v12, 7 }
 0xc49   :  { %v98_v8 = vpop.permute.xlu0 %97  ;;  %v106_v23 = vpop.permute.xlu1 %105 }
 0xc4a   :  { %v127_v40 = vsel %vm126_vm6, %v124_v51, %v98_v8 }
 0xc4b   :  { %v130_v5 = vsel %vm129_vm7, %v127_v40, %v106_v23 }
 0xc4c   :  { %v3582_v61 = vsel %vm3419_vm8, %v3581_v27, %v130_v5 }
 0xcaf   :  { %v3490_v54 = vpop.f32.mrb[12].mxu0 }
 0xcb0   :  { %v3491_v56 = vadd.f32 %v3655_v38, %v3490_v54  ;;  %v3775_v58 = vpop.f32.mrb[13].mxu0 }
 0xcb2   :  { %v3494_v9 = vmax.f32 %v3491_v56, 0.0 }
 0xcb4   :  { %3785 = vmatmul.mubr.msk.f32.vlgmr.msra.gmra.mrb[12].mxu1 %vm3421_vm10, %v3494_v9 }
 0xd87   :  { %v3575_v31 = vpop.f32.mrb[12].mxu1 }
 0xd88   :  { %v3576_v32 = vadd.f32 %v3657_v16, %v3575_v31  ;;  %v3786_v36 = vpop.f32.mrb[13].mxu1 }
 0xd8a   :  { %v3584_v63 = vadd.f32 %v3582_v61, %v3576_v32 }
 0xd8c   :  { %3586 = vst.msk [vmem:[#allocation2] sm:$0x3] %vm3585_vm0, %v3584_v63 }
 0xd8d   :  { %4067 = shalt.err (!%p4064_p4)
}
 0xd8e   :  { %s4068_s25 = scalar_lea.hbm %s5342_s15, 32 }
 0xd8f   :  { %p4069_p5 = scmp.ne.s32.totalorder %s5342_s15, %s4068_s25  ;;  %p4072_p6 = scmp.lt.u32.totalorder %s4068_s25, %s5342_s15 }
 0xd91   :  { %p4074_p7 = pnand %p4072_p6, %p4069_p5 }
 0xd93   :  { %4077 = shalt.err (!%p4074_p7)
}
 0xd94   :  { %3596 = dma.vmem_to_hbm [thread:$0]  %s3594_s21, 32, %s5342_s15, [#allocation3]  }
 0xd95   :  { %4078 = dma.done.wait [#allocation3], 32  }
 0xd96   :  { %4079 = vsyncadd [#allocation3], 4294967264 }
 0xd97   :  { %3600 = vsyncpa [#allocation3], 1 }

</bundles_post_ra>
